<compile_context>
chip_gen: v5e
topology: v5e:2x2
jax: 0.10.0
libtpu: 0.0.40
codegen_flags: <defaults>
</compile_context>

<pallas_src>
import jax
import jax.numpy as jnp
from jax.experimental import pallas as pl
from jax.experimental.pallas import tpu as pltpu


def _round_up(n, m):
    return ((n + m - 1) // m) * m


def _pad2(a, rows, cols):
    r, c = a.shape
    if (r, c) == (rows, cols):
        return a
    return jnp.zeros((rows, cols), a.dtype).at[:r, :c].set(a)


def _vmem_limit_bytes():
    # ~75% of physical VMEM: ~96 MiB on v5e/v6e (128 MiB), ~48 MiB on v7x (64 MiB).
    try:
        cap = int(pltpu.get_tpu_info().vmem_capacity_bytes)
    except Exception:
        cap = 64 * 1024 * 1024
    return max(32 * 1024 * 1024, (cap * 3) // 4)


def _stable_sigmoid_and_log1m(logits):
    """Returns (sigmoid(z), log(1 - sigmoid(z))) with no overflow and no -inf."""
    e = jnp.exp(-jnp.abs(logits))                        # in (0, 1]
    num = jnp.where(logits >= 0, 1.0, e)
    sig = num / (1.0 + e)
    # log(1 - sigmoid(z)) == -softplus(z) == -(max(z, 0) + log(1 + exp(-|z|)))
    log1m = -(jnp.maximum(logits, 0.0) + jnp.log(1.0 + e))
    return sig, log1m


def masked_omics_kernel(x_ref, w1_ref, b1_ref, w2_ref, b2_ref,
                        w3_ref, b3_ref, w4_ref, b4_ref,
                        out_ref, h1_acc):
    k = pl.program_id(1)

    @pl.when(k == 0)
    def _init():
        h1_acc[...] = jnp.zeros_like(h1_acc)

    # Partial masked fc_1 (mask pre-fused into W1; x pre-cast to bf16 in the
    # wrapper, so no per-step VPU cast in the reduction loop).
    h1_acc[...] += jnp.dot(x_ref[...], w1_ref[...],
                           preferred_element_type=jnp.float32)

    @pl.when(k == pl.num_programs(1) - 1)
    def _finalize():
        h1 = h1_acc[...] + b1_ref[...]                                   # (TB, D1) f32

        # Masked fc_2 (mask pre-fused into W2).
        # TODO(synk): W2 is block-diagonal (one (d1, d2) block per pathway); at
        # production pathway counts store it as (P, d1, d2) blocks to cut its
        # DMA/VMEM/MXU cost by P x (dense form kept here for layout safety at
        # small demo shapes).
        h2 = jnp.dot(h1.astype(jnp.bfloat16), w2_ref[...],
                     preferred_element_type=jnp.float32) + b2_ref[...]   # (TB, D2)

        # to_logits: Linear -> ReLU -> Dropout -> Linear
        h3 = jnp.dot(h2.astype(jnp.bfloat16), w3_ref[...],
                     preferred_element_type=jnp.float32) + b3_ref[...]   # (TB, H)
        h3 = jnp.maximum(h3, 0.0)
        # TODO(synk): dropout (p=0.1) is an inference-mode no-op inside the kernel.
        logits = jnp.dot(h3.astype(jnp.bfloat16), w4_ref[...],
                         preferred_element_type=jnp.float32) + b4_ref[...]  # (TB, C)

        hazards, log1m = _stable_sigmoid_and_log1m(logits)               # f32
        c = logits.shape[-1]

        # S = cumprod(1 - hazards) = exp(prefix-sum(log(1 - hazards))); C is
        # tiny, so a short unrolled add chain (VPU/EUP only, no padded MXU op).
        run = log1m[:, 0:1]
        s_cols = [jnp.exp(run)]
        for i in range(1, c):
            run = run + log1m[:, i:i + 1]
            s_cols.append(jnp.exp(run))

        # Single lane-packed store: [logits | hazards | S].
        out_ref[...] = jnp.concatenate([logits, hazards] + s_cols, axis=-1)


def masked_omics_forward(x_omic, params, *, max_block_b=256):
    """Returns (hazards, S, Y_hat, None, None), matching the PyTorch module."""
    w1, b1 = params["w1"], params["b1"]
    w2, b2 = params["w2"], params["b2"]
    w3, b3 = params["w3"], params["b3"]
    w4, b4 = params["w4"], params["b4"]
    K = params["input_dim"]
    block_k = params["block_k"]
    K_pad, D1 = w1.shape
    D2, H, C = b2.shape[-1], b3.shape[-1], b4.shape[-1]

    x = jnp.asarray(x_omic)
    single = x.ndim == 1
    if single:
        x = x[None, :]
    B = x.shape[0]
    assert x.shape[1] == K

    # Batch tiling: one big tile when the whole (8-padded) batch fits, so the
    # weights are streamed exactly once; otherwise max_block_b-row tiles
    # (multiple of 128 -> full MXU rows; batch tiles shard across v7x's 2 TCs).
    if _round_up(B, 8) <= max_block_b:
        block_b = _round_up(B, 8)
        B_pad = block_b
    else:
        block_b = max_block_b
        B_pad = _round_up(B, block_b)

    # Pre-cast to bf16 (halves x HBM/DMA traffic); only copy if padding needed.
    x_bf = x.astype(jnp.bfloat16)
    if (B_pad, K_pad) != (B, K):
        x_bf = jnp.zeros((B_pad, K_pad), jnp.bfloat16).at[:B, :K].set(x_bf)

    grid = (B_pad // block_b, K_pad // block_k)

    def call(single_buffer_consts):
        # Constant-index operands don't benefit from double-buffering; single-
        # buffering halves their VMEM residency (most valuable on v7x's 64 MiB).
        const_kw = {"pipeline_mode": pl.Buffered(1)} if single_buffer_consts else {}

        def const_spec(shape):
            return pl.BlockSpec(shape, lambda b, k: (0, 0), **const_kw)

        return pl.pallas_call(
            masked_omics_kernel,
            out_shape=jax.ShapeDtypeStruct((B_pad, 3 * C), jnp.float32),
            grid_spec=pltpu.PrefetchScalarGridSpec(
                num_scalar_prefetch=0,
                grid=grid,
                in_specs=[
                    pl.BlockSpec((block_b, block_k), lambda b, k: (b, k)),  # x tile
                    pl.BlockSpec((block_k, D1), lambda b, k: (k, 0)),       # fused W1 tile
                    const_spec((1, D1)),                                    # b1
                    const_spec((D1, D2)),                                   # fused W2
                    const_spec((1, D2)),                                    # b2
                    const_spec((D2, H)),                                    # W3
                    const_spec((1, H)),                                     # b3
                    const_spec((H, C)),                                     # W4
                    const_spec((1, C)),                                     # b4
                ],
                out_specs=pl.BlockSpec((block_b, 3 * C), lambda b, k: (b, 0)),
                scratch_shapes=[pltpu.VMEM((block_b, D1), jnp.float32)],
            ),
            compiler_params=pltpu.CompilerParams(
                # Batch tiles are independent -> "parallel" (shards across
                # v7x's 2 TensorCores when B spans multiple tiles); the
                # input_dim axis is a reduction -> "arbitrary" (innermost).
                dimension_semantics=("parallel", "arbitrary"),
                vmem_limit_bytes=_vmem_limit_bytes(),
            ),
        )(x_bf, w1, b1, w2, b2, w3, b3, w4, b4)

    try:
        packed = call(True)
    except Exception:
        # pipeline_mode=pl.Buffered not supported by this jax build; fall back
        # to default double-buffering (identical results, slightly more VMEM).
        packed = call(False)

    packed = packed[:B]
    logits = packed[:, 0:C]
    hazards = packed[:, C:2 * C]
    S = packed[:, 2 * C:3 * C]
    # torch.topk(logits, 1, dim=1)[1] == per-row argmax over classes.
    Y_hat = jnp.argmax(logits, axis=1, keepdims=True)
    return hazards, S, Y_hat, None, None


def init_params(key, input_dim, num_pathways, dim_per_path_1, dim_per_path_2,
                num_classes, *, block_k=1024):
    D1 = dim_per_path_1 * num_pathways
    D2 = dim_per_path_2 * num_pathways
    H = D2 // 4
    keys = jax.random.split(key, 9)

    # df_comp: deterministic synthetic binary gene -> pathway membership matrix.
    df_comp = (jax.random.uniform(keys[0], (input_dim, num_pathways)) < 0.3
               ).astype(jnp.float32)
    # mask_1 = repeat_interleave(df_comp, dim_per_path_1, dim=1)
    m1 = jnp.repeat(df_comp, dim_per_path_1, axis=1)                    # (input_dim, D1)
    # mask_2: (dim_per_path_1 x dim_per_path_2) blocks of ones on the diagonal.
    ri = jnp.arange(D1)[:, None] // dim_per_path_1
    ci = jnp.arange(D2)[None, :] // dim_per_path_2
    m2 = (ri == ci).astype(jnp.float32)                                 # (D1, D2)

    def xavier_normal(k, fan_in, fan_out):
        std = (2.0 / (fan_in + fan_out)) ** 0.5
        return std * jax.random.normal(k, (fan_in, fan_out), jnp.float32)

    # Fuse the masks into the weights once (the kernel never sees the masks).
    w1 = xavier_normal(keys[1], input_dim, D1) * m1
    b1 = jax.random.uniform(keys[2], (1, D1), jnp.float32)              # torch.rand
    w2 = xavier_normal(keys[3], D1, D2) * m2
    b2 = jax.random.uniform(keys[4], (1, D2), jnp.float32)              # torch.rand

    # to_logits Linear layers (PyTorch default-style uniform init, stored (in, out)).
    lim3 = 1.0 / (D2 ** 0.5)
    w3 = jax.random.uniform(keys[5], (D2, H), jnp.float32, -lim3, lim3)
    b3 = jax.random.uniform(keys[6], (1, H), jnp.float32, -lim3, lim3)
    lim4 = 1.0 / (H ** 0.5)
    w4 = jax.random.uniform(keys[7], (H, num_classes), jnp.float32, -lim4, lim4)
    b4 = jax.random.uniform(keys[8], (1, num_classes), jnp.float32, -lim4, lim4)

    # Pad feature dims to lane multiples (no-op at demo shapes) so all weight
    # tiles are lane-dense; zero padding is forward-equivalent.
    D1p = _round_up(D1, 128)
    D2p = _round_up(D2, 128)
    Hp = _round_up(H, 128)
    w1 = _pad2(w1, input_dim, D1p)
    b1 = _pad2(b1, 1, D1p)
    w2 = _pad2(w2, D1p, D2p)
    b2 = _pad2(b2, 1, D2p)
    w3 = _pad2(w3, D2p, Hp)
    b3 = _pad2(b3, 1, Hp)
    w4 = _pad2(w4, Hp, num_classes)

    # Pad the reduction (input_dim) axis of W1 once at init time, to an exact
    # multiple of the K tile (no per-call padded-W1 copies).
    assert block_k % 128 == 0
    bk = min(block_k, _round_up(input_dim, 128))
    K_pad = _round_up(input_dim, bk)
    w1 = _pad2(w1, K_pad, D1p)

    # Matmul operands stored in bf16; biases stay f32 for the f32 epilogue.
    return dict(
        w1=w1.astype(jnp.bfloat16), b1=b1,
        w2=w2.astype(jnp.bfloat16), b2=b2,
        w3=w3.astype(jnp.bfloat16), b3=b3,
        w4=w4.astype(jnp.bfloat16), b4=b4,
        input_dim=input_dim, block_k=bk,
    )


def masked_omics_reference(x_omic, params):
    """Pure-JAX reference with the same bf16-matmul / f32-accumulate math."""
    x = jnp.asarray(x_omic, jnp.float32)
    if x.ndim == 1:
        x = x[None, :]
    K = x.shape[-1]
    h1 = jnp.dot(x.astype(jnp.bfloat16), params["w1"][:K],
                 preferred_element_type=jnp.float32) + params["b1"]
    h2 = jnp.dot(h1.astype(jnp.bfloat16), params["w2"],
                 preferred_element_type=jnp.float32) + params["b2"]
    h3 = jnp.maximum(jnp.dot(h2.astype(jnp.bfloat16), params["w3"],
                             preferred_element_type=jnp.float32) + params["b3"], 0.0)
    logits = jnp.dot(h3.astype(jnp.bfloat16), params["w4"],
                     preferred_element_type=jnp.float32) + params["b4"]
    hazards, log1m = _stable_sigmoid_and_log1m(logits)
    S = jnp.exp(jnp.cumsum(log1m, axis=-1))
    return hazards, S


if __name__ == "__main__":
    key = jax.random.PRNGKey(0)
    k_x, k_p = jax.random.split(key)

    # Small, lane-dense demo shapes: D1 = 256, D2 = 512, hidden = 128, C = 4.
    input_dim = 512
    num_pathways = 32
    dim_per_path_1 = 8
    dim_per_path_2 = 16
    num_classes = 4
    batch = 16

    params = init_params(k_p, input_dim, num_pathways,
                         dim_per_path_1, dim_per_path_2, num_classes)

    # Batched forward: single batch tile -> weights streamed once per call.
    x_batch = jax.random.normal(k_x, (batch, input_dim), jnp.float32)
    hazards, S, Y_hat, _, _ = masked_omics_forward(x_batch, params)
    jax.block_until_ready((hazards, S, Y_hat))
    assert hazards.shape == (batch, num_classes)
    assert S.shape == (batch, num_classes)
    assert Y_hat.shape == (batch, 1)

    # Single-sample path (matches the original module's x_omic vector input).
    h1s, S1, Y1, _, _ = masked_omics_forward(x_batch[0], params)
    jax.block_until_ready((h1s, S1, Y1))
    assert h1s.shape == (1, num_classes) and S1.shape == (1, num_classes)
    assert Y1.shape == (1, 1)

    # Cross-check against a pure-JAX reference (same bf16/f32 math).
    ref_h, ref_S = masked_omics_reference(x_batch, params)
    assert jnp.allclose(hazards, ref_h, atol=1e-2, rtol=1e-2)
    assert jnp.allclose(S, ref_S, atol=1e-2, rtol=1e-2)
    assert jnp.allclose(h1s[0], ref_h[0], atol=1e-2, rtol=1e-2)

    print("KERNEL_OK")
</pallas_src>

<mosaic_0001>
module attributes {stable_mosaic.version = 11 : i64} {
  func.func @masked_omics_kernel(%arg0: i32, %arg1: i32, %arg2: memref<16x512xbf16, #tpu.memory_space<vmem>>, %arg3: memref<512x256xbf16, #tpu.memory_space<vmem>>, %arg4: memref<1x256xf32, #tpu.memory_space<vmem>>, %arg5: memref<256x512xbf16, #tpu.memory_space<vmem>>, %arg6: memref<1x512xf32, #tpu.memory_space<vmem>>, %arg7: memref<512x128xbf16, #tpu.memory_space<vmem>>, %arg8: memref<1x128xf32, #tpu.memory_space<vmem>>, %arg9: memref<128x4xbf16, #tpu.memory_space<vmem>>, %arg10: memref<1x4xf32, #tpu.memory_space<vmem>>, %arg11: memref<16x12xf32, #tpu.memory_space<vmem>>, %arg12: memref<16x256xf32, #tpu.memory_space<vmem>>) attributes {dimension_semantics = [#tpu.dimension_semantics<parallel>, #tpu.dimension_semantics<arbitrary>], iteration_bounds = array<i64: 1, 1>, scalar_prefetch = 0 : i64, scratch_operands = 1 : i64, tpu.core_type = #tpu.core_type<tc>, window_params = [{transform_indices = @transform_0, window_bounds = array<i64: 16, 512>}, {transform_indices = @transform_1, window_bounds = array<i64: 512, 256>}, {pipeline_mode = #tpu.pipeline_mode<synchronous>, transform_indices = @transform_2, window_bounds = array<i64: 1, 256>}, {pipeline_mode = #tpu.pipeline_mode<synchronous>, transform_indices = @transform_3, window_bounds = array<i64: 256, 512>}, {pipeline_mode = #tpu.pipeline_mode<synchronous>, transform_indices = @transform_4, window_bounds = array<i64: 1, 512>}, {pipeline_mode = #tpu.pipeline_mode<synchronous>, transform_indices = @transform_5, window_bounds = array<i64: 512, 128>}, {pipeline_mode = #tpu.pipeline_mode<synchronous>, transform_indices = @transform_6, window_bounds = array<i64: 1, 128>}, {pipeline_mode = #tpu.pipeline_mode<synchronous>, transform_indices = @transform_7, window_bounds = array<i64: 128, 4>}, {pipeline_mode = #tpu.pipeline_mode<synchronous>, transform_indices = @transform_8, window_bounds = array<i64: 1, 4>}, {transform_indices = @transform_9, window_bounds = array<i64: 16, 12>}]} {
    %c0_i32 = arith.constant 0 : i32
    %0 = arith.cmpi eq, %arg1, %c0_i32 : i32
    %1 = arith.extui %0 : i1 to i32
    %c0_i32_0 = arith.constant 0 : i32
    %2 = arith.cmpi ne, %1, %c0_i32_0 : i32
    scf.if %2 {
      %cst_10 = arith.constant 0.000000e+00 : f32
      %12 = vector.broadcast %cst_10 : f32 to vector<16x256xf32>
      %c0_11 = arith.constant 0 : index
      %c0_12 = arith.constant 0 : index
      %13 = vector.load %arg12[%c0_11, %c0_12] : memref<16x256xf32, #tpu.memory_space<vmem>>, vector<16x256xf32>
      tpu.vector_store %arg12[%c0_11, %c0_12], %12 {strides = array<i32>} : memref<16x256xf32, #tpu.memory_space<vmem>>, vector<16x256xf32>,
    } else {
    }
    %c0 = arith.constant 0 : index
    %c0_1 = arith.constant 0 : index
    %3 = vector.load %arg12[%c0, %c0_1] : memref<16x256xf32, #tpu.memory_space<vmem>>, vector<16x256xf32>
    %c0_2 = arith.constant 0 : index
    %c0_3 = arith.constant 0 : index
    %4 = vector.load %arg2[%c0_2, %c0_3] : memref<16x512xbf16, #tpu.memory_space<vmem>>, vector<16x512xbf16>
    %c0_4 = arith.constant 0 : index
    %c0_5 = arith.constant 0 : index
    %5 = vector.load %arg3[%c0_4, %c0_5] : memref<512x256xbf16, #tpu.memory_space<vmem>>, vector<512x256xbf16>
    %cst = arith.constant dense<0.000000e+00> : vector<16x256xf32>
    %6 = tpu.matmul %4, %5, %cst {dimension_numbers = #tpu.dot_dimension_numbers<[1], [0], [0], [1], [0, 0, 1, 1], [], []>} : vector<16x512xbf16>, vector<512x256xbf16>, vector<16x256xf32> -> vector<16x256xf32>
    %7 = arith.addf %3, %6 : vector<16x256xf32>
    %c0_6 = arith.constant 0 : index
    %c0_7 = arith.constant 0 : index
    %8 = vector.load %arg12[%c0_6, %c0_7] : memref<16x256xf32, #tpu.memory_space<vmem>>, vector<16x256xf32>
    tpu.vector_store %arg12[%c0_6, %c0_7], %7 {strides = array<i32>} : memref<16x256xf32, #tpu.memory_space<vmem>>, vector<16x256xf32>,
    %c0_i32_8 = arith.constant 0 : i32
    %9 = arith.cmpi eq, %arg1, %c0_i32_8 : i32
    %10 = arith.extui %9 : i1 to i32
    %c0_i32_9 = arith.constant 0 : i32
    %11 = arith.cmpi ne, %10, %c0_i32_9 : i32
    scf.if %11 {
      %c0_10 = arith.constant 0 : index
      %c0_11 = arith.constant 0 : index
      %12 = vector.load %arg12[%c0_10, %c0_11] : memref<16x256xf32, #tpu.memory_space<vmem>>, vector<16x256xf32>
      %c0_12 = arith.constant 0 : index
      %c0_13 = arith.constant 0 : index
      %13 = vector.load %arg4[%c0_12, %c0_13] : memref<1x256xf32, #tpu.memory_space<vmem>>, vector<1x256xf32>
      %14 = vector.broadcast %13 : vector<1x256xf32> to vector<16x256xf32>
      %15 = arith.addf %12, %14 : vector<16x256xf32>
      %16 = arith.truncf %15 : vector<16x256xf32> to vector<16x256xbf16>
      %c0_14 = arith.constant 0 : index
      %c0_15 = arith.constant 0 : index
      %17 = vector.load %arg5[%c0_14, %c0_15] : memref<256x512xbf16, #tpu.memory_space<vmem>>, vector<256x512xbf16>
      %cst_16 = arith.constant dense<0.000000e+00> : vector<16x512xf32>
      %18 = tpu.matmul %16, %17, %cst_16 {dimension_numbers = #tpu.dot_dimension_numbers<[1], [0], [0], [1], [0, 0, 1, 1], [], []>} : vector<16x256xbf16>, vector<256x512xbf16>, vector<16x512xf32> -> vector<16x512xf32>
      %c0_17 = arith.constant 0 : index
      %c0_18 = arith.constant 0 : index
      %19 = vector.load %arg6[%c0_17, %c0_18] : memref<1x512xf32, #tpu.memory_space<vmem>>, vector<1x512xf32>
      %20 = vector.broadcast %19 : vector<1x512xf32> to vector<16x512xf32>
      %21 = arith.addf %18, %20 : vector<16x512xf32>
      %22 = arith.truncf %21 : vector<16x512xf32> to vector<16x512xbf16>
      %c0_19 = arith.constant 0 : index
      %c0_20 = arith.constant 0 : index
      %23 = vector.load %arg7[%c0_19, %c0_20] : memref<512x128xbf16, #tpu.memory_space<vmem>>, vector<512x128xbf16>
      %cst_21 = arith.constant dense<0.000000e+00> : vector<16x128xf32>
      %24 = tpu.matmul %22, %23, %cst_21 {dimension_numbers = #tpu.dot_dimension_numbers<[1], [0], [0], [1], [0, 0, 1, 1], [], []>} : vector<16x512xbf16>, vector<512x128xbf16>, vector<16x128xf32> -> vector<16x128xf32>
      %c0_22 = arith.constant 0 : index
      %c0_23 = arith.constant 0 : index
      %25 = vector.load %arg8[%c0_22, %c0_23] : memref<1x128xf32, #tpu.memory_space<vmem>>, vector<1x128xf32>
      %26 = vector.broadcast %25 : vector<1x128xf32> to vector<16x128xf32>
      %27 = arith.addf %24, %26 : vector<16x128xf32>
      %cst_24 = arith.constant 0.000000e+00 : f32
      %28 = vector.broadcast %cst_24 : f32 to vector<16x128xf32>
      %29 = arith.maximumf %27, %28 : vector<16x128xf32>
      %30 = arith.truncf %29 : vector<16x128xf32> to vector<16x128xbf16>
      %c0_25 = arith.constant 0 : index
      %c0_26 = arith.constant 0 : index
      %31 = vector.load %arg9[%c0_25, %c0_26] : memref<128x4xbf16, #tpu.memory_space<vmem>>, vector<128x4xbf16>
      %cst_27 = arith.constant dense<0.000000e+00> : vector<16x4xf32>
      %32 = tpu.matmul %30, %31, %cst_27 {dimension_numbers = #tpu.dot_dimension_numbers<[1], [0], [0], [1], [0, 0, 1, 1], [], []>} : vector<16x128xbf16>, vector<128x4xbf16>, vector<16x4xf32> -> vector<16x4xf32>
      %c0_28 = arith.constant 0 : index
      %c0_29 = arith.constant 0 : index
      %33 = vector.load %arg10[%c0_28, %c0_29] : memref<1x4xf32, #tpu.memory_space<vmem>>, vector<1x4xf32>
      %34 = vector.broadcast %33 : vector<1x4xf32> to vector<16x4xf32>
      %35 = arith.addf %32, %34 : vector<16x4xf32>
      %36 = math.absf %35 : vector<16x4xf32>
      %cst_30 = arith.constant 0.000000e+00 : f32
      %37 = vector.broadcast %cst_30 : f32 to vector<16x4xf32>
      %38 = arith.subf %37, %36 : vector<16x4xf32>
      %39 = math.exp %38 : vector<16x4xf32>
      %cst_31 = arith.constant 0.000000e+00 : f32
      %40 = vector.broadcast %cst_31 : f32 to vector<16x4xf32>
      %41 = arith.cmpf oge, %35, %40 : vector<16x4xf32>
      %cst_32 = arith.constant 1.000000e+00 : f32
      %42 = vector.broadcast %cst_32 : f32 to vector<16x4xf32>
      %43 = arith.select %41, %42, %39 : vector<16x4xi1>, vector<16x4xf32>
      %cst_33 = arith.constant 1.000000e+00 : f32
      %44 = vector.broadcast %cst_33 : f32 to vector<16x4xf32>
      %45 = arith.addf %44, %39 : vector<16x4xf32>
      %46 = arith.divf %43, %45 : vector<16x4xf32>
      %cst_34 = arith.constant 0.000000e+00 : f32
      %47 = vector.broadcast %cst_34 : f32 to vector<16x4xf32>
      %48 = arith.maximumf %35, %47 : vector<16x4xf32>
      %cst_35 = arith.constant 1.000000e+00 : f32
      %49 = vector.broadcast %cst_35 : f32 to vector<16x4xf32>
      %50 = arith.addf %49, %39 : vector<16x4xf32>
      %51 = math.log %50 : vector<16x4xf32>
      %52 = arith.addf %48, %51 : vector<16x4xf32>
      %cst_36 = arith.constant 0.000000e+00 : f32
      %53 = vector.broadcast %cst_36 : f32 to vector<16x4xf32>
      %54 = arith.subf %53, %52 : vector<16x4xf32>
      %55 = vector.extract_strided_slice %54 {offsets = [0, 0], sizes = [16, 1], strides = [1, 1]} : vector<16x4xf32> to vector<16x1xf32>
      %56 = math.exp %55 : vector<16x1xf32>
      %57 = vector.extract_strided_slice %54 {offsets = [0, 1], sizes = [16, 1], strides = [1, 1]} : vector<16x4xf32> to vector<16x1xf32>
      %58 = arith.addf %55, %57 : vector<16x1xf32>
      %59 = math.exp %58 : vector<16x1xf32>
      %60 = vector.extract_strided_slice %54 {offsets = [0, 2], sizes = [16, 1], strides = [1, 1]} : vector<16x4xf32> to vector<16x1xf32>
      %61 = arith.addf %58, %60 : vector<16x1xf32>
      %62 = math.exp %61 : vector<16x1xf32>
      %63 = vector.extract_strided_slice %54 {offsets = [0, 3], sizes = [16, 1], strides = [1, 1]} : vector<16x4xf32> to vector<16x1xf32>
      %64 = arith.addf %61, %63 : vector<16x1xf32>
      %65 = math.exp %64 : vector<16x1xf32>
      %66 = tpu.concatenate %35, %46, %56, %59, %62, %65 in 1 : vector<16x4xf32>, vector<16x4xf32>, vector<16x1xf32>, vector<16x1xf32>, vector<16x1xf32>, vector<16x1xf32> -> vector<16x12xf32>
      %c0_37 = arith.constant 0 : index
      %c0_38 = arith.constant 0 : index
      %67 = vector.load %arg11[%c0_37, %c0_38] : memref<16x12xf32, #tpu.memory_space<vmem>>, vector<16x12xf32>
      tpu.vector_store %arg11[%c0_37, %c0_38], %66 {strides = array<i32>} : memref<16x12xf32, #tpu.memory_space<vmem>>, vector<16x12xf32>,
    } else {
    }
    return
  }
  func.func @transform_0(%arg0: i32, %arg1: i32) -> (i32, i32) {
    %c0_i32 = arith.constant 0 : i32
    return %arg0, %arg1 : i32, i32
  }
  func.func @transform_1(%arg0: i32, %arg1: i32) -> (i32, i32) {
    %c0_i32 = arith.constant 0 : i32
    %c0_i32_0 = arith.constant 0 : i32
    return %arg1, %c0_i32 : i32, i32
  }
  func.func @transform_2(%arg0: i32, %arg1: i32) -> (i32, i32) {
    %c0_i32 = arith.constant 0 : i32
    %c0_i32_0 = arith.constant 0 : i32
    %c0_i32_1 = arith.constant 0 : i32
    return %c0_i32, %c0_i32_0 : i32, i32
  }
  func.func @transform_3(%arg0: i32, %arg1: i32) -> (i32, i32) {
    %c0_i32 = arith.constant 0 : i32
    %c0_i32_0 = arith.constant 0 : i32
    %c0_i32_1 = arith.constant 0 : i32
    return %c0_i32, %c0_i32_0 : i32, i32
  }
  func.func @transform_4(%arg0: i32, %arg1: i32) -> (i32, i32) {
    %c0_i32 = arith.constant 0 : i32
    %c0_i32_0 = arith.constant 0 : i32
    %c0_i32_1 = arith.constant 0 : i32
    return %c0_i32, %c0_i32_0 : i32, i32
  }
  func.func @transform_5(%arg0: i32, %arg1: i32) -> (i32, i32) {
    %c0_i32 = arith.constant 0 : i32
    %c0_i32_0 = arith.constant 0 : i32
    %c0_i32_1 = arith.constant 0 : i32
    return %c0_i32, %c0_i32_0 : i32, i32
  }
  func.func @transform_6(%arg0: i32, %arg1: i32) -> (i32, i32) {
    %c0_i32 = arith.constant 0 : i32
    %c0_i32_0 = arith.constant 0 : i32
    %c0_i32_1 = arith.constant 0 : i32
    return %c0_i32, %c0_i32_0 : i32, i32
  }
  func.func @transform_7(%arg0: i32, %arg1: i32) -> (i32, i32) {
    %c0_i32 = arith.constant 0 : i32
    %c0_i32_0 = arith.constant 0 : i32
    %c0_i32_1 = arith.constant 0 : i32
    return %c0_i32, %c0_i32_0 : i32, i32
  }
  func.func @transform_8(%arg0: i32, %arg1: i32) -> (i32, i32) {
    %c0_i32 = arith.constant 0 : i32
    %c0_i32_0 = arith.constant 0 : i32
    %c0_i32_1 = arith.constant 0 : i32
    return %c0_i32, %c0_i32_0 : i32, i32
  }
  func.func @transform_9(%arg0: i32, %arg1: i32) -> (i32, i32) {
    %c0_i32 = arith.constant 0 : i32
    %c0_i32_0 = arith.constant 0 : i32
    return %arg0, %c0_i32 : i32, i32
  }
}

module attributes {stable_mosaic.version = 11 : i64} {
  func.func @masked_omics_kernel(%arg0: i32, %arg1: i32, %arg2: memref<16x512xbf16, #tpu.memory_space<vmem>>, %arg3: memref<512x256xbf16, #tpu.memory_space<vmem>>, %arg4: memref<1x256xf32, #tpu.memory_space<vmem>>, %arg5: memref<256x512xbf16, #tpu.memory_space<vmem>>, %arg6: memref<1x512xf32, #tpu.memory_space<vmem>>, %arg7: memref<512x128xbf16, #tpu.memory_space<vmem>>, %arg8: memref<1x128xf32, #tpu.memory_space<vmem>>, %arg9: memref<128x4xbf16, #tpu.memory_space<vmem>>, %arg10: memref<1x4xf32, #tpu.memory_space<vmem>>, %arg11: memref<16x12xf32, #tpu.memory_space<vmem>>, %arg12: memref<16x256xf32, #tpu.memory_space<vmem>>) attributes {dimension_semantics = [#tpu.dimension_semantics<parallel>, #tpu.dimension_semantics<arbitrary>], iteration_bounds = array<i64: 1, 1>, scalar_prefetch = 0 : i64, scratch_operands = 1 : i64, tpu.core_type = #tpu.core_type<tc>, window_params = [{transform_indices = @transform_0, window_bounds = array<i64: 16, 512>}, {transform_indices = @transform_1, window_bounds = array<i64: 512, 256>}, {pipeline_mode = #tpu.pipeline_mode<synchronous>, transform_indices = @transform_2, window_bounds = array<i64: 1, 256>}, {pipeline_mode = #tpu.pipeline_mode<synchronous>, transform_indices = @transform_3, window_bounds = array<i64: 256, 512>}, {pipeline_mode = #tpu.pipeline_mode<synchronous>, transform_indices = @transform_4, window_bounds = array<i64: 1, 512>}, {pipeline_mode = #tpu.pipeline_mode<synchronous>, transform_indices = @transform_5, window_bounds = array<i64: 512, 128>}, {pipeline_mode = #tpu.pipeline_mode<synchronous>, transform_indices = @transform_6, window_bounds = array<i64: 1, 128>}, {pipeline_mode = #tpu.pipeline_mode<synchronous>, transform_indices = @transform_7, window_bounds = array<i64: 128, 4>}, {pipeline_mode = #tpu.pipeline_mode<synchronous>, transform_indices = @transform_8, window_bounds = array<i64: 1, 4>}, {transform_indices = @transform_9, window_bounds = array<i64: 16, 12>}]} {
    %c0_i32 = arith.constant 0 : i32
    %0 = arith.cmpi eq, %arg1, %c0_i32 : i32
    %1 = arith.extui %0 : i1 to i32
    %c0_i32_0 = arith.constant 0 : i32
    %2 = arith.cmpi ne, %1, %c0_i32_0 : i32
    scf.if %2 {
      %cst_10 = arith.constant 0.000000e+00 : f32
      %12 = vector.broadcast %cst_10 : f32 to vector<16x256xf32>
      %c0_11 = arith.constant 0 : index
      %c0_12 = arith.constant 0 : index
      %13 = vector.load %arg12[%c0_11, %c0_12] : memref<16x256xf32, #tpu.memory_space<vmem>>, vector<16x256xf32>
      tpu.vector_store %arg12[%c0_11, %c0_12], %12 {strides = array<i32>} : memref<16x256xf32, #tpu.memory_space<vmem>>, vector<16x256xf32>,
    } else {
    }
    %c0 = arith.constant 0 : index
    %c0_1 = arith.constant 0 : index
    %3 = vector.load %arg12[%c0, %c0_1] : memref<16x256xf32, #tpu.memory_space<vmem>>, vector<16x256xf32>
    %c0_2 = arith.constant 0 : index
    %c0_3 = arith.constant 0 : index
    %4 = vector.load %arg2[%c0_2, %c0_3] : memref<16x512xbf16, #tpu.memory_space<vmem>>, vector<16x512xbf16>
    %c0_4 = arith.constant 0 : index
    %c0_5 = arith.constant 0 : index
    %5 = vector.load %arg3[%c0_4, %c0_5] : memref<512x256xbf16, #tpu.memory_space<vmem>>, vector<512x256xbf16>
    %cst = arith.constant dense<0.000000e+00> : vector<16x256xf32>
    %6 = tpu.matmul %4, %5, %cst {dimension_numbers = #tpu.dot_dimension_numbers<[1], [0], [0], [1], [0, 0, 1, 1], [], []>} : vector<16x512xbf16>, vector<512x256xbf16>, vector<16x256xf32> -> vector<16x256xf32>
    %7 = arith.addf %3, %6 : vector<16x256xf32>
    %c0_6 = arith.constant 0 : index
    %c0_7 = arith.constant 0 : index
    %8 = vector.load %arg12[%c0_6, %c0_7] : memref<16x256xf32, #tpu.memory_space<vmem>>, vector<16x256xf32>
    tpu.vector_store %arg12[%c0_6, %c0_7], %7 {strides = array<i32>} : memref<16x256xf32, #tpu.memory_space<vmem>>, vector<16x256xf32>,
    %c0_i32_8 = arith.constant 0 : i32
    %9 = arith.cmpi eq, %arg1, %c0_i32_8 : i32
    %10 = arith.extui %9 : i1 to i32
    %c0_i32_9 = arith.constant 0 : i32
    %11 = arith.cmpi ne, %10, %c0_i32_9 : i32
    scf.if %11 {
      %c0_10 = arith.constant 0 : index
      %c0_11 = arith.constant 0 : index
      %12 = vector.load %arg12[%c0_10, %c0_11] : memref<16x256xf32, #tpu.memory_space<vmem>>, vector<16x256xf32>
      %c0_12 = arith.constant 0 : index
      %c0_13 = arith.constant 0 : index
      %13 = vector.load %arg4[%c0_12, %c0_13] : memref<1x256xf32, #tpu.memory_space<vmem>>, vector<1x256xf32>
      %14 = vector.broadcast %13 : vector<1x256xf32> to vector<16x256xf32>
      %15 = arith.addf %12, %14 : vector<16x256xf32>
      %16 = arith.truncf %15 : vector<16x256xf32> to vector<16x256xbf16>
      %c0_14 = arith.constant 0 : index
      %c0_15 = arith.constant 0 : index
      %17 = vector.load %arg5[%c0_14, %c0_15] : memref<256x512xbf16, #tpu.memory_space<vmem>>, vector<256x512xbf16>
      %cst_16 = arith.constant dense<0.000000e+00> : vector<16x512xf32>
      %18 = tpu.matmul %16, %17, %cst_16 {dimension_numbers = #tpu.dot_dimension_numbers<[1], [0], [0], [1], [0, 0, 1, 1], [], []>} : vector<16x256xbf16>, vector<256x512xbf16>, vector<16x512xf32> -> vector<16x512xf32>
      %c0_17 = arith.constant 0 : index
      %c0_18 = arith.constant 0 : index
      %19 = vector.load %arg6[%c0_17, %c0_18] : memref<1x512xf32, #tpu.memory_space<vmem>>, vector<1x512xf32>
      %20 = vector.broadcast %19 : vector<1x512xf32> to vector<16x512xf32>
      %21 = arith.addf %18, %20 : vector<16x512xf32>
      %22 = arith.truncf %21 : vector<16x512xf32> to vector<16x512xbf16>
      %c0_19 = arith.constant 0 : index
      %c0_20 = arith.constant 0 : index
      %23 = vector.load %arg7[%c0_19, %c0_20] : memref<512x128xbf16, #tpu.memory_space<vmem>>, vector<512x128xbf16>
      %cst_21 = arith.constant dense<0.000000e+00> : vector<16x128xf32>
      %24 = tpu.matmul %22, %23, %cst_21 {dimension_numbers = #tpu.dot_dimension_numbers<[1], [0], [0], [1], [0, 0, 1, 1], [], []>} : vector<16x512xbf16>, vector<512x128xbf16>, vector<16x128xf32> -> vector<16x128xf32>
      %c0_22 = arith.constant 0 : index
      %c0_23 = arith.constant 0 : index
      %25 = vector.load %arg8[%c0_22, %c0_23] : memref<1x128xf32, #tpu.memory_space<vmem>>, vector<1x128xf32>
      %26 = vector.broadcast %25 : vector<1x128xf32> to vector<16x128xf32>
      %27 = arith.addf %24, %26 : vector<16x128xf32>
      %cst_24 = arith.constant 0.000000e+00 : f32
      %28 = vector.broadcast %cst_24 : f32 to vector<16x128xf32>
      %29 = arith.maximumf %27, %28 : vector<16x128xf32>
      %30 = arith.truncf %29 : vector<16x128xf32> to vector<16x128xbf16>
      %c0_25 = arith.constant 0 : index
      %c0_26 = arith.constant 0 : index
      %31 = vector.load %arg9[%c0_25, %c0_26] : memref<128x4xbf16, #tpu.memory_space<vmem>>, vector<128x4xbf16>
      %cst_27 = arith.constant dense<0.000000e+00> : vector<16x4xf32>
      %32 = tpu.matmul %30, %31, %cst_27 {dimension_numbers = #tpu.dot_dimension_numbers<[1], [0], [0], [1], [0, 0, 1, 1], [], []>} : vector<16x128xbf16>, vector<128x4xbf16>, vector<16x4xf32> -> vector<16x4xf32>
      %c0_28 = arith.constant 0 : index
      %c0_29 = arith.constant 0 : index
      %33 = vector.load %arg10[%c0_28, %c0_29] : memref<1x4xf32, #tpu.memory_space<vmem>>, vector<1x4xf32>
      %34 = vector.broadcast %33 : vector<1x4xf32> to vector<16x4xf32>
      %35 = arith.addf %32, %34 : vector<16x4xf32>
      %36 = math.absf %35 : vector<16x4xf32>
      %cst_30 = arith.constant 0.000000e+00 : f32
      %37 = vector.broadcast %cst_30 : f32 to vector<16x4xf32>
      %38 = arith.subf %37, %36 : vector<16x4xf32>
      %39 = math.exp %38 : vector<16x4xf32>
      %cst_31 = arith.constant 0.000000e+00 : f32
      %40 = vector.broadcast %cst_31 : f32 to vector<16x4xf32>
      %41 = arith.cmpf oge, %35, %40 : vector<16x4xf32>
      %cst_32 = arith.constant 1.000000e+00 : f32
      %42 = vector.broadcast %cst_32 : f32 to vector<16x4xf32>
      %43 = arith.select %41, %42, %39 : vector<16x4xi1>, vector<16x4xf32>
      %cst_33 = arith.constant 1.000000e+00 : f32
      %44 = vector.broadcast %cst_33 : f32 to vector<16x4xf32>
      %45 = arith.addf %44, %39 : vector<16x4xf32>
      %46 = arith.divf %43, %45 : vector<16x4xf32>
      %cst_34 = arith.constant 0.000000e+00 : f32
      %47 = vector.broadcast %cst_34 : f32 to vector<16x4xf32>
      %48 = arith.maximumf %35, %47 : vector<16x4xf32>
      %cst_35 = arith.constant 1.000000e+00 : f32
      %49 = vector.broadcast %cst_35 : f32 to vector<16x4xf32>
      %50 = arith.addf %49, %39 : vector<16x4xf32>
      %51 = math.log %50 : vector<16x4xf32>
      %52 = arith.addf %48, %51 : vector<16x4xf32>
      %cst_36 = arith.constant 0.000000e+00 : f32
      %53 = vector.broadcast %cst_36 : f32 to vector<16x4xf32>
      %54 = arith.subf %53, %52 : vector<16x4xf32>
      %55 = vector.extract_strided_slice %54 {offsets = [0, 0], sizes = [16, 1], strides = [1, 1]} : vector<16x4xf32> to vector<16x1xf32>
      %56 = math.exp %55 : vector<16x1xf32>
      %57 = vector.extract_strided_slice %54 {offsets = [0, 1], sizes = [16, 1], strides = [1, 1]} : vector<16x4xf32> to vector<16x1xf32>
      %58 = arith.addf %55, %57 : vector<16x1xf32>
      %59 = math.exp %58 : vector<16x1xf32>
      %60 = vector.extract_strided_slice %54 {offsets = [0, 2], sizes = [16, 1], strides = [1, 1]} : vector<16x4xf32> to vector<16x1xf32>
      %61 = arith.addf %58, %60 : vector<16x1xf32>
      %62 = math.exp %61 : vector<16x1xf32>
      %63 = vector.extract_strided_slice %54 {offsets = [0, 3], sizes = [16, 1], strides = [1, 1]} : vector<16x4xf32> to vector<16x1xf32>
      %64 = arith.addf %61, %63 : vector<16x1xf32>
      %65 = math.exp %64 : vector<16x1xf32>
      %66 = tpu.concatenate %35, %46, %56, %59, %62, %65 in 1 : vector<16x4xf32>, vector<16x4xf32>, vector<16x1xf32>, vector<16x1xf32>, vector<16x1xf32>, vector<16x1xf32> -> vector<16x12xf32>
      %c0_37 = arith.constant 0 : index
      %c0_38 = arith.constant 0 : index
      %67 = vector.load %arg11[%c0_37, %c0_38] : memref<16x12xf32, #tpu.memory_space<vmem>>, vector<16x12xf32>
      tpu.vector_store %arg11[%c0_37, %c0_38], %66 {strides = array<i32>} : memref<16x12xf32, #tpu.memory_space<vmem>>, vector<16x12xf32>,
    } else {
    }
    return
  }
  func.func @transform_0(%arg0: i32, %arg1: i32) -> (i32, i32) {
    %c0_i32 = arith.constant 0 : i32
    return %arg0, %arg1 : i32, i32
  }
  func.func @transform_1(%arg0: i32, %arg1: i32) -> (i32, i32) {
    %c0_i32 = arith.constant 0 : i32
    %c0_i32_0 = arith.constant 0 : i32
    return %arg1, %c0_i32 : i32, i32
  }
  func.func @transform_2(%arg0: i32, %arg1: i32) -> (i32, i32) {
    %c0_i32 = arith.constant 0 : i32
    %c0_i32_0 = arith.constant 0 : i32
    %c0_i32_1 = arith.constant 0 : i32
    return %c0_i32, %c0_i32_0 : i32, i32
  }
  func.func @transform_3(%arg0: i32, %arg1: i32) -> (i32, i32) {
    %c0_i32 = arith.constant 0 : i32
    %c0_i32_0 = arith.constant 0 : i32
    %c0_i32_1 = arith.constant 0 : i32
    return %c0_i32, %c0_i32_0 : i32, i32
  }
  func.func @transform_4(%arg0: i32, %arg1: i32) -> (i32, i32) {
    %c0_i32 = arith.constant 0 : i32
    %c0_i32_0 = arith.constant 0 : i32
    %c0_i32_1 = arith.constant 0 : i32
    return %c0_i32, %c0_i32_0 : i32, i32
  }
  func.func @transform_5(%arg0: i32, %arg1: i32) -> (i32, i32) {
    %c0_i32 = arith.constant 0 : i32
    %c0_i32_0 = arith.constant 0 : i32
    %c0_i32_1 = arith.constant 0 : i32
    return %c0_i32, %c0_i32_0 : i32, i32
  }
  func.func @transform_6(%arg0: i32, %arg1: i32) -> (i32, i32) {
    %c0_i32 = arith.constant 0 : i32
    %c0_i32_0 = arith.constant 0 : i32
    %c0_i32_1 = arith.constant 0 : i32
    return %c0_i32, %c0_i32_0 : i32, i32
  }
  func.func @transform_7(%arg0: i32, %arg1: i32) -> (i32, i32) {
    %c0_i32 = arith.constant 0 : i32
    %c0_i32_0 = arith.constant 0 : i32
    %c0_i32_1 = arith.constant 0 : i32
    return %c0_i32, %c0_i32_0 : i32, i32
  }
  func.func @transform_8(%arg0: i32, %arg1: i32) -> (i32, i32) {
    %c0_i32 = arith.constant 0 : i32
    %c0_i32_0 = arith.constant 0 : i32
    %c0_i32_1 = arith.constant 0 : i32
    return %c0_i32, %c0_i32_0 : i32, i32
  }
  func.func @transform_9(%arg0: i32, %arg1: i32) -> (i32, i32) {
    %c0_i32 = arith.constant 0 : i32
    %c0_i32_0 = arith.constant 0 : i32
    return %arg0, %c0_i32 : i32, i32
  }
}

</mosaic_0001>

<bundles_post_ra>
// kernel: tpu_custom_call.1
= control target key start
LH: loop header
LB: loop body
LE: loop exit
PB: predicated region body
PF: predicated region fallthrough
CT: control target
= control target key end

     0   :  { %14 = vsyncpa [#allocation4], 0  ;;  %s2933_s0 = inlined_call_operand.vmem [shape: bf16[16,512], index: 0, kind: input, shape index: {}]   ;;  %s2934_s1 = inlined_call_operand.hbm [shape: bf16[512,256], index: 1, kind: input, shape index: {}]   ;;  %s2935_s2 = inlined_call_operand.vmem [shape: f32[1,256], index: 2, kind: input, shape index: {}]   ;;  %s2936_s3 = inlined_call_operand.hbm [shape: bf16[256,512], index: 3, kind: input, shape index: {}]   ;;  %s2937_s4 = inlined_call_operand.vmem [shape: f32[1,512], index: 4, kind: input, shape index: {}]   ;;  %s2938_s5 = inlined_call_operand.hbm [shape: bf16[512,128], index: 5, kind: input, shape index: {}]   ;;  %s2939_s6 = inlined_call_operand.vmem [shape: f32[1,128], index: 6, kind: input, shape index: {}]   ;;  %s2940_s7 = inlined_call_operand.vmem [shape: bf16[128,4], index: 7, kind: input, shape index: {}]   ;;  %s2941_s8 = inlined_call_operand.vmem [shape: f32[1,4], index: 8, kind: input, shape index: {}]   ;;  %s2942_s9 = inlined_call_operand.hbm [shape: f32[16,12], index: 9, kind: output, shape index: {}]  }
   0x1   :  { %15 = vsyncpa [#allocation7], 0  ;;  %s38_s11 = sshll.u32 %s2936_s3, 4  ;;  %s39_s11 = int_to_ptr.hbm [resolvable:$true] %s38_s11 }
   0x2   :  { %16 = vsyncpa [#allocation5], 0  ;;  %s2732_s12 = smov [#allocation6]   ;;  %s23_s16 = sshll.u32 %s2934_s1, 4  ;;  %s24_s16 = int_to_ptr.hbm [resolvable:$true] %s23_s16 }
   0x3   :  { %s40_s13 = sshll.u32 %s2732_s12, 4  ;;  %s2733_s17 = smov 256   ;;  %s41_s13 = int_to_ptr.vmem [resolvable:$true] %s40_s13 }
   0x4   :  { %s2734_s18 = smov 16   ;;  %s2735_s19 = smov [#allocation3]  }
   0x5   :  { %46 = dma.hbm_to_vmem [thread:$0]  %s39_s11, 8192, %s41_s13, [#allocation7], %s2733_s17, %s2733_s17, %s2734_s18  }
   0x6   :  { %s25_s20 = sshll.u32 %s2735_s19, 4  ;;  %s2736_s21 = smov 128   ;;  %s26_s20 = int_to_ptr.vmem [resolvable:$true] %s25_s20 }
   0x7   :  { %s2737_s22 = smov 8   ;;  %s53_s24 = sshll.u32 %s2938_s5, 4  ;;  %s54_s24 = int_to_ptr.hbm [resolvable:$true] %s53_s24 }
   0x8   :  { %31 = dma.hbm_to_vmem [thread:$0]  %s24_s16, 8192, %s26_s20, [#allocation4], %s2736_s21, %s2736_s21, %s2737_s22  }
   0x9   :  { %s2738_s25 = smov [#allocation8]   ;;  %s2739_s26 = smov 64  }
   0xa   :  { %s55_s1 = sshll.u32 %s2738_s25, 4  ;;  %s2740_s27 = smov 4   ;;  %s56_s1 = int_to_ptr.vmem [resolvable:$true] %s55_s1 }
   0xb   :  { %61 = dma.hbm_to_vmem [thread:$0]  %s54_s24, 4096, %s56_s1, [#allocation7], %s2739_s26, %s2739_s26, %s2740_s27  }
   0xc   :  { %2726 = dma.done.wait [#allocation4], 8192  }
   0xd   :  { %2727 = vsyncadd [#allocation4], 4294959104 }
   0xe   :  { %2728 = dma.done.wait [#allocation7], 12288  }
   0xf   :  { %2729 = vsyncadd [#allocation7], 4294955008  ;;  %v1798_v0 = vld [vmem:[#allocation3 + $0x70] sm:$0xf]  ;;  %v2431_v1 = vld [vmem:[#allocation3 + $0x74] sm:$0xf0] }
  0x10   :  { %v1862_v2 = vld [vmem:[#allocation3 + $0xf0] sm:$0xf]  ;;  %v1799_v3 = vor.u32 %v2431_v1, %v1798_v0  ;;  %v2447_v4 = vld [vmem:[#allocation3 + $0xf4] sm:$0xf0]  ;;  %v1790_v11 = vld [vmem:[#allocation3 + $0x60] sm:$0xf] }
  0x11   :  { %v1926_v5 = vld [vmem:[#allocation3 + $0x170] sm:$0xf]  ;;  %v2463_v6 = vld [vmem:[#allocation3 + $0x174] sm:$0xf0]  ;;  %v1863_v7 = vor.u32 %v2447_v4, %v1862_v2  ;;  %v2429_v13 = vld [vmem:[#allocation3 + $0x64] sm:$0xf0] }
  0x12   :  { %v1927_v8 = vor.u32 %v2463_v6, %v1926_v5  ;;  %v1990_v9 = vld [vmem:[#allocation3 + $0x1f0] sm:$0xf]  ;;  %v2479_v10 = vld [vmem:[#allocation3 + $0x1f4] sm:$0xf0]  ;;  %500 = vmatpush.bf16.msra.mxu0 %v1799_v3  ;;  %v1854_v14 = vld [vmem:[#allocation3 + $0xe0] sm:$0xf]  ;;  %v1791_v16 = vor.u32 %v2429_v13, %v1790_v11 }
  0x13   :  { %v1991_v12 = vor.u32 %v2479_v10, %v1990_v9  ;;  %v2445_v15 = vld [vmem:[#allocation3 + $0xe4] sm:$0xf0]  ;;  %514 = vmatpush.bf16.msra.mxu1 %v1863_v7  ;;  %v1918_v18 = vld [vmem:[#allocation3 + $0x160] sm:$0xf]  ;;  %v1782_v23 = vld [vmem:[#allocation3 + $0x50] sm:$0xf] }
  0x14   :  { %528 = vmatpush.bf16.msra.mxu2 %v1927_v8  ;;  %v1855_v17 = vor.u32 %v2445_v15, %v1854_v14  ;;  %v2461_v19 = vld [vmem:[#allocation3 + $0x164] sm:$0xf0]  ;;  %v1982_v20 = vld [vmem:[#allocation3 + $0x1e0] sm:$0xf]  ;;  %v2427_v24 = vld [vmem:[#allocation3 + $0x54] sm:$0xf0] }
  0x15   :  { %542 = vmatpush.bf16.msra.mxu3 %v1991_v12  ;;  %v1919_v21 = vor.u32 %v2461_v19, %v1918_v18  ;;  %v2477_v22 = vld [vmem:[#allocation3 + $0x1e4] sm:$0xf0]  ;;  %v1846_v26 = vld [vmem:[#allocation3 + $0xd0] sm:$0xf]  ;;  %v2443_v27 = vld [vmem:[#allocation3 + $0xd4] sm:$0xf0]  ;;  %v1783_v29 = vor.u32 %v2427_v24, %v1782_v23 }
  0x16   :  { %v1983_v25 = vor.u32 %v2477_v22, %v1982_v20  ;;  %v1910_v28 = vld [vmem:[#allocation3 + $0x150] sm:$0xf]  ;;  %501 = vmatpush.bf16.msra.mxu0 %v1791_v16  ;;  %v2459_v30 = vld [vmem:[#allocation3 + $0x154] sm:$0xf0]  ;;  %v1847_v33 = vor.u32 %v2443_v27, %v1846_v26  ;;  %v1774_v35 = vld [vmem:[#allocation3 + $0x40] sm:$0xf] }
  0x17   :  { %v1974_v31 = vld [vmem:[#allocation3 + $0x1d0] sm:$0xf]  ;;  %v2475_v32 = vld [vmem:[#allocation3 + $0x1d4] sm:$0xf0]  ;;  %515 = vmatpush.bf16.msra.mxu1 %v1855_v17  ;;  %v1911_v34 = vor.u32 %v2459_v30, %v1910_v28  ;;  %v2425_v36 = vld [vmem:[#allocation3 + $0x44] sm:$0xf0] }
  0x18   :  { %529 = vmatpush.bf16.msra.mxu2 %v1919_v21  ;;  %v1838_v37 = vld [vmem:[#allocation3 + $0xc0] sm:$0xf]  ;;  %v1975_v38 = vor.u32 %v2475_v32, %v1974_v31  ;;  %v2441_v39 = vld [vmem:[#allocation3 + $0xc4] sm:$0xf0]  ;;  %v1775_v44 = vor.u32 %v2425_v36, %v1774_v35  ;;  %v1766_v47 = vld [vmem:[#allocation3 + $0x30] sm:$0xf] }
  0x19   :  { %543 = vmatpush.bf16.msra.mxu3 %v1983_v25  ;;  %v1902_v40 = vld [vmem:[#allocation3 + $0x140] sm:$0xf]  ;;  %v2457_v41 = vld [vmem:[#allocation3 + $0x144] sm:$0xf0]  ;;  %v1839_v45 = vor.u32 %v2441_v39, %v1838_v37  ;;  %v2423_v48 = vld [vmem:[#allocation3 + $0x34] sm:$0xf0] }
  0x1a   :  { %v1966_v42 = vld [vmem:[#allocation3 + $0x1c0] sm:$0xf]  ;;  %v2473_v43 = vld [vmem:[#allocation3 + $0x1c4] sm:$0xf0]  ;;  %502 = vmatpush.bf16.msra.mxu0 %v1783_v29  ;;  %v1903_v46 = vor.u32 %v2457_v41, %v1902_v40  ;;  %v1830_v49 = vld [vmem:[#allocation3 + $0xb0] sm:$0xf]  ;;  %v1767_v56 = vor.u32 %v2423_v48, %v1766_v47 }
  0x1b   :  { %516 = vmatpush.bf16.msra.mxu1 %v1847_v33  ;;  %v1967_v50 = vor.u32 %v2473_v43, %v1966_v42  ;;  %v2439_v51 = vld [vmem:[#allocation3 + $0xb4] sm:$0xf0]  ;;  %v1894_v52 = vld [vmem:[#allocation3 + $0x130] sm:$0xf]  ;;  %v1758_v59 = vld [vmem:[#allocation3 + $0x20] sm:$0xf] }
  0x1c   :  { %530 = vmatpush.bf16.msra.mxu2 %v1911_v34  ;;  %v2455_v53 = vld [vmem:[#allocation3 + $0x134] sm:$0xf0]  ;;  %v1958_v54 = vld [vmem:[#allocation3 + $0x1b0] sm:$0xf]  ;;  %v1831_v57 = vor.u32 %v2439_v51, %v1830_v49  ;;  %v2421_v60 = vld [vmem:[#allocation3 + $0x24] sm:$0xf0] }
  0x1d   :  { %544 = vmatpush.bf16.msra.mxu3 %v1975_v38  ;;  %v2471_v55 = vld [vmem:[#allocation3 + $0x1b4] sm:$0xf0]  ;;  %v1895_v58 = vor.u32 %v2455_v53, %v1894_v52  ;;  %v1822_v61 = vld [vmem:[#allocation3 + $0xa0] sm:$0xf]  ;;  %v2437_v63 = vld [vmem:[#allocation3 + $0xa4] sm:$0xf0]  ;;  %v1759_v4 = vor.u32 %v2421_v60, %v1758_v59 }
  0x1e   :  { %503 = vmatpush.bf16.msra.mxu0 %v1775_v44  ;;  %v1959_v62 = vor.u32 %v2471_v55, %v1958_v54  ;;  %v1886_v0 = vld [vmem:[#allocation3 + $0x120] sm:$0xf]  ;;  %v2453_v1 = vld [vmem:[#allocation3 + $0x124] sm:$0xf0]  ;;  %v1750_v5 = vld [vmem:[#allocation3 + $0x10] sm:$0xf]  ;;  %v1823_v6 = vor.u32 %v2437_v63, %v1822_v61 }
  0x1f   :  { %517 = vmatpush.bf16.msra.mxu1 %v1839_v45  ;;  %v1950_v2 = vld [vmem:[#allocation3 + $0x1a0] sm:$0xf]  ;;  %v2469_v3 = vld [vmem:[#allocation3 + $0x1a4] sm:$0xf0]  ;;  %v1887_v7 = vor.u32 %v2453_v1, %v1886_v0  ;;  %v2419_v8 = vld [vmem:[#allocation3 + $0x14] sm:$0xf0] }
  0x20   :  { %531 = vmatpush.bf16.msra.mxu2 %v1903_v46  ;;  %v1814_v9 = vld [vmem:[#allocation3 + $0x90] sm:$0xf]  ;;  %v2435_v10 = vld [vmem:[#allocation3 + $0x94] sm:$0xf0]  ;;  %v1951_v11 = vor.u32 %v2469_v3, %v1950_v2  ;;  %v1742_v16 = vld [vmem:[#allocation3] sm:$0xf]  ;;  %v1751_v18 = vor.u32 %v2419_v8, %v1750_v5 }
  0x21   :  { %545 = vmatpush.bf16.msra.mxu3 %v1967_v50  ;;  %v1878_v12 = vld [vmem:[#allocation3 + $0x110] sm:$0xf]  ;;  %v2451_v13 = vld [vmem:[#allocation3 + $0x114] sm:$0xf0]  ;;  %v2417_v17 = vld [vmem:[#allocation3 + $0x4] sm:$0xf0]  ;;  %v1815_v23 = vor.u32 %v2435_v10, %v1814_v9 }
  0x22   :  { %504 = vmatpush.bf16.msra.mxu0 %v1767_v56  ;;  %v1942_v14 = vld [vmem:[#allocation3 + $0x190] sm:$0xf]  ;;  %v2467_v15 = vld [vmem:[#allocation3 + $0x194] sm:$0xf0]  ;;  %v1806_v19 = vld [vmem:[#allocation3 + $0x80] sm:$0xf]  ;;  %v1879_v24 = vor.u32 %v2451_v13, %v1878_v12  ;;  %v1743_v35 = vor.u32 %v2417_v17, %v1742_v16 }
  0x23   :  { %518 = vmatpush.bf16.msra.mxu1 %v1831_v57  ;;  %v2433_v20 = vld [vmem:[#allocation3 + $0x84] sm:$0xf0]  ;;  %v1870_v21 = vld [vmem:[#allocation3 + $0x100] sm:$0xf]  ;;  %v2430_v27 = vld [vmem:[#allocation3 + $0x74] sm:$0xf]  ;;  %v1943_v28 = vor.u32 %v2467_v15, %v1942_v14 }
  0x24   :  { %532 = vmatpush.bf16.msra.mxu2 %v1895_v58  ;;  %v2449_v22 = vld [vmem:[#allocation3 + $0x104] sm:$0xf0]  ;;  %v1934_v25 = vld [vmem:[#allocation3 + $0x180] sm:$0xf]  ;;  %v1800_v29 = vld [vmem:[#allocation3 + $0x78] sm:$0xf0]  ;;  %v1807_v39 = vor.u32 %v2433_v20, %v1806_v19 }
  0x25   :  { %546 = vmatpush.bf16.msra.mxu3 %v1959_v62  ;;  %v2465_v26 = vld [vmem:[#allocation3 + $0x184] sm:$0xf0]  ;;  %v2446_v30 = vld [vmem:[#allocation3 + $0xf4] sm:$0xf]  ;;  %v1864_v31 = vld [vmem:[#allocation3 + $0xf8] sm:$0xf0]  ;;  %v1871_v40 = vor.u32 %v2449_v22, %v1870_v21  ;;  %v1803_v45 = vor.u32 %v2430_v27, %v1800_v29 }
  0x26   :  { %505 = vmatpush.bf16.msra.mxu0 %v1759_v4  ;;  %v2462_v32 = vld [vmem:[#allocation3 + $0x174] sm:$0xf]  ;;  %v1928_v33 = vld [vmem:[#allocation3 + $0x178] sm:$0xf0]  ;;  %v1734_v37 = vld [vmem:[%s2933_s0 + $0x8] sm:$0xf]  ;;  %v1935_v44 = vor.u32 %v2465_v26, %v1934_v25  ;;  %v1867_v49 = vor.u32 %v2446_v30, %v1864_v31 }
  0x27   :  { %519 = vmatpush.bf16.msra.mxu1 %v1823_v6  ;;  %v2478_v34 = vld [vmem:[#allocation3 + $0x1f4] sm:$0xf]  ;;  %v1992_v36 = vld [vmem:[#allocation3 + $0x1f8] sm:$0xf0]  ;;  %v2415_v38 = vld [vmem:[%s2933_s0 + $0x14] sm:$0xf0]  ;;  %v1931_v50 = vor.u32 %v2462_v32, %v1928_v33 }
  0x28   :  { %533 = vmatpush.bf16.msra.mxu2 %v1887_v7  ;;  %v2413_v41 = vld [vmem:[%s2933_s0 + $0xc] sm:$0xf]  ;;  %v1736_v42 = vld [vmem:[%s2933_s0 + $0x18] sm:$0xf0]  ;;  %v2428_v43 = vld [vmem:[#allocation3 + $0x64] sm:$0xf]  ;;  %v1995_v54 = vor.u32 %v2478_v34, %v1992_v36  ;;  %v2835_v55 = vor.u32 %v2415_v38, %v1734_v37 }
  0x29   :  { %547 = vmatpush.bf16.msra.mxu3 %v1951_v11  ;;  %v1792_v46 = vld [vmem:[#allocation3 + $0x68] sm:$0xf0]  ;;  %v1726_v47 = vld [vmem:[%s2933_s0] sm:$0xf]  ;;  %v2414_v48 = vld [vmem:[%s2933_s0 + $0xc] sm:$0xf0]  ;;  %v2837_v59 = vor.u32 %v2413_v41, %v1736_v42 }
  0x2a   :  { %506 = vmatpush.bf16.msra.mxu0 %v1751_v18  ;;  %v2444_v51 = vld [vmem:[#allocation3 + $0xe4] sm:$0xf]  ;;  %v1728_v53 = vld [vmem:[%s2933_s0 + $0x10] sm:$0xf0]  ;;  %v1856_v56 = vld [vmem:[#allocation3 + $0xe8] sm:$0xf0]  ;;  %v2839_v62 = vor.u32 %v2414_v48, %v1726_v47  ;;  %v1795_v63 = vor.u32 %v2428_v43, %v1792_v46 }
  0x2b   :  { %520 = vmatpush.bf16.msra.mxu1 %v1815_v23  ;;  %v2412_v52 = vld [vmem:[%s2933_s0 + $0x4] sm:$0xf]  ;;  %v1920_v58 = vld [vmem:[#allocation3 + $0x168] sm:$0xf0]  ;;  %v1859_v1 = vor.u32 %v2444_v51, %v1856_v56  ;;  %v2426_v3 = vld [vmem:[#allocation3 + $0x54] sm:$0xf] }
  0x2c   :  { %534 = vmatpush.bf16.msra.mxu2 %v1879_v24  ;;  %v2460_v57 = vld [vmem:[#allocation3 + $0x164] sm:$0xf]  ;;  %v1984_v61 = vld [vmem:[#allocation3 + $0x1e8] sm:$0xf0]  ;;  %v2841_v0 = vor.u32 %v2412_v52, %v1728_v53  ;;  %v1784_v4 = vld [vmem:[#allocation3 + $0x58] sm:$0xf0] }
  0x2d   :  { %548 = vmatpush.bf16.msra.mxu3 %v1943_v28  ;;  %v2476_v60 = vld [vmem:[#allocation3 + $0x1e4] sm:$0xf]  ;;  %v1923_v2 = vor.u32 %v2460_v57, %v1920_v58  ;;  %v2442_v5 = vld [vmem:[#allocation3 + $0xd4] sm:$0xf]  ;;  %v1848_v7 = vld [vmem:[#allocation3 + $0xd8] sm:$0xf0]  ;;  %v1787_v12 = vor.u32 %v2426_v3, %v1784_v4 }
  0x2e   :  { %507 = vmatpush.bf16.msra.mxu0 %v1743_v35  ;;  %v1987_v6 = vor.u32 %v2476_v60, %v1984_v61  ;;  %v2458_v8 = vld [vmem:[#allocation3 + $0x154] sm:$0xf]  ;;  %v1912_v9 = vld [vmem:[#allocation3 + $0x158] sm:$0xf0]  ;;  %v1851_v13 = vor.u32 %v2442_v5, %v1848_v7  ;;  %v2424_v15 = vld [vmem:[#allocation3 + $0x44] sm:$0xf] }
  0x2f   :  { %521 = vmatpush.bf16.msra.mxu1 %v1807_v39  ;;  %v2474_v10 = vld [vmem:[#allocation3 + $0x1d4] sm:$0xf]  ;;  %v1976_v11 = vld [vmem:[#allocation3 + $0x1d8] sm:$0xf0]  ;;  %v1915_v14 = vor.u32 %v2458_v8, %v1912_v9  ;;  %v1776_v16 = vld [vmem:[#allocation3 + $0x48] sm:$0xf0] }
  0x30   :  { %535 = vmatpush.bf16.msra.mxu2 %v1871_v40  ;;  %v2440_v17 = vld [vmem:[#allocation3 + $0xc4] sm:$0xf]  ;;  %v1979_v18 = vor.u32 %v2474_v10, %v1976_v11  ;;  %v1840_v19 = vld [vmem:[#allocation3 + $0xc8] sm:$0xf0]  ;;  %v1779_v24 = vor.u32 %v2424_v15, %v1776_v16  ;;  %v2422_v27 = vld [vmem:[#allocation3 + $0x34] sm:$0xf] }
  0x31   :  { %549 = vmatpush.bf16.msra.mxu3 %v1935_v44  ;;  %508 = vmatmul.bf16.vlgmr.msra.gmra.mxu0 %v2839_v62  ;;  %v2456_v20 = vld [vmem:[#allocation3 + $0x144] sm:$0xf]  ;;  %v1904_v21 = vld [vmem:[#allocation3 + $0x148] sm:$0xf0]  ;;  %v1843_v25 = vor.u32 %v2440_v17, %v1840_v19  ;;  %v1768_v28 = vld [vmem:[#allocation3 + $0x38] sm:$0xf0] }
  0x32   :  { %556 = vmatpush.bf16.msrb.mxu0 %v1803_v45  ;;  %522 = vmatmul.bf16.vlgmr.msra.gmra.mxu1 %v2841_v0  ;;  %v2472_v22 = vld [vmem:[#allocation3 + $0x1c4] sm:$0xf]  ;;  %v1968_v23 = vld [vmem:[#allocation3 + $0x1c8] sm:$0xf0]  ;;  %v1907_v26 = vor.u32 %v2456_v20, %v1904_v21  ;;  %v2438_v29 = vld [vmem:[#allocation3 + $0xb4] sm:$0xf]  ;;  %v1771_v36 = vor.u32 %v2422_v27, %v1768_v28 }
  0x33   :  { %570 = vmatpush.bf16.msrb.mxu1 %v1867_v49  ;;  %536 = vmatmul.bf16.vlgmr.msra.gmra.mxu2 %v2835_v55  ;;  %v1971_v30 = vor.u32 %v2472_v22, %v1968_v23  ;;  %v1832_v31 = vld [vmem:[#allocation3 + $0xb8] sm:$0xf0]  ;;  %v2454_v32 = vld [vmem:[#allocation3 + $0x134] sm:$0xf]  ;;  %v2420_v39 = vld [vmem:[#allocation3 + $0x24] sm:$0xf] }
  0x34   :  { %584 = vmatpush.bf16.msrb.mxu2 %v1931_v50  ;;  %550 = vmatmul.bf16.vlgmr.msra.gmra.mxu3 %v2837_v59  ;;  %v1896_v33 = vld [vmem:[#allocation3 + $0x138] sm:$0xf0]  ;;  %v2470_v34 = vld [vmem:[#allocation3 + $0x1b4] sm:$0xf]  ;;  %v1835_v37 = vor.u32 %v2438_v29, %v1832_v31  ;;  %v1760_v40 = vld [vmem:[#allocation3 + $0x28] sm:$0xf0] }
  0x35   :  { %598 = vmatpush.bf16.msrb.mxu3 %v1995_v54  ;;  %v1960_v35 = vld [vmem:[#allocation3 + $0x1b8] sm:$0xf0]  ;;  %v1899_v38 = vor.u32 %v2454_v32, %v1896_v33  ;;  %v2436_v41 = vld [vmem:[#allocation3 + $0xa4] sm:$0xf]  ;;  %v1824_v43 = vld [vmem:[#allocation3 + $0xa8] sm:$0xf0]  ;;  %v1763_v48 = vor.u32 %v2420_v39, %v1760_v40 }
  0x36   :  { %557 = vmatpush.bf16.msrb.mxu0 %v1795_v63  ;;  %v1963_v42 = vor.u32 %v2470_v34, %v1960_v35  ;;  %v2452_v44 = vld [vmem:[#allocation3 + $0x124] sm:$0xf]  ;;  %v1888_v45 = vld [vmem:[#allocation3 + $0x128] sm:$0xf0]  ;;  %v1827_v49 = vor.u32 %v2436_v41, %v1824_v43  ;;  %v2418_v51 = vld [vmem:[#allocation3 + $0x14] sm:$0xf] }
  0x37   :  { %571 = vmatpush.bf16.msrb.mxu1 %v1859_v1  ;;  %v2468_v46 = vld [vmem:[#allocation3 + $0x1a4] sm:$0xf]  ;;  %v1952_v47 = vld [vmem:[#allocation3 + $0x1a8] sm:$0xf0]  ;;  %v1891_v50 = vor.u32 %v2452_v44, %v1888_v45  ;;  %v1752_v52 = vld [vmem:[#allocation3 + $0x18] sm:$0xf0] }
  0x38   :  { %585 = vmatpush.bf16.msrb.mxu2 %v1923_v2  ;;  %v2434_v53 = vld [vmem:[#allocation3 + $0x94] sm:$0xf]  ;;  %v1955_v54 = vor.u32 %v2468_v46, %v1952_v47  ;;  %v1816_v56 = vld [vmem:[#allocation3 + $0x98] sm:$0xf0]  ;;  %v1755_v63 = vor.u32 %v2418_v51, %v1752_v52  ;;  %v2416_v1 = vld [vmem:[#allocation3 + $0x4] sm:$0xf] }
  0x39   :  { %599 = vmatpush.bf16.msrb.mxu3 %v1987_v6  ;;  %v2450_v57 = vld [vmem:[#allocation3 + $0x114] sm:$0xf]  ;;  %v1880_v58 = vld [vmem:[#allocation3 + $0x118] sm:$0xf0]  ;;  %v1744_v2 = vld [vmem:[#allocation3 + $0x8] sm:$0xf0]  ;;  %v1819_v4 = vor.u32 %v2434_v53, %v1816_v56 }
  0x3a   :  { %558 = vmatpush.bf16.msrb.mxu0 %v1787_v12  ;;  %v2466_v60 = vld [vmem:[#allocation3 + $0x194] sm:$0xf]  ;;  %v1944_v61 = vld [vmem:[#allocation3 + $0x198] sm:$0xf0]  ;;  %v2432_v3 = vld [vmem:[#allocation3 + $0x84] sm:$0xf]  ;;  %v1883_v5 = vor.u32 %v2450_v57, %v1880_v58 }
  0x3b   :  { %572 = vmatpush.bf16.msrb.mxu1 %v1851_v13  ;;  %v1808_v6 = vld [vmem:[#allocation3 + $0x88] sm:$0xf0]  ;;  %v1947_v7 = vor.u32 %v2466_v60, %v1944_v61  ;;  %v2448_v8 = vld [vmem:[#allocation3 + $0x104] sm:$0xf]  ;;  %v2110_v12 = vld [vmem:[#allocation6 + $0xe0] sm:$0xf] }
  0x3c   :  { %586 = vmatpush.bf16.msrb.mxu2 %v1915_v14  ;;  %v1872_v9 = vld [vmem:[#allocation3 + $0x108] sm:$0xf0]  ;;  %v2464_v10 = vld [vmem:[#allocation3 + $0x184] sm:$0xf]  ;;  %v2510_v13 = vld [vmem:[#allocation6 + $0xec] sm:$0xf0]  ;;  %v1747_v14 = vor.u32 %v2416_v1, %v1744_v2  ;;  %v1811_v17 = vor.u32 %v2432_v3, %v1808_v6 }
  0x3d   :  { %600 = vmatpush.bf16.msrb.mxu3 %v1979_v18  ;;  %v1936_v11 = vld [vmem:[#allocation3 + $0x188] sm:$0xf0]  ;;  %v2508_v15 = vld [vmem:[#allocation6 + $0xe4] sm:$0xf]  ;;  %v2112_v16 = vld [vmem:[#allocation6 + $0xf0] sm:$0xf0]  ;;  %v1875_v18 = vor.u32 %v2448_v8, %v1872_v9  ;;  %v2111_v20 = vor.u32 %v2510_v13, %v2110_v12 }
  0x3e   :  { %559 = vmatpush.bf16.msrb.mxu0 %v1779_v24  ;;  %v1939_v19 = vor.u32 %v2464_v10, %v1936_v11  ;;  %v2115_v21 = vor.u32 %v2508_v15, %v2112_v16  ;;  %v2094_v22 = vld [vmem:[#allocation6 + $0xc0] sm:$0xf]  ;;  %v2506_v23 = vld [vmem:[#allocation6 + $0xcc] sm:$0xf0]  ;;  %v2504_v24 = vld [vmem:[#allocation6 + $0xc4] sm:$0xf] }
  0x3f   :  { %573 = vmatpush.bf16.msrb.mxu1 %v1843_v25  ;;  %v2096_v25 = vld [vmem:[#allocation6 + $0xd0] sm:$0xf0]  ;;  %v2078_v28 = vld [vmem:[#allocation6 + $0xa0] sm:$0xf]  ;;  %v2502_v29 = vld [vmem:[#allocation6 + $0xac] sm:$0xf0] }
  0x40   :  { %587 = vmatpush.bf16.msrb.mxu2 %v1907_v26  ;;  %v2095_v26 = vor.u32 %v2506_v23, %v2094_v22  ;;  %v2099_v27 = vor.u32 %v2504_v24, %v2096_v25  ;;  %v2080_v31 = vld [vmem:[#allocation6 + $0xb0] sm:$0xf0]  ;;  %v2079_v32 = vor.u32 %v2502_v29, %v2078_v28  ;;  %v2062_v34 = vld [vmem:[#allocation6 + $0x80] sm:$0xf]  ;;  %v2498_v35 = vld [vmem:[#allocation6 + $0x8c] sm:$0xf0] }
  0x41   :  { %601 = vmatpush.bf16.msrb.mxu3 %v1971_v30  ;;  %v2500_v30 = vld [vmem:[#allocation6 + $0xa4] sm:$0xf]  ;;  %v2046_v39 = vld [vmem:[#allocation6 + $0x60] sm:$0xf]  ;;  %v2490_v43 = vld [vmem:[#allocation6 + $0x4c] sm:$0xf0] }
  0x42   :  { %560 = vmatpush.bf16.msrb.mxu0 %v1771_v36  ;;  %v2083_v33 = vor.u32 %v2500_v30, %v2080_v31  ;;  %v2496_v36 = vld [vmem:[#allocation6 + $0x84] sm:$0xf]  ;;  %v2032_v45 = vld [vmem:[#allocation6 + $0x50] sm:$0xf0]  ;;  %v2482_v56 = vld [vmem:[#allocation6 + $0xc] sm:$0xf0] }
  0x43   :  { %574 = vmatpush.bf16.msrb.mxu1 %v1835_v37  ;;  %v2063_v37 = vor.u32 %v2498_v35, %v2062_v34  ;;  %v2492_v40 = vld [vmem:[#allocation6 + $0x64] sm:$0xf]  ;;  %v2016_v51 = vld [vmem:[#allocation6 + $0x30] sm:$0xf0]  ;;  %v2238_v61 = vld [vmem:[#allocation6 + $0x1e0] sm:$0xf] }
  0x44   :  { %588 = vmatpush.bf16.msrb.mxu2 %v1899_v38  ;;  %v2488_v44 = vld [vmem:[#allocation6 + $0x44] sm:$0xf]  ;;  %v2000_v60 = vld [vmem:[#allocation6 + $0x10] sm:$0xf0]  ;;  %v2509_v8 = vld [vmem:[#allocation6 + $0xec] sm:$0xf] }
  0x45   :  { %602 = vmatpush.bf16.msrb.mxu3 %v1963_v42  ;;  %v2030_v42 = vld [vmem:[#allocation6 + $0x40] sm:$0xf]  ;;  %v2035_v47 = vor.u32 %v2488_v44, %v2032_v45  ;;  %v2480_v57 = vld [vmem:[#allocation6 + $0x4] sm:$0xf]  ;;  %v2120_v10 = vld [vmem:[#allocation6 + $0xf8] sm:$0xf0] }
  0x46   :  { %561 = vmatpush.bf16.msrb.mxu0 %v1763_v48  ;;  %v2031_v46 = vor.u32 %v2490_v43, %v2030_v42  ;;  %v2014_v48 = vld [vmem:[#allocation6 + $0x20] sm:$0xf]  ;;  %v2003_v1 = vor.u32 %v2480_v57, %v2000_v60  ;;  %v2540_v3 = vld [vmem:[#allocation6 + $0x1e4] sm:$0xf]  ;;  %v2123_v11 = vor.u32 %v2509_v8, %v2120_v10  ;;  %v2538_v13 = vld [vmem:[#allocation6 + $0x1cc] sm:$0xf0] }
  0x47   :  { %575 = vmatpush.bf16.msrb.mxu1 %v1827_v49  ;;  %v2486_v49 = vld [vmem:[#allocation6 + $0x2c] sm:$0xf0]  ;;  %v2222_v12 = vld [vmem:[#allocation6 + $0x1c0] sm:$0xf]  ;;  %v2224_v16 = vld [vmem:[#allocation6 + $0x1d0] sm:$0xf0] }
  0x48   :  { %589 = vmatpush.bf16.msrb.mxu2 %v1891_v50  ;;  %v2484_v50 = vld [vmem:[#allocation6 + $0x24] sm:$0xf]  ;;  %v2015_v52 = vor.u32 %v2486_v49, %v2014_v48  ;;  %v2223_v15 = vor.u32 %v2538_v13, %v2222_v12  ;;  %v2104_v22 = vld [vmem:[#allocation6 + $0xd8] sm:$0xf0]  ;;  %v2206_v24 = vld [vmem:[#allocation6 + $0x1a0] sm:$0xf] }
  0x49   :  { %603 = vmatpush.bf16.msrb.mxu3 %v1955_v54  ;;  %v2019_v53 = vor.u32 %v2484_v50, %v2016_v51  ;;  %v1998_v54 = vld [vmem:[#allocation6] sm:$0xf]  ;;  %v2534_v25 = vld [vmem:[#allocation6 + $0x1ac] sm:$0xf0]  ;;  %v2208_v28 = vld [vmem:[#allocation6 + $0x1b0] sm:$0xf0] }
  0x4a   :  { %562 = vmatpush.bf16.msrb.mxu0 %v1755_v63  ;;  %v1999_v58 = vor.u32 %v2482_v56, %v1998_v54  ;;  %v2542_v63 = vld [vmem:[#allocation6 + $0x1ec] sm:$0xf0]  ;;  %v2086_v29 = vld [vmem:[#allocation6 + $0xa8] sm:$0xf]  ;;  %v2503_v30 = vld [vmem:[#allocation6 + $0xb4] sm:$0xf0] }
  0x4b   :  { %576 = vmatpush.bf16.msrb.mxu1 %v1819_v4  ;;  %v2239_v2 = vor.u32 %v2542_v63, %v2238_v61  ;;  %v2240_v4 = vld [vmem:[#allocation6 + $0x1f0] sm:$0xf0]  ;;  %v2088_v34 = vld [vmem:[#allocation6 + $0xb8] sm:$0xf0]  ;;  %v2174_v44 = vld [vmem:[#allocation6 + $0x160] sm:$0xf] }
  0x4c   :  { %590 = vmatpush.bf16.msrb.mxu2 %v1883_v5  ;;  %v2118_v5 = vld [vmem:[#allocation6 + $0xe8] sm:$0xf]  ;;  %v2243_v6 = vor.u32 %v2540_v3, %v2240_v4  ;;  %v2072_v42 = vld [vmem:[#allocation6 + $0x98] sm:$0xf0]  ;;  %v2526_v45 = vld [vmem:[#allocation6 + $0x16c] sm:$0xf0] }
  0x4d   :  { %604 = vmatpush.bf16.msrb.mxu3 %v1947_v7  ;;  %v2511_v7 = vld [vmem:[#allocation6 + $0xf4] sm:$0xf0]  ;;  %v2176_v48 = vld [vmem:[#allocation6 + $0x170] sm:$0xf0]  ;;  %v2054_v49 = vld [vmem:[#allocation6 + $0x68] sm:$0xf] }
  0x4e   :  { %563 = vmatpush.bf16.msrb.mxu0 %v1747_v14  ;;  %v2119_v9 = vor.u32 %v2511_v7, %v2118_v5  ;;  %v2536_v14 = vld [vmem:[#allocation6 + $0x1c4] sm:$0xf]  ;;  %v2495_v50 = vld [vmem:[#allocation6 + $0x74] sm:$0xf0]  ;;  %v2056_v54 = vld [vmem:[#allocation6 + $0x78] sm:$0xf0] }
  0x4f   :  { %577 = vmatpush.bf16.msrb.mxu1 %v1811_v17  ;;  %v2102_v17 = vld [vmem:[#allocation6 + $0xc8] sm:$0xf]  ;;  %v2158_v56 = vld [vmem:[#allocation6 + $0x140] sm:$0xf]  ;;  %v2520_v60 = vld [vmem:[#allocation6 + $0x144] sm:$0xf] }
  0x50   :  { %591 = vmatpush.bf16.msrb.mxu2 %v1875_v18  ;;  %v2507_v18 = vld [vmem:[#allocation6 + $0xd4] sm:$0xf0]  ;;  %v2160_v61 = vld [vmem:[#allocation6 + $0x150] sm:$0xf0]  ;;  %v2489_v4 = vld [vmem:[#allocation6 + $0x4c] sm:$0xf] }
  0x51   :  { %605 = vmatpush.bf16.msrb.mxu3 %v1939_v19  ;;  %564 = vmatmul.bf16.vlgmr.msrb.gmra.mxu0 %v2839_v62  ;;  %v2064_v62 = vld [vmem:[#allocation6 + $0x90] sm:$0xf0]  ;;  %v2227_v19 = vor.u32 %v2536_v14, %v2224_v16  ;;  %v2491_v3 = vld [vmem:[#allocation6 + $0x54] sm:$0xf0]  ;;  %v2142_v8 = vld [vmem:[#allocation6 + $0x120] sm:$0xf] }
  0x52   :  { %1033 = vmatpush.bf16.msra.mxu0 %v2111_v20  ;;  %578 = vmatmul.bf16.vlgmr.msrb.gmra.mxu1 %v2841_v0  ;;  %v2067_v38 = vor.u32 %v2496_v36, %v2064_v62  ;;  %v2494_v0 = vld [vmem:[#allocation6 + $0x6c] sm:$0xf0]  ;;  %v2103_v20 = vor.u32 %v2507_v18, %v2102_v17  ;;  %v2190_v36 = vld [vmem:[#allocation6 + $0x180] sm:$0xf]  ;;  %v2516_v10 = vld [vmem:[#allocation6 + $0x124] sm:$0xf] }
  0x53   :  { %592 = vmatmul.bf16.vlgmr.msrb.gmra.mxu2 %v2835_v55  ;;  %v2048_v55 = vld [vmem:[#allocation6 + $0x70] sm:$0xf0]  ;;  %v2047_v41 = vor.u32 %v2494_v0, %v2046_v39  ;;  %1047 = vmatpush.bf16.msra.mxu1 %v2239_v2  ;;  %v2530_v62 = vld [vmem:[#allocation6 + $0x18c] sm:$0xf0]  ;;  %v2070_v0 = vld [vmem:[#allocation6 + $0x88] sm:$0xf] }
  0x54   :  { %1061 = vmatpush.bf16.msra.mxu2 %v2115_v21  ;;  %606 = vmatmul.bf16.vlgmr.msrb.gmra.mxu3 %v2837_v59  ;;  %v2051_v59 = vor.u32 %v2492_v40, %v2048_v55  ;;  %v2505_v21 = vld [vmem:[#allocation6 + $0xcc] sm:$0xf]  ;;  %v2192_v39 = vld [vmem:[#allocation6 + $0x190] sm:$0xf0]  ;;  %v2499_v40 = vld [vmem:[#allocation6 + $0x94] sm:$0xf0] }
  0x55   :  { %1075 = vmatpush.bf16.msra.mxu3 %v2243_v6  ;;  %v2107_v23 = vor.u32 %v2505_v21, %v2104_v22  ;;  %v2038_v2 = vld [vmem:[#allocation6 + $0x48] sm:$0xf]  ;;  %v2040_v6 = vld [vmem:[#allocation6 + $0x58] sm:$0xf0]  ;;  %v2144_v12 = vld [vmem:[#allocation6 + $0x130] sm:$0xf0] }
  0x56   :  { %1034 = vmatpush.bf16.msra.mxu0 %v2095_v26  ;;  %v2532_v26 = vld [vmem:[#allocation6 + $0x1a4] sm:$0xf]  ;;  %v2039_v5 = vor.u32 %v2491_v3, %v2038_v2  ;;  %v2043_v7 = vor.u32 %v2489_v4, %v2040_v6  ;;  %v2022_v13 = vld [vmem:[#allocation6 + $0x28] sm:$0xf]  ;;  %v2487_v14 = vld [vmem:[#allocation6 + $0x34] sm:$0xf0]  ;;  %v2147_v16 = vor.u32 %v2516_v10, %v2144_v12 }
  0x57   :  { %1048 = vmatpush.bf16.msra.mxu1 %v2223_v15  ;;  %v2211_v31 = vor.u32 %v2532_v26, %v2208_v28  ;;  %v2023_v17 = vor.u32 %v2487_v14, %v2022_v13  ;;  %v2485_v18 = vld [vmem:[#allocation6 + $0x2c] sm:$0xf]  ;;  %v2126_v22 = vld [vmem:[#allocation6 + $0x100] sm:$0xf]  ;;  %v2128_v26 = vld [vmem:[#allocation6 + $0x110] sm:$0xf0] }
  0x58   :  { %1062 = vmatpush.bf16.msra.mxu2 %v2099_v27  ;;  %v2207_v27 = vor.u32 %v2534_v25, %v2206_v24  ;;  %v2512_v24 = vld [vmem:[#allocation6 + $0x104] sm:$0xf]  ;;  %v2483_v28 = vld [vmem:[#allocation6 + $0x14] sm:$0xf0]  ;;  %v2529_v3 = vld [vmem:[#allocation6 + $0x18c] sm:$0xf] }
  0x59   :  { %1076 = vmatpush.bf16.msra.mxu3 %v2227_v19  ;;  %v2024_v19 = vld [vmem:[#allocation6 + $0x38] sm:$0xf0]  ;;  %v2531_v2 = vld [vmem:[#allocation6 + $0x194] sm:$0xf0]  ;;  %v2182_v10 = vld [vmem:[#allocation6 + $0x168] sm:$0xf] }
  0x5a   :  { %1035 = vmatpush.bf16.msra.mxu0 %v2079_v32  ;;  %v2087_v32 = vor.u32 %v2503_v30, %v2086_v29  ;;  %v2027_v21 = vor.u32 %v2485_v18, %v2024_v19  ;;  %v2131_v30 = vor.u32 %v2512_v24, %v2128_v26  ;;  %v2525_v12 = vld [vmem:[#allocation6 + $0x16c] sm:$0xf]  ;;  %v2523_v18 = vld [vmem:[#allocation6 + $0x154] sm:$0xf0]  ;;  %v2152_v26 = vld [vmem:[#allocation6 + $0x138] sm:$0xf0] }
  0x5b   :  { %1049 = vmatpush.bf16.msra.mxu1 %v2207_v27  ;;  %v2006_v27 = vld [vmem:[#allocation6 + $0x8] sm:$0xf]  ;;  %v2521_v19 = vld [vmem:[#allocation6 + $0x14c] sm:$0xf]  ;;  %v2519_v24 = vld [vmem:[#allocation6 + $0x134] sm:$0xf0] }
  0x5c   :  { %1063 = vmatpush.bf16.msra.mxu2 %v2083_v33  ;;  %v2501_v33 = vld [vmem:[#allocation6 + $0xac] sm:$0xf]  ;;  %s2743_s3 = smov 127   ;;  %s2745_s0 = smov 10   ;;  %vm1686_vm10 = vcmask 31744   ;;  %vm1689_vm11 = vcmask 64512  }
  0x5d   :  { %v2091_v35 = vor.u32 %v2501_v33, %v2088_v34  ;;  %1077 = vmatpush.bf16.msra.mxu3 %v2211_v31  ;;  %v2007_v31 = vor.u32 %v2483_v28, %v2006_v27  ;;  %v2008_v33 = vld [vmem:[#allocation6 + $0x18] sm:$0xf0]  ;;  %v2246_v34 = vld [vmem:[#allocation6 + $0x1e8] sm:$0xf]  ;;  %s2746_s23 = smov 11   ;;  %vm1692_vm12 = vcmask 72704  }
  0x5e   :  { %1036 = vmatpush.bf16.msra.mxu0 %v2063_v37  ;;  %v2528_v37 = vld [vmem:[#allocation6 + $0x184] sm:$0xf]  ;;  %vm1695_vm13 = vcmask 80896   ;;  %vm1698_vm14 = vcmask 89088   ;;  %vm1701_vm15 = vcmask 97280   ;;  %s1710_s1 = sshll.u32 %s2942_s9, 4  ;;  %s1711_s1 = int_to_ptr.hbm [resolvable:$true] %s1710_s1 }
  0x5f   :  { %v2195_v55 = vor.u32 %v2528_v37, %v2192_v39  ;;  %v2541_v37 = vld [vmem:[#allocation6 + $0x1ec] sm:$0xf] }
  0x60   :  { %1064 = vmatpush.bf16.msra.mxu2 %v2067_v38  ;;  %v2191_v38 = vor.u32 %v2530_v62, %v2190_v36  ;;  %v2543_v62 = vld [vmem:[#allocation6 + $0x1f4] sm:$0xf0] }
  0x61   :  { %1078 = vmatpush.bf16.msra.mxu3 %v2195_v55  ;;  %v2230_v55 = vld [vmem:[#allocation6 + $0x1c8] sm:$0xf] }
  0x62   :  { %1037 = vmatpush.bf16.msra.mxu0 %v2047_v41  ;;  %v2071_v41 = vor.u32 %v2499_v40, %v2070_v0  ;;  %1050 = vmatpush.bf16.msra.mxu1 %v2191_v38  ;;  %v2248_v38 = vld [vmem:[#allocation6 + $0x1f8] sm:$0xf0]  ;;  %v2247_v0 = vor.u32 %v2543_v62, %v2246_v34 }
  0x63   :  { %v2251_v40 = vor.u32 %v2541_v37, %v2248_v38  ;;  %v2136_v34 = vld [vmem:[#allocation6 + $0x118] sm:$0xf0] }
  0x64   :  { %1065 = vmatpush.bf16.msra.mxu2 %v2051_v59  ;;  %v2497_v59 = vld [vmem:[#allocation6 + $0x8c] sm:$0xf] }
  0x65   :  { %v2075_v43 = vor.u32 %v2497_v59, %v2072_v42  ;;  %v2537_v59 = vld [vmem:[#allocation6 + $0x1cc] sm:$0xf] }
  0x66   :  { %1038 = vmatpush.bf16.msra.mxu0 %v2031_v46  ;;  %v2524_v46 = vld [vmem:[#allocation6 + $0x164] sm:$0xf] }
  0x67   :  { %v2179_v51 = vor.u32 %v2524_v46, %v2176_v48  ;;  %v2854_v46 = vld [vmem:[%s2935_s2] sm:$0x3]  ;;  %s2747_s2 = smov [#allocation9]  }
  0x68   :  { %1066 = vmatpush.bf16.msra.mxu2 %v2035_v47  ;;  %v2175_v47 = vor.u32 %v2526_v45, %v2174_v44  ;;  %v2232_v45 = vld [vmem:[#allocation6 + $0x1d8] sm:$0xf0]  ;;  %s1708_s24 = sshll.u32 %s2747_s2, 4  ;;  %s1709_s24 = int_to_ptr.vmem [resolvable:$true] %s1708_s24 }
  0x69   :  { %1079 = vmatpush.bf16.msra.mxu3 %v2179_v51  ;;  %v2235_v48 = vor.u32 %v2537_v59, %v2232_v45  ;;  %v2535_v51 = vld [vmem:[#allocation6 + $0x1b4] sm:$0xf0] }
  0x6a   :  { %1039 = vmatpush.bf16.msra.mxu0 %v2015_v52  ;;  %v2055_v52 = vor.u32 %v2495_v50, %v2054_v49  ;;  %1051 = vmatpush.bf16.msra.mxu1 %v2175_v47  ;;  %v2214_v50 = vld [vmem:[#allocation6 + $0x1a8] sm:$0xf] }
  0x6c   :  { %1067 = vmatpush.bf16.msra.mxu2 %v2019_v53  ;;  %v2493_v53 = vld [vmem:[#allocation6 + $0x6c] sm:$0xf] }
  0x6d   :  { %v2059_v57 = vor.u32 %v2493_v53, %v2056_v54  ;;  %v629_v54 = vperm.slane %v2854_v46, 0 }
  0x6e   :  { %1040 = vmatpush.bf16.msra.mxu0 %v1999_v58  ;;  %v2522_v58 = vld [vmem:[#allocation6 + $0x14c] sm:$0xf0] }
  0x6f   :  { %v2159_v63 = vor.u32 %v2522_v58, %v2158_v56  ;;  %v2215_v56 = vor.u32 %v2535_v51, %v2214_v50  ;;  %v2551_v50 = vld [vmem:[#allocation8 + $0x38] sm:$0xff]  ;;  %v2550_v51 = vld [vmem:[#allocation8 + $0x30] sm:$0xff] }
  0x70   :  { %1068 = vmatpush.bf16.msra.mxu2 %v2003_v1  ;;  %v2163_v1 = vor.u32 %v2520_v60, %v2160_v61 }
  0x71   :  { %1052 = vmatpush.bf16.msra.mxu1 %v2159_v63 }
  0x72   :  { %1089 = vmatpush.bf16.msrb.mxu0 %v2119_v9  ;;  %1080 = vmatpush.bf16.msra.mxu3 %v2163_v1  ;;  %v2518_v9 = vld [vmem:[#allocation6 + $0x12c] sm:$0xf0]  ;;  %v2198_v1 = vld [vmem:[#allocation6 + $0x188] sm:$0xf] }
  0x73   :  { %v2199_v6 = vor.u32 %v2531_v2, %v2198_v1  ;;  %v2555_v1 = vld [vmem:[#allocation8 + $0x58] sm:$0xff] }
  0x74   :  { %1117 = vmatpush.bf16.msrb.mxu2 %v2123_v11  ;;  %v2143_v11 = vor.u32 %v2518_v9, %v2142_v8  ;;  %v2575_v2 = vld [vmem:[#allocation8 + $0xf8] sm:$0xff] }
  0x76   :  { %1090 = vmatpush.bf16.msrb.mxu0 %v2103_v20  ;;  %1053 = vmatpush.bf16.msra.mxu1 %v2143_v11  ;;  %v2527_v11 = vld [vmem:[#allocation6 + $0x174] sm:$0xf0] }
  0x77   :  { %1081 = vmatpush.bf16.msra.mxu3 %v2147_v16  ;;  %v2183_v14 = vor.u32 %v2527_v11, %v2182_v10  ;;  %v2573_v10 = vld [vmem:[#allocation8 + $0xe8] sm:$0xff]  ;;  %v2563_v11 = vld [vmem:[#allocation8 + $0x98] sm:$0xff] }
  0x78   :  { %1118 = vmatpush.bf16.msrb.mxu2 %v2107_v23  ;;  %v2514_v23 = vld [vmem:[#allocation6 + $0x10c] sm:$0xf0] }
  0x79   :  { %v2127_v25 = vor.u32 %v2514_v23, %v2126_v22  ;;  %v2150_v23 = vld [vmem:[#allocation6 + $0x128] sm:$0xf] }
  0x7a   :  { %1091 = vmatpush.bf16.msrb.mxu0 %v2087_v32  ;;  %v2481_v32 = vld [vmem:[#allocation6 + $0xc] sm:$0xf]  ;;  %v2151_v27 = vor.u32 %v2519_v24, %v2150_v23  ;;  %v703_v23 = vld [vmem:[%s2937_s4] sm:$0xf] }
  0x7b   :  { %1054 = vmatpush.bf16.msra.mxu1 %v2127_v25  ;;  %v2011_v36 = vor.u32 %v2481_v32, %v2008_v33  ;;  %1082 = vmatpush.bf16.msra.mxu3 %v2131_v30  ;;  %v2517_v25 = vld [vmem:[#allocation6 + $0x12c] sm:$0xf]  ;;  %v2515_v32 = vld [vmem:[#allocation6 + $0x114] sm:$0xf0] }
  0x7c   :  { %1119 = vmatpush.bf16.msrb.mxu2 %v2091_v35  ;;  %v2155_v30 = vor.u32 %v2517_v25, %v2152_v26  ;;  %v2513_v33 = vld [vmem:[#allocation6 + $0x10c] sm:$0xf]  ;;  %v705_v26 = vperm.slane %v703_v23, 0 }
  0x7e   :  { %1092 = vmatpush.bf16.msrb.mxu0 %v2071_v41  ;;  %v2539_v41 = vld [vmem:[#allocation6 + $0x1d4] sm:$0xf0] }
  0x7f   :  { %1103 = vmatpush.bf16.msrb.mxu1 %v2247_v0  ;;  %v2231_v44 = vor.u32 %v2539_v41, %v2230_v55  ;;  %1131 = vmatpush.bf16.msrb.mxu3 %v2251_v40 }
  0x80   :  { %1120 = vmatpush.bf16.msrb.mxu2 %v2075_v43 }
  0x82   :  { %1093 = vmatpush.bf16.msrb.mxu0 %v2055_v52  ;;  %v2533_v52 = vld [vmem:[#allocation6 + $0x1ac] sm:$0xf] }
  0x83   :  { %1104 = vmatpush.bf16.msrb.mxu1 %v2231_v44  ;;  %1132 = vmatpush.bf16.msrb.mxu3 %v2235_v48 }
  0x84   :  { %1121 = vmatpush.bf16.msrb.mxu2 %v2059_v57  ;;  %v2216_v57 = vld [vmem:[#allocation6 + $0x1b8] sm:$0xf0] }
  0x85   :  { %v2219_v60 = vor.u32 %v2533_v52, %v2216_v57  ;;  %v2559_v52 = vld [vmem:[#allocation8 + $0x78] sm:$0xff] }
  0x86   :  { %1094 = vmatpush.bf16.msrb.mxu0 %v2039_v5  ;;  %v2547_v57 = vld [vmem:[#allocation8 + $0x18] sm:$0xff] }
  0x87   :  { %1105 = vmatpush.bf16.msrb.mxu1 %v2215_v56  ;;  %1133 = vmatpush.bf16.msrb.mxu3 %v2219_v60  ;;  %v2557_v56 = vld [vmem:[#allocation8 + $0x68] sm:$0xff]  ;;  %v2556_v60 = vld [vmem:[#allocation8 + $0x60] sm:$0xff] }
  0x88   :  { %1122 = vmatpush.bf16.msrb.mxu2 %v2043_v7  ;;  %v2200_v7 = vld [vmem:[#allocation6 + $0x198] sm:$0xf0] }
  0x89   :  { %v2203_v8 = vor.u32 %v2529_v3, %v2200_v7  ;;  %v2545_v3 = vld [vmem:[#allocation8 + $0x8] sm:$0xff]  ;;  %v2544_v7 = vld [vmem:[#allocation8] sm:$0xff] }
  0x8a   :  { %1095 = vmatpush.bf16.msrb.mxu0 %v2023_v17  ;;  %v2166_v17 = vld [vmem:[#allocation6 + $0x148] sm:$0xf] }
  0x8b   :  { %1106 = vmatpush.bf16.msrb.mxu1 %v2199_v6  ;;  %1134 = vmatpush.bf16.msrb.mxu3 %v2203_v8  ;;  %v2574_v6 = vld [vmem:[#allocation8 + $0xf0] sm:$0xff]  ;;  %v2564_v8 = vld [vmem:[#allocation8 + $0xa0] sm:$0xff] }
  0x8c   :  { %1123 = vmatpush.bf16.msrb.mxu2 %v2027_v21  ;;  %v2167_v21 = vor.u32 %v2523_v18, %v2166_v17  ;;  %v2570_v18 = vld [vmem:[#allocation8 + $0xd0] sm:$0xff] }
  0x8e   :  { %1096 = vmatpush.bf16.msrb.mxu0 %v2007_v31  ;;  %v2134_v31 = vld [vmem:[#allocation6 + $0x108] sm:$0xf] }
  0x8f   :  { %1107 = vmatpush.bf16.msrb.mxu1 %v2183_v14  ;;  %v2562_v14 = vld [vmem:[#allocation8 + $0x90] sm:$0xff] }
  0x90   :  { %1124 = vmatpush.bf16.msrb.mxu2 %v2011_v36  ;;  %v2139_v36 = vor.u32 %v2513_v33, %v2136_v34 }
  0x93   :  { %1108 = vmatpush.bf16.msrb.mxu1 %v2167_v21 }
  0x97   :  { %1109 = vmatpush.bf16.msrb.mxu1 %v2151_v27 }
  0xae   :  { %v509_v15 = vpop.f32.mrf.mxu0 }
  0xaf   :  { %v523_v20 = vpop.f32.mrf.mxu1 }
  0xb0   :  { %v524_v29 = vadd.f32 %v523_v20, %v509_v15  ;;  %v2184_v15 = vld [vmem:[#allocation6 + $0x178] sm:$0xf0] }
  0xb1   :  { %v2187_v16 = vor.u32 %v2525_v12, %v2184_v15  ;;  %v2168_v20 = vld [vmem:[#allocation6 + $0x158] sm:$0xf0]  ;;  %v2552_v12 = vld [vmem:[#allocation8 + $0x40] sm:$0xff] }
  0xb2   :  { %v2171_v22 = vor.u32 %v2521_v19, %v2168_v20  ;;  %v2571_v15 = vld [vmem:[#allocation8 + $0xd8] sm:$0xff]  ;;  %v2560_v19 = vld [vmem:[#allocation8 + $0x80] sm:$0xff]  ;;  %v2569_v20 = vld [vmem:[#allocation8 + $0xc8] sm:$0xff] }
  0xb3   :  { %1135 = vmatpush.bf16.msrb.mxu3 %v2187_v16  ;;  %v2561_v16 = vld [vmem:[#allocation8 + $0x88] sm:$0xff] }
  0xb6   :  { %v537_v35 = vpop.f32.mrf.mxu2  ;;  %v511_v43 = vpop.f32.mrf.mxu0 }
  0xb7   :  { %v551_v39 = vpop.f32.mrf.mxu3  ;;  %v538_v42 = vadd.f32 %v537_v35, %v524_v29  ;;  %v525_v47 = vpop.f32.mrf.mxu1  ;;  %1136 = vmatpush.bf16.msrb.mxu3 %v2171_v22  ;;  %v2135_v35 = vor.u32 %v2515_v32, %v2134_v31  ;;  %v2568_v22 = vld [vmem:[#allocation8 + $0xc0] sm:$0xff]  ;;  %v706_v32 = vperm.slane %v703_v23, 1 }
  0xb8   :  { %v526_v49 = vadd.f32 %v525_v47, %v511_v43 }
  0xb9   :  { %v552_v53 = vadd.f32 %v551_v39, %v538_v42  ;;  %1110 = vmatpush.bf16.msrb.mxu1 %v2135_v35  ;;  %v630_v42 = vperm.slane %v2854_v46, 1  ;;  %v2548_v46 = vld [vmem:[#allocation8 + $0x20] sm:$0xff] }
  0xbb   :  { %v633_v4 = vadd.f32 %v629_v54, %v552_v53  ;;  %1137 = vmatpush.bf16.msrb.mxu3 %v2155_v30  ;;  %v2549_v53 = vld [vmem:[#allocation8 + $0x28] sm:$0xff] }
  0xbe   :  { %v539_v58 = vpop.f32.mrf.mxu2 }
  0xbf   :  { %v540_v61 = vadd.f32 %v539_v58, %v526_v49  ;;  %v553_v63 = vpop.f32.mrf.mxu3  ;;  %1138 = vmatpush.bf16.msrb.mxu3 %v2139_v36  ;;  %v2567_v58 = vld [vmem:[#allocation8 + $0xb8] sm:$0xff] }
  0xc1   :  { %v554_v5 = vadd.f32 %v553_v63, %v540_v61  ;;  %v2546_v61 = vld [vmem:[#allocation8 + $0x10] sm:$0xff] }
  0xc2   :  { %v2566_v63 = vld [vmem:[#allocation8 + $0xb0] sm:$0xff] }
  0xc3   :  { %v635_v9 = vadd.f32 %v629_v54, %v554_v5  ;;  %v2558_v54 = vld [vmem:[#allocation8 + $0x70] sm:$0xff] }
  0xc4   :  { %v2554_v5 = vld [vmem:[#allocation8 + $0x50] sm:$0xff] }
  0xc5   :  { %v637_v13 = vpack.c.bf16 %v635_v9, %v633_v4  ;;  %v2565_v4 = vld [vmem:[#allocation8 + $0xa8] sm:$0xff] }
  0xc6   :  { %v2553_v9 = vld [vmem:[#allocation8 + $0x48] sm:$0xff] }
  0xc7   :  { %1041 = vmatmul.bf16.vlgmr.msra.gmra.mxu0 %v637_v13  ;;  %1069 = vmatmul.bf16.vlgmr.msra.gmra.mxu2 %v637_v13 }
  0xc8   :  { %1409 = vmatpush.bf16.msra.mxu0 %v2551_v50  ;;  %1437 = vmatpush.bf16.msra.mxu2 %v2567_v58 }
  0xcc   :  { %1410 = vmatpush.bf16.msra.mxu0 %v2550_v51  ;;  %1438 = vmatpush.bf16.msra.mxu2 %v2566_v63  ;;  %v2581_v63 = vld [vmem:[%s2940_s7 + $0x28] sm:$0xff] }
  0xce   :  { %v565_v28 = vpop.f32.mrf.mxu0 }
  0xcf   :  { %v579_v29 = vpop.f32.mrf.mxu1 }
  0xd0   :  { %v580_v37 = vadd.f32 %v579_v29, %v565_v28  ;;  %1411 = vmatpush.bf16.msra.mxu0 %v2549_v53  ;;  %1439 = vmatpush.bf16.msra.mxu2 %v2565_v4  ;;  %v2577_v4 = vld [vmem:[%s2940_s7 + $0x8] sm:$0xff] }
  0xd4   :  { %1412 = vmatpush.bf16.msra.mxu0 %v2548_v46  ;;  %1440 = vmatpush.bf16.msra.mxu2 %v2564_v8 }
  0xd6   :  { %v593_v62 = vpop.f32.mrf.mxu2  ;;  %v567_v39 = vpop.f32.mrf.mxu0 }
  0xd7   :  { %v607_v38 = vpop.f32.mrf.mxu3  ;;  %1097 = vmatmul.bf16.vlgmr.msrb.gmra.mxu0 %v637_v13  ;;  %1125 = vmatmul.bf16.vlgmr.msrb.gmra.mxu2 %v637_v13  ;;  %v581_v0 = vpop.f32.mrf.mxu1  ;;  %v594_v40 = vadd.f32 %v593_v62, %v580_v37  ;;  %v2572_v13 = vld [vmem:[#allocation8 + $0xe0] sm:$0xff] }
  0xd8   :  { %v582_v55 = vadd.f32 %v581_v0, %v567_v39  ;;  %1413 = vmatpush.bf16.msra.mxu0 %v2547_v57  ;;  %1441 = vmatpush.bf16.msra.mxu2 %v2563_v11 }
  0xd9   :  { %v608_v59 = vadd.f32 %v607_v38, %v594_v40 }
  0xdb   :  { %v634_v47 = vadd.f32 %v630_v42, %v608_v59  ;;  %v707_v59 = vperm.slane %v703_v23, 2 }
  0xdc   :  { %1414 = vmatpush.bf16.msra.mxu0 %v2546_v61  ;;  %1442 = vmatpush.bf16.msra.mxu2 %v2562_v14  ;;  %v2582_v61 = vld [vmem:[%s2940_s7 + $0x30] sm:$0xff] }
  0xde   :  { %v595_v41 = vpop.f32.mrf.mxu2 }
  0xdf   :  { %v596_v43 = vadd.f32 %v595_v41, %v582_v55  ;;  %v609_v44 = vpop.f32.mrf.mxu3 }
  0xe0   :  { %1415 = vmatpush.bf16.msra.mxu0 %v2545_v3  ;;  %1443 = vmatpush.bf16.msra.mxu2 %v2561_v16  ;;  %v2578_v3 = vld [vmem:[%s2940_s7 + $0x10] sm:$0xff] }
  0xe1   :  { %v610_v45 = vadd.f32 %v609_v44, %v596_v43 }
  0xe3   :  { %v636_v48 = vadd.f32 %v630_v42, %v610_v45 }
  0xe4   :  { %1416 = vmatpush.bf16.msra.mxu0 %v2544_v7  ;;  %1444 = vmatpush.bf16.msra.mxu2 %v2560_v19 }
  0xe5   :  { %v638_v49 = vpack.c.bf16 %v636_v48, %v634_v47  ;;  %v708_v48 = vperm.slane %v703_v23, 3 }
  0xe7   :  { %1055 = vmatmul.bf16.vlgmr.msra.gmra.mxu1 %v638_v49  ;;  %1083 = vmatmul.bf16.vlgmr.msra.gmra.mxu3 %v638_v49 }
  0xe8   :  { %1423 = vmatpush.bf16.msra.mxu1 %v2559_v52  ;;  %1451 = vmatpush.bf16.msra.mxu3 %v2575_v2  ;;  %v2579_v2 = vld [vmem:[%s2940_s7 + $0x18] sm:$0xff] }
  0xec   :  { %1424 = vmatpush.bf16.msra.mxu1 %v2558_v54  ;;  %1452 = vmatpush.bf16.msra.mxu3 %v2574_v6 }
  0xf0   :  { %1425 = vmatpush.bf16.msra.mxu1 %v2557_v56  ;;  %1453 = vmatpush.bf16.msra.mxu3 %v2573_v10 }
  0xf4   :  { %1426 = vmatpush.bf16.msra.mxu1 %v2556_v60  ;;  %1454 = vmatpush.bf16.msra.mxu3 %v2572_v13  ;;  %v2583_v60 = vld [vmem:[%s2940_s7 + $0x38] sm:$0xff] }
  0xf5   :  { %1536 = vmatpush.bf16.msrb.mxu0 %v2583_v60 }
  0xf7   :  { %1111 = vmatmul.bf16.vlgmr.msrb.gmra.mxu1 %v638_v49  ;;  %1139 = vmatmul.bf16.vlgmr.msrb.gmra.mxu3 %v638_v49 }
  0xf8   :  { %1427 = vmatpush.bf16.msra.mxu1 %v2555_v1  ;;  %1455 = vmatpush.bf16.msra.mxu3 %v2571_v15  ;;  %v2580_v1 = vld [vmem:[%s2940_s7 + $0x20] sm:$0xff] }
  0xf9   :  { %1537 = vmatpush.bf16.msrb.mxu0 %v2582_v61 }
  0xfc   :  { %1428 = vmatpush.bf16.msra.mxu1 %v2554_v5  ;;  %1456 = vmatpush.bf16.msra.mxu3 %v2570_v18  ;;  %v2576_v5 = vld [vmem:[%s2940_s7] sm:$0xff] }
  0xfd   :  { %1538 = vmatpush.bf16.msrb.mxu0 %v2581_v63 }
 0x100   :  { %1429 = vmatpush.bf16.msra.mxu1 %v2553_v9  ;;  %1457 = vmatpush.bf16.msra.mxu3 %v2569_v20  ;;  %v2600_v9 = vld [vmem:[%s2939_s6] ss:$0 sm:$0xff]  ;;  %s2741_s6 = smov 125  }
 0x101   :  { %1539 = vmatpush.bf16.msrb.mxu0 %v2580_v1 }
 0x104   :  { %1430 = vmatpush.bf16.msra.mxu1 %v2552_v12  ;;  %1458 = vmatpush.bf16.msra.mxu3 %v2568_v22 }
 0x105   :  { %1540 = vmatpush.bf16.msrb.mxu0 %v2579_v2 }
 0x109   :  { %1541 = vmatpush.bf16.msrb.mxu0 %v2578_v3 }
 0x10d   :  { %1542 = vmatpush.bf16.msrb.mxu0 %v2577_v4 }
 0x111   :  { %1543 = vmatpush.bf16.msrb.mxu0 %v2576_v5 }
 0x144   :  { %v1042_v17 = vpop.f32.mrf.mxu0 }
 0x145   :  { %v1043_v29 = vadd.f32 %v1042_v17, %v705_v26 }
 0x14a   :  { %v1070_v21 = vpop.f32.mrf.mxu2 }
 0x14b   :  { %v1071_v62 = vadd.f32 %v1070_v21, %v706_v32 }
 0x14c   :  { %v1044_v24 = vpop.f32.mrf.mxu0 }
 0x14d   :  { %v1045_v30 = vadd.f32 %v1044_v24, %v705_v26  ;;  %v2601_v26 = vld [vmem:[%s2941_s8] ss:$0 sm:$0xff]  ;;  %s2742_s8 = smov 126  }
 0x152   :  { %v1072_v27 = vpop.f32.mrf.mxu2 }
 0x153   :  { %v1073_v37 = vadd.f32 %v1072_v27, %v706_v32 }
 0x154   :  { %v1098_v35 = vpop.f32.mrf.mxu0 }
 0x155   :  { %v1099_v44 = vadd.f32 %v1098_v35, %v707_v59 }
 0x15a   :  { %v1126_v40 = vpop.f32.mrf.mxu2 }
 0x15b   :  { %v1127_v53 = vadd.f32 %v1126_v40, %v708_v48 }
 0x15c   :  { %v1100_v42 = vpop.f32.mrf.mxu0 }
 0x15d   :  { %v1101_v45 = vadd.f32 %v1100_v42, %v707_v59 }
 0x162   :  { %v1128_v51 = vpop.f32.mrf.mxu2 }
 0x163   :  { %v1129_v54 = vadd.f32 %v1128_v51, %v708_v48 }
 0x164   :  { %v1056_v25 = vpop.f32.mrf.mxu1 }
 0x165   :  { %v1057_v33 = vadd.f32 %v1056_v25, %v1043_v29 }
 0x16a   :  { %v1084_v28 = vpop.f32.mrf.mxu3 }
 0x16b   :  { %v1085_v39 = vadd.f32 %v1084_v28, %v1071_v62 }
 0x16c   :  { %v1058_v31 = vpop.f32.mrf.mxu1 }
 0x16d   :  { %v1059_v34 = vadd.f32 %v1058_v31, %v1045_v30 }
 0x16f   :  { %v1145_v36 = vpack.c.bf16 %v1059_v34, %v1057_v33 }
 0x171   :  { %1417 = vmatmul.bf16.vlgmr.msra.gmra.mxu0 %v1145_v36 }
 0x172   :  { %v1086_v38 = vpop.f32.mrf.mxu3 }
 0x173   :  { %v1087_v0 = vadd.f32 %v1086_v38, %v1073_v37 }
 0x174   :  { %v1112_v55 = vpop.f32.mrf.mxu1 }
 0x175   :  { %v1146_v41 = vpack.c.bf16 %v1087_v0, %v1085_v39  ;;  %v1113_v49 = vadd.f32 %v1112_v55, %v1099_v44 }
 0x177   :  { %1431 = vmatmul.bf16.vlgmr.msra.gmra.mxu1 %v1146_v41 }
 0x17a   :  { %v1140_v43 = vpop.f32.mrf.mxu3 }
 0x17b   :  { %v1141_v56 = vadd.f32 %v1140_v43, %v1127_v53 }
 0x17c   :  { %v1114_v47 = vpop.f32.mrf.mxu1 }
 0x17d   :  { %v1115_v50 = vadd.f32 %v1114_v47, %v1101_v45 }
 0x17f   :  { %v1147_v52 = vpack.c.bf16 %v1115_v50, %v1113_v49 }
 0x181   :  { %1445 = vmatmul.bf16.vlgmr.msra.gmra.mxu2 %v1147_v52 }
 0x182   :  { %v1142_v46 = vpop.f32.mrf.mxu3 }
 0x183   :  { %v1143_v57 = vadd.f32 %v1142_v46, %v1129_v54 }
 0x185   :  { %v1148_v58 = vpack.c.bf16 %v1143_v57, %v1141_v56 }
 0x187   :  { %1459 = vmatmul.bf16.vlgmr.msra.gmra.mxu3 %v1148_v58 }
 0x1ee   :  { %v1418_v6 = vpop.f32.mrf.mxu0 }
 0x1ef   :  { %v1419_v12 = vadd.f32 %v2600_v9, %v1418_v6 }
 0x1f4   :  { %v1432_v7 = vpop.f32.mrf.mxu1 }
 0x1f5   :  { %v1433_v14 = vadd.f32 %v1432_v7, %v1419_v12 }
 0x1f6   :  { %v1420_v10 = vpop.f32.mrf.mxu0 }
 0x1f7   :  { %v1421_v15 = vadd.f32 %v2600_v9, %v1420_v10 }
 0x1fc   :  { %v1434_v13 = vpop.f32.mrf.mxu1 }
 0x1fd   :  { %v1435_v17 = vadd.f32 %v1434_v13, %v1421_v15 }
 0x204   :  { %v1446_v8 = vpop.f32.mrf.mxu2 }
 0x205   :  { %v1447_v18 = vadd.f32 %v1446_v8, %v1433_v14 }
 0x20a   :  { %v1460_v11 = vpop.f32.mrf.mxu3 }
 0x20b   :  { %v1461_v19 = vadd.f32 %v1460_v11, %v1447_v18 }
 0x20c   :  { %v1448_v16 = vpop.f32.mrf.mxu2 }
 0x20d   :  { %v1449_v20 = vadd.f32 %v1448_v16, %v1435_v17  ;;  %v1465_v23 = vmax.f32 %v1461_v19, 0.0 }
 0x212   :  { %v1462_v21 = vpop.f32.mrf.mxu3 }
 0x213   :  { %v1463_v22 = vadd.f32 %v1462_v21, %v1449_v20 }
 0x215   :  { %v1466_v24 = vmax.f32 %v1463_v22, 0.0 }
 0x217   :  { %v1467_v25 = vpack.c.bf16 %v1466_v24, %v1465_v23 }
 0x219   :  { %1544 = vmatmul.bf16.vlgmr.msrb.gmra.mxu0 %v1467_v25 }
 0x296   :  { %v1545_v27 = vpop.f32.mrf.mxu0 }
 0x297   :  { %v2891_v28 = vadd.f32 %v2601_v26, %v1545_v27 }
 0x299   :  { %v1550_v29 = vand.u32 2147483647, %v2891_v28  ;;  %v1594_v41 = vmax.f32 %v2891_v28, 0.0  ;;  %vm1558_vm9 = vcmp.ge.f32.partialorder %v2891_v28, 0.0 }
 0x29b   :  { %v1552_v30 = vsub.f32 0.0, %v1550_v29 }
 0x29d   :  { %v1554_v31 = vmul.f32 1.442695, %v1552_v30 }
 0x29e   :  { %v1547_v32 = vpop.f32.mrf.mxu0 }
 0x29f   :  { %2602 = vpow2.f32 %v1554_v31  ;;  %v2894_v33 = vadd.f32 %v2601_v26, %v1547_v32 }
 0x2a1   :  { %v1551_v34 = vand.u32 2147483647, %v2894_v33  ;;  %v1595_v50 = vmax.f32 %v2894_v33, 0.0  ;;  %vm1559_vm8 = vcmp.ge.f32.partialorder %v2894_v33, 0.0 }
 0x2a3   :  { %v1553_v35 = vsub.f32 0.0, %v1551_v34 }
 0x2a5   :  { %v2897_v36 = vpop.eup %2602  ;;  %v1556_v62 = vmul.f32 1.442695, %v1553_v35 }
 0x2a6   :  { %v1562_v37 = vadd.f32 1.0, %v2897_v36  ;;  %v1560_v11 = vsel %vm1558_vm9, 1.0, %v2897_v36 }
 0x2a7   :  { %2604 = vpow2.f32 %v1556_v62 }
 0x2a8   :  { %2606 = vrcp.f32 %v1562_v37  ;;  %vm1569_vm2 = vweird.f32 %v1562_v37  ;;  %v1575_v61 = vand.u32 2147483648, %v1562_v37  ;;  %v1573_v2 = vand.u32 2147483647, %v1562_v37 }
 0x2a9   :  { %2608 = vlog2.f32 %v1562_v37 }
 0x2aa   :  { %v1576_v6 = vor.u32 1.1754944e-38, %v1575_v61  ;;  %vm1574_vm7 = vcmp.eq.f32.partialorder %v1573_v2, 8.507059e+37 }
 0x2ad   :  { %v2605_v38 = vpop.eup %2604 }
 0x2ae   :  { %v2607_v39 = vpop.eup %2606  ;;  %v1563_v0 = vadd.f32 1.0, %v2605_v38  ;;  %v1561_v9 = vsel %vm1559_vm8, 1.0, %v2605_v38 }
 0x2af   :  { %v2609_v40 = vpop.eup %2608  ;;  %v1565_v55 = vmul.f32 %v2607_v39, %v1562_v37  ;;  %vm1570_vm0 = vweird.f32 %v2607_v39 }
 0x2b0   :  { %v1597_v59 = vmul.f32 0.6931472, %v2609_v40  ;;  %2610 = vrcp.f32 %v1563_v0  ;;  %v1590_v54 = vand.u32 2147483648, %v1563_v0  ;;  %v1588_v60 = vand.u32 2147483647, %v1563_v0  ;;  %vm2902_vm4 = vmor %vm1569_vm2, %vm1570_vm0 }
 0x2b1   :  { %2612 = vlog2.f32 %v1563_v0  ;;  %v1566_v43 = vsub.f32 1.0, %v1565_v55  ;;  %vm1584_vm3 = vweird.f32 %v1563_v0 }
 0x2b2   :  { %v1600_v42 = vadd.f32 %v1597_v59, %v1594_v41  ;;  %v1591_v4 = vor.u32 1.1754944e-38, %v1590_v54  ;;  %vm1589_vm6 = vcmp.eq.f32.partialorder %v1588_v60, 8.507059e+37 }
 0x2b3   :  { %v1567_v49 = vmul.f32 %v2607_v39, %v1566_v43 }
 0x2b4   :  { %v1602_v44 = vsub.f32 0.0, %v1600_v42 }
 0x2b5   :  { %v1568_v57 = vadd.f32 %v2607_v39, %v1567_v49 }
 0x2b6   :  { %v2611_v45 = vpop.eup %2610  ;;  %1634 = vrot.lane.b32.xlu2 %v1602_v44, %s2741_s6  ;;  %1622 = vrot.lane.b32.xlu1 %v1602_v44, %s2742_s8  ;;  %v1604_v56 = vmul.f32 1.442695, %v1602_v44 }
 0x2b7   :  { %v2613_v47 = vpop.eup %2612  ;;  %1610 = vrot.lane.b32.xlu0 %v1602_v44, %s2743_s3  ;;  %v1580_v48 = vmul.f32 %v2611_v45, %v1563_v0  ;;  %vm1585_vm1 = vweird.f32 %v2611_v45  ;;  %v1572_v5 = vsel %vm2902_vm4, %v2607_v39, %v1568_v57 }
 0x2b8   :  { %v1599_v51 = vmul.f32 0.6931472, %v2613_v47  ;;  %vm1586_vm5 = vmor %vm1584_vm3, %vm1585_vm1  ;;  %2614 = vpow2.f32 %v1604_v56  ;;  %v1577_v8 = vsel %vm1574_vm7, %v1576_v6, %v1572_v5 }
 0x2b9   :  { %v1581_v52 = vsub.f32 1.0, %v1580_v48  ;;  %v1578_v14 = vmul.f32 %v1577_v8, %v1560_v11 }
 0x2ba   :  { %v1601_v53 = vadd.f32 %v1599_v51, %v1595_v50 }
 0x2bb   :  { %v1582_v46 = vmul.f32 %v2611_v45, %v1581_v52 }
 0x2bc   :  { %v1603_v58 = vsub.f32 0.0, %v1601_v53 }
 0x2bd   :  { %v1583_v63 = vadd.f32 %v2611_v45, %v1582_v46 }
 0x2be   :  { %1636 = vrot.lane.b32.xlu2 %v1603_v58, %s2741_s6  ;;  %1624 = vrot.lane.b32.xlu1 %v1603_v58, %s2742_s8  ;;  %v1606_v12 = vmul.f32 1.442695, %v1603_v58  ;;  %v2615_v13 = vpop.eup %2614 }
 0x2bf   :  { %1612 = vrot.lane.b32.xlu0 %v1603_v58, %s2743_s3  ;;  %v1587_v3 = vsel %vm1586_vm5, %v2611_v45, %v1583_v63 }
 0x2c0   :  { %v1592_v7 = vsel %vm1589_vm6, %v1591_v4, %v1587_v3  ;;  %2616 = vpow2.f32 %v1606_v12 }
 0x2c1   :  { %v1593_v10 = vmul.f32 %v1592_v7, %v1561_v9 }
 0x2c6   :  { %1650 = vrot.lane.b32.xlu1 %v1593_v10, %s2740_s27  ;;  %1656 = vrot.lane.b32.xlu2 %v2615_v13, %s2737_s22  ;;  %v2617_v15 = vpop.eup %2616 }
 0x2c7   :  { %1648 = vrot.lane.b32.xlu0 %v1578_v14, %s2740_s27  ;;  %s2744_s27 = smov 9  }
 0x2cf   :  { %1658 = vrot.lane.b32.xlu0 %v2617_v15, %s2737_s22 }
 0x310   :  { %v1635_v19 = vpop.permute.xlu2 %1634 }
 0x318   :  { %v1637_v30 = vpop.permute.xlu2 %1636 }
 0x320   :  { %v1657_v55 = vpop.permute.xlu2 %1656 }
 0x328   :  { %v1623_v16 = vpop.permute.xlu1 %1622 }
 0x329   :  { %v1611_v17 = vpop.permute.xlu0 %1610 }
 0x32a   :  { %v1616_v18 = vadd.f32 %v1611_v17, %v1602_v44 }
 0x32c   :  { %v1618_v20 = vmul.f32 1.442695, %v1616_v18  ;;  %v1628_v21 = vadd.f32 %v1623_v16, %v1616_v18 }
 0x32e   :  { %2618 = vpow2.f32 %v1618_v20  ;;  %v1630_v22 = vmul.f32 1.442695, %v1628_v21  ;;  %v1640_v32 = vadd.f32 %v1635_v19, %v1628_v21 }
 0x330   :  { %2620 = vpow2.f32 %v1630_v22  ;;  %v1625_v25 = vpop.permute.xlu1 %1624  ;;  %v1642_v62 = vmul.f32 1.442695, %v1640_v32 }
 0x331   :  { %v1613_v23 = vpop.permute.xlu0 %1612 }
 0x332   :  { %v1617_v24 = vadd.f32 %v1613_v23, %v1603_v58 }
 0x334   :  { %v2619_v26 = vpop.eup %2618  ;;  %v1620_v27 = vmul.f32 1.442695, %v1617_v24  ;;  %v1629_v29 = vadd.f32 %v1625_v25, %v1617_v24 }
 0x335   :  { %1664 = vrot.lane.b32.xlu1 %v2619_v26, %s2744_s27 }
 0x336   :  { %v2621_v31 = vpop.eup %2620  ;;  %2622 = vpow2.f32 %v1620_v27  ;;  %v1632_v34 = vmul.f32 1.442695, %v1629_v29  ;;  %v1641_v35 = vadd.f32 %v1637_v30, %v1629_v29 }
 0x337   :  { %1672 = vrot.lane.b32.xlu0 %v2621_v31, %s2745_s0 }
 0x338   :  { %2624 = vpow2.f32 %v1632_v34  ;;  %v1644_v36 = vmul.f32 1.442695, %v1641_v35  ;;  %v1651_v41 = vpop.permute.xlu1 %1650 }
 0x339   :  { %v1649_v40 = vpop.permute.xlu0 %1648 }
 0x33a   :  { %2626 = vpow2.f32 %v1644_v36  ;;  %v1687_v43 = vsel %vm1686_vm10, %v2891_v28, %v1649_v40  ;;  %v1688_v28 = vsel %vm1686_vm10, %v2894_v33, %v1651_v41 }
 0x33b   :  { %2628 = vpow2.f32 %v1642_v62  ;;  %v1690_v45 = vsel %vm1689_vm11, %v1687_v43, %v1657_v55 }
 0x33c   :  { %v2623_v37 = vpop.eup %2622 }
 0x33d   :  { %1666 = vrot.lane.b32.xlu2 %v2623_v37, %s2744_s27 }
 0x33e   :  { %v2625_v38 = vpop.eup %2624 }
 0x33f   :  { %1674 = vrot.lane.b32.xlu1 %v2625_v38, %s2745_s0 }
 0x340   :  { %v2627_v39 = vpop.eup %2626 }
 0x341   :  { %1682 = vrot.lane.b32.xlu0 %v2627_v39, %s2746_s23  ;;  %v2629_v0 = vpop.eup %2628  ;;  %v1659_v42 = vpop.permute.xlu0 %1658 }
 0x342   :  { %v1691_v52 = vsel %vm1689_vm11, %v1688_v28, %v1659_v42 }
 0x345   :  { %1680 = vrot.lane.b32.xlu2 %v2629_v0, %s2746_s23 }
 0x397   :  { %v1667_v59 = vpop.permute.xlu2 %1666 }
 0x398   :  { %v1694_v53 = vsel %vm1692_vm12, %v1691_v52, %v1667_v59 }
 0x39f   :  { %v1681_v49 = vpop.permute.xlu2 %1680 }
 0x3a7   :  { %v1665_v44 = vpop.permute.xlu1 %1664 }
 0x3a8   :  { %v1693_v47 = vsel %vm1692_vm12, %v1690_v45, %v1665_v44 }
 0x3a9   :  { %v1673_v48 = vpop.permute.xlu0 %1672 }
 0x3aa   :  { %v1696_v50 = vsel %vm1695_vm13, %v1693_v47, %v1673_v48 }
 0x3ab   :  { %v1699_v51 = vsel %vm1698_vm14, %v1696_v50, %v1681_v49 }
 0x3ac   :  { %1702 = vst.msk [vmem:[#allocation9] sm:$0xff] %vm1701_vm15, %v1699_v51 }
 0x3b1   :  { %v1675_v54 = vpop.permute.xlu1 %1674 }
 0x3b2   :  { %v1697_v46 = vsel %vm1695_vm13, %v1694_v53, %v1675_v54 }
 0x3b3   :  { %v1683_v56 = vpop.permute.xlu0 %1682 }
 0x3b4   :  { %v1700_v57 = vsel %vm1698_vm14, %v1697_v46, %v1683_v56 }
 0x3b5   :  { %1703 = vst.msk [vmem:[#allocation9 + $0x8] sm:$0xff] %vm1701_vm15, %v1700_v57 }
 0x3b6   :  { %1716 = dma.vmem_to_hbm [thread:$0]  %s1709_s24, 256, %s1711_s1, [#allocation5], %s2736_s21, %s2736_s21, %s2737_s22  }
 0x3b7   :  { %2730 = dma.done.wait [#allocation5], 256  }
 0x3b8   :  { %2731 = vsyncadd [#allocation5], 4294967040 }
 0x3b9   :  { %1721 = vsyncpa [#allocation4], 1 }
 0x3ba   :  { %1722 = vsyncpa [#allocation7], 1 }
 0x3bb   :  { %1723 = vsyncpa [#allocation5], 1 }

// kernel: tpu_custom_call.1
= control target key start
LH: loop header
LB: loop body
LE: loop exit
PB: predicated region body
PF: predicated region fallthrough
CT: control target
= control target key end

     0   :  { %14 = vsyncpa [#allocation4], 0  ;;  %s2933_s0 = inlined_call_operand.vmem [shape: bf16[16,512], index: 0, kind: input, shape index: {}]   ;;  %s2934_s1 = inlined_call_operand.hbm [shape: bf16[512,256], index: 1, kind: input, shape index: {}]   ;;  %s2935_s2 = inlined_call_operand.vmem [shape: f32[1,256], index: 2, kind: input, shape index: {}]   ;;  %s2936_s3 = inlined_call_operand.hbm [shape: bf16[256,512], index: 3, kind: input, shape index: {}]   ;;  %s2937_s4 = inlined_call_operand.vmem [shape: f32[1,512], index: 4, kind: input, shape index: {}]   ;;  %s2938_s5 = inlined_call_operand.hbm [shape: bf16[512,128], index: 5, kind: input, shape index: {}]   ;;  %s2939_s6 = inlined_call_operand.vmem [shape: f32[1,128], index: 6, kind: input, shape index: {}]   ;;  %s2940_s7 = inlined_call_operand.vmem [shape: bf16[128,4], index: 7, kind: input, shape index: {}]   ;;  %s2941_s8 = inlined_call_operand.vmem [shape: f32[1,4], index: 8, kind: input, shape index: {}]   ;;  %s2942_s9 = inlined_call_operand.hbm [shape: f32[16,12], index: 9, kind: output, shape index: {}]  }
   0x1   :  { %15 = vsyncpa [#allocation7], 0  ;;  %s38_s11 = sshll.u32 %s2936_s3, 4  ;;  %s39_s11 = int_to_ptr.hbm [resolvable:$true] %s38_s11 }
   0x2   :  { %16 = vsyncpa [#allocation5], 0  ;;  %s2732_s12 = smov [#allocation6]   ;;  %s23_s16 = sshll.u32 %s2934_s1, 4  ;;  %s24_s16 = int_to_ptr.hbm [resolvable:$true] %s23_s16 }
   0x3   :  { %s40_s13 = sshll.u32 %s2732_s12, 4  ;;  %s2733_s17 = smov 256   ;;  %s41_s13 = int_to_ptr.vmem [resolvable:$true] %s40_s13 }
   0x4   :  { %s2734_s18 = smov 16   ;;  %s2735_s19 = smov [#allocation3]  }
   0x5   :  { %46 = dma.hbm_to_vmem [thread:$0]  %s39_s11, 8192, %s41_s13, [#allocation7], %s2733_s17, %s2733_s17, %s2734_s18  }
   0x6   :  { %s25_s20 = sshll.u32 %s2735_s19, 4  ;;  %s2736_s21 = smov 128   ;;  %s26_s20 = int_to_ptr.vmem [resolvable:$true] %s25_s20 }
   0x7   :  { %s2737_s22 = smov 8   ;;  %s53_s24 = sshll.u32 %s2938_s5, 4  ;;  %s54_s24 = int_to_ptr.hbm [resolvable:$true] %s53_s24 }
   0x8   :  { %31 = dma.hbm_to_vmem [thread:$0]  %s24_s16, 8192, %s26_s20, [#allocation4], %s2736_s21, %s2736_s21, %s2737_s22  }
   0x9   :  { %s2738_s25 = smov [#allocation8]   ;;  %s2739_s26 = smov 64  }
   0xa   :  { %s55_s1 = sshll.u32 %s2738_s25, 4  ;;  %s2740_s27 = smov 4   ;;  %s56_s1 = int_to_ptr.vmem [resolvable:$true] %s55_s1 }
   0xb   :  { %61 = dma.hbm_to_vmem [thread:$0]  %s54_s24, 4096, %s56_s1, [#allocation7], %s2739_s26, %s2739_s26, %s2740_s27  }
   0xc   :  { %2726 = dma.done.wait [#allocation4], 8192  }
   0xd   :  { %2727 = vsyncadd [#allocation4], 4294959104 }
   0xe   :  { %2728 = dma.done.wait [#allocation7], 12288  }
   0xf   :  { %2729 = vsyncadd [#allocation7], 4294955008  ;;  %v1798_v0 = vld [vmem:[#allocation3 + $0x70] sm:$0xf]  ;;  %v2431_v1 = vld [vmem:[#allocation3 + $0x74] sm:$0xf0] }
  0x10   :  { %v1862_v2 = vld [vmem:[#allocation3 + $0xf0] sm:$0xf]  ;;  %v1799_v3 = vor.u32 %v2431_v1, %v1798_v0  ;;  %v2447_v4 = vld [vmem:[#allocation3 + $0xf4] sm:$0xf0]  ;;  %v1790_v11 = vld [vmem:[#allocation3 + $0x60] sm:$0xf] }
  0x11   :  { %v1926_v5 = vld [vmem:[#allocation3 + $0x170] sm:$0xf]  ;;  %v2463_v6 = vld [vmem:[#allocation3 + $0x174] sm:$0xf0]  ;;  %v1863_v7 = vor.u32 %v2447_v4, %v1862_v2  ;;  %v2429_v13 = vld [vmem:[#allocation3 + $0x64] sm:$0xf0] }
  0x12   :  { %v1927_v8 = vor.u32 %v2463_v6, %v1926_v5  ;;  %v1990_v9 = vld [vmem:[#allocation3 + $0x1f0] sm:$0xf]  ;;  %v2479_v10 = vld [vmem:[#allocation3 + $0x1f4] sm:$0xf0]  ;;  %500 = vmatpush.bf16.msra.mxu0 %v1799_v3  ;;  %v1854_v14 = vld [vmem:[#allocation3 + $0xe0] sm:$0xf]  ;;  %v1791_v16 = vor.u32 %v2429_v13, %v1790_v11 }
  0x13   :  { %v1991_v12 = vor.u32 %v2479_v10, %v1990_v9  ;;  %v2445_v15 = vld [vmem:[#allocation3 + $0xe4] sm:$0xf0]  ;;  %514 = vmatpush.bf16.msra.mxu1 %v1863_v7  ;;  %v1918_v18 = vld [vmem:[#allocation3 + $0x160] sm:$0xf]  ;;  %v1782_v23 = vld [vmem:[#allocation3 + $0x50] sm:$0xf] }
  0x14   :  { %528 = vmatpush.bf16.msra.mxu2 %v1927_v8  ;;  %v1855_v17 = vor.u32 %v2445_v15, %v1854_v14  ;;  %v2461_v19 = vld [vmem:[#allocation3 + $0x164] sm:$0xf0]  ;;  %v1982_v20 = vld [vmem:[#allocation3 + $0x1e0] sm:$0xf]  ;;  %v2427_v24 = vld [vmem:[#allocation3 + $0x54] sm:$0xf0] }
  0x15   :  { %542 = vmatpush.bf16.msra.mxu3 %v1991_v12  ;;  %v1919_v21 = vor.u32 %v2461_v19, %v1918_v18  ;;  %v2477_v22 = vld [vmem:[#allocation3 + $0x1e4] sm:$0xf0]  ;;  %v1846_v26 = vld [vmem:[#allocation3 + $0xd0] sm:$0xf]  ;;  %v2443_v27 = vld [vmem:[#allocation3 + $0xd4] sm:$0xf0]  ;;  %v1783_v29 = vor.u32 %v2427_v24, %v1782_v23 }
  0x16   :  { %v1983_v25 = vor.u32 %v2477_v22, %v1982_v20  ;;  %v1910_v28 = vld [vmem:[#allocation3 + $0x150] sm:$0xf]  ;;  %501 = vmatpush.bf16.msra.mxu0 %v1791_v16  ;;  %v2459_v30 = vld [vmem:[#allocation3 + $0x154] sm:$0xf0]  ;;  %v1847_v33 = vor.u32 %v2443_v27, %v1846_v26  ;;  %v1774_v35 = vld [vmem:[#allocation3 + $0x40] sm:$0xf] }
  0x17   :  { %v1974_v31 = vld [vmem:[#allocation3 + $0x1d0] sm:$0xf]  ;;  %v2475_v32 = vld [vmem:[#allocation3 + $0x1d4] sm:$0xf0]  ;;  %515 = vmatpush.bf16.msra.mxu1 %v1855_v17  ;;  %v1911_v34 = vor.u32 %v2459_v30, %v1910_v28  ;;  %v2425_v36 = vld [vmem:[#allocation3 + $0x44] sm:$0xf0] }
  0x18   :  { %529 = vmatpush.bf16.msra.mxu2 %v1919_v21  ;;  %v1838_v37 = vld [vmem:[#allocation3 + $0xc0] sm:$0xf]  ;;  %v1975_v38 = vor.u32 %v2475_v32, %v1974_v31  ;;  %v2441_v39 = vld [vmem:[#allocation3 + $0xc4] sm:$0xf0]  ;;  %v1775_v44 = vor.u32 %v2425_v36, %v1774_v35  ;;  %v1766_v47 = vld [vmem:[#allocation3 + $0x30] sm:$0xf] }
  0x19   :  { %543 = vmatpush.bf16.msra.mxu3 %v1983_v25  ;;  %v1902_v40 = vld [vmem:[#allocation3 + $0x140] sm:$0xf]  ;;  %v2457_v41 = vld [vmem:[#allocation3 + $0x144] sm:$0xf0]  ;;  %v1839_v45 = vor.u32 %v2441_v39, %v1838_v37  ;;  %v2423_v48 = vld [vmem:[#allocation3 + $0x34] sm:$0xf0] }
  0x1a   :  { %v1966_v42 = vld [vmem:[#allocation3 + $0x1c0] sm:$0xf]  ;;  %v2473_v43 = vld [vmem:[#allocation3 + $0x1c4] sm:$0xf0]  ;;  %502 = vmatpush.bf16.msra.mxu0 %v1783_v29  ;;  %v1903_v46 = vor.u32 %v2457_v41, %v1902_v40  ;;  %v1830_v49 = vld [vmem:[#allocation3 + $0xb0] sm:$0xf]  ;;  %v1767_v56 = vor.u32 %v2423_v48, %v1766_v47 }
  0x1b   :  { %516 = vmatpush.bf16.msra.mxu1 %v1847_v33  ;;  %v1967_v50 = vor.u32 %v2473_v43, %v1966_v42  ;;  %v2439_v51 = vld [vmem:[#allocation3 + $0xb4] sm:$0xf0]  ;;  %v1894_v52 = vld [vmem:[#allocation3 + $0x130] sm:$0xf]  ;;  %v1758_v59 = vld [vmem:[#allocation3 + $0x20] sm:$0xf] }
  0x1c   :  { %530 = vmatpush.bf16.msra.mxu2 %v1911_v34  ;;  %v2455_v53 = vld [vmem:[#allocation3 + $0x134] sm:$0xf0]  ;;  %v1958_v54 = vld [vmem:[#allocation3 + $0x1b0] sm:$0xf]  ;;  %v1831_v57 = vor.u32 %v2439_v51, %v1830_v49  ;;  %v2421_v60 = vld [vmem:[#allocation3 + $0x24] sm:$0xf0] }
  0x1d   :  { %544 = vmatpush.bf16.msra.mxu3 %v1975_v38  ;;  %v2471_v55 = vld [vmem:[#allocation3 + $0x1b4] sm:$0xf0]  ;;  %v1895_v58 = vor.u32 %v2455_v53, %v1894_v52  ;;  %v1822_v61 = vld [vmem:[#allocation3 + $0xa0] sm:$0xf]  ;;  %v2437_v63 = vld [vmem:[#allocation3 + $0xa4] sm:$0xf0]  ;;  %v1759_v4 = vor.u32 %v2421_v60, %v1758_v59 }
  0x1e   :  { %503 = vmatpush.bf16.msra.mxu0 %v1775_v44  ;;  %v1959_v62 = vor.u32 %v2471_v55, %v1958_v54  ;;  %v1886_v0 = vld [vmem:[#allocation3 + $0x120] sm:$0xf]  ;;  %v2453_v1 = vld [vmem:[#allocation3 + $0x124] sm:$0xf0]  ;;  %v1750_v5 = vld [vmem:[#allocation3 + $0x10] sm:$0xf]  ;;  %v1823_v6 = vor.u32 %v2437_v63, %v1822_v61 }
  0x1f   :  { %517 = vmatpush.bf16.msra.mxu1 %v1839_v45  ;;  %v1950_v2 = vld [vmem:[#allocation3 + $0x1a0] sm:$0xf]  ;;  %v2469_v3 = vld [vmem:[#allocation3 + $0x1a4] sm:$0xf0]  ;;  %v1887_v7 = vor.u32 %v2453_v1, %v1886_v0  ;;  %v2419_v8 = vld [vmem:[#allocation3 + $0x14] sm:$0xf0] }
  0x20   :  { %531 = vmatpush.bf16.msra.mxu2 %v1903_v46  ;;  %v1814_v9 = vld [vmem:[#allocation3 + $0x90] sm:$0xf]  ;;  %v2435_v10 = vld [vmem:[#allocation3 + $0x94] sm:$0xf0]  ;;  %v1951_v11 = vor.u32 %v2469_v3, %v1950_v2  ;;  %v1742_v16 = vld [vmem:[#allocation3] sm:$0xf]  ;;  %v1751_v18 = vor.u32 %v2419_v8, %v1750_v5 }
  0x21   :  { %545 = vmatpush.bf16.msra.mxu3 %v1967_v50  ;;  %v1878_v12 = vld [vmem:[#allocation3 + $0x110] sm:$0xf]  ;;  %v2451_v13 = vld [vmem:[#allocation3 + $0x114] sm:$0xf0]  ;;  %v2417_v17 = vld [vmem:[#allocation3 + $0x4] sm:$0xf0]  ;;  %v1815_v23 = vor.u32 %v2435_v10, %v1814_v9 }
  0x22   :  { %504 = vmatpush.bf16.msra.mxu0 %v1767_v56  ;;  %v1942_v14 = vld [vmem:[#allocation3 + $0x190] sm:$0xf]  ;;  %v2467_v15 = vld [vmem:[#allocation3 + $0x194] sm:$0xf0]  ;;  %v1806_v19 = vld [vmem:[#allocation3 + $0x80] sm:$0xf]  ;;  %v1879_v24 = vor.u32 %v2451_v13, %v1878_v12  ;;  %v1743_v35 = vor.u32 %v2417_v17, %v1742_v16 }
  0x23   :  { %518 = vmatpush.bf16.msra.mxu1 %v1831_v57  ;;  %v2433_v20 = vld [vmem:[#allocation3 + $0x84] sm:$0xf0]  ;;  %v1870_v21 = vld [vmem:[#allocation3 + $0x100] sm:$0xf]  ;;  %v2430_v27 = vld [vmem:[#allocation3 + $0x74] sm:$0xf]  ;;  %v1943_v28 = vor.u32 %v2467_v15, %v1942_v14 }
  0x24   :  { %532 = vmatpush.bf16.msra.mxu2 %v1895_v58  ;;  %v2449_v22 = vld [vmem:[#allocation3 + $0x104] sm:$0xf0]  ;;  %v1934_v25 = vld [vmem:[#allocation3 + $0x180] sm:$0xf]  ;;  %v1800_v29 = vld [vmem:[#allocation3 + $0x78] sm:$0xf0]  ;;  %v1807_v39 = vor.u32 %v2433_v20, %v1806_v19 }
  0x25   :  { %546 = vmatpush.bf16.msra.mxu3 %v1959_v62  ;;  %v2465_v26 = vld [vmem:[#allocation3 + $0x184] sm:$0xf0]  ;;  %v2446_v30 = vld [vmem:[#allocation3 + $0xf4] sm:$0xf]  ;;  %v1864_v31 = vld [vmem:[#allocation3 + $0xf8] sm:$0xf0]  ;;  %v1871_v40 = vor.u32 %v2449_v22, %v1870_v21  ;;  %v1803_v45 = vor.u32 %v2430_v27, %v1800_v29 }
  0x26   :  { %505 = vmatpush.bf16.msra.mxu0 %v1759_v4  ;;  %v2462_v32 = vld [vmem:[#allocation3 + $0x174] sm:$0xf]  ;;  %v1928_v33 = vld [vmem:[#allocation3 + $0x178] sm:$0xf0]  ;;  %v1734_v37 = vld [vmem:[%s2933_s0 + $0x8] sm:$0xf]  ;;  %v1935_v44 = vor.u32 %v2465_v26, %v1934_v25  ;;  %v1867_v49 = vor.u32 %v2446_v30, %v1864_v31 }
  0x27   :  { %519 = vmatpush.bf16.msra.mxu1 %v1823_v6  ;;  %v2478_v34 = vld [vmem:[#allocation3 + $0x1f4] sm:$0xf]  ;;  %v1992_v36 = vld [vmem:[#allocation3 + $0x1f8] sm:$0xf0]  ;;  %v2415_v38 = vld [vmem:[%s2933_s0 + $0x14] sm:$0xf0]  ;;  %v1931_v50 = vor.u32 %v2462_v32, %v1928_v33 }
  0x28   :  { %533 = vmatpush.bf16.msra.mxu2 %v1887_v7  ;;  %v2413_v41 = vld [vmem:[%s2933_s0 + $0xc] sm:$0xf]  ;;  %v1736_v42 = vld [vmem:[%s2933_s0 + $0x18] sm:$0xf0]  ;;  %v2428_v43 = vld [vmem:[#allocation3 + $0x64] sm:$0xf]  ;;  %v1995_v54 = vor.u32 %v2478_v34, %v1992_v36  ;;  %v2835_v55 = vor.u32 %v2415_v38, %v1734_v37 }
  0x29   :  { %547 = vmatpush.bf16.msra.mxu3 %v1951_v11  ;;  %v1792_v46 = vld [vmem:[#allocation3 + $0x68] sm:$0xf0]  ;;  %v1726_v47 = vld [vmem:[%s2933_s0] sm:$0xf]  ;;  %v2414_v48 = vld [vmem:[%s2933_s0 + $0xc] sm:$0xf0]  ;;  %v2837_v59 = vor.u32 %v2413_v41, %v1736_v42 }
  0x2a   :  { %506 = vmatpush.bf16.msra.mxu0 %v1751_v18  ;;  %v2444_v51 = vld [vmem:[#allocation3 + $0xe4] sm:$0xf]  ;;  %v1728_v53 = vld [vmem:[%s2933_s0 + $0x10] sm:$0xf0]  ;;  %v1856_v56 = vld [vmem:[#allocation3 + $0xe8] sm:$0xf0]  ;;  %v2839_v62 = vor.u32 %v2414_v48, %v1726_v47  ;;  %v1795_v63 = vor.u32 %v2428_v43, %v1792_v46 }
  0x2b   :  { %520 = vmatpush.bf16.msra.mxu1 %v1815_v23  ;;  %v2412_v52 = vld [vmem:[%s2933_s0 + $0x4] sm:$0xf]  ;;  %v1920_v58 = vld [vmem:[#allocation3 + $0x168] sm:$0xf0]  ;;  %v1859_v1 = vor.u32 %v2444_v51, %v1856_v56  ;;  %v2426_v3 = vld [vmem:[#allocation3 + $0x54] sm:$0xf] }
  0x2c   :  { %534 = vmatpush.bf16.msra.mxu2 %v1879_v24  ;;  %v2460_v57 = vld [vmem:[#allocation3 + $0x164] sm:$0xf]  ;;  %v1984_v61 = vld [vmem:[#allocation3 + $0x1e8] sm:$0xf0]  ;;  %v2841_v0 = vor.u32 %v2412_v52, %v1728_v53  ;;  %v1784_v4 = vld [vmem:[#allocation3 + $0x58] sm:$0xf0] }
  0x2d   :  { %548 = vmatpush.bf16.msra.mxu3 %v1943_v28  ;;  %v2476_v60 = vld [vmem:[#allocation3 + $0x1e4] sm:$0xf]  ;;  %v1923_v2 = vor.u32 %v2460_v57, %v1920_v58  ;;  %v2442_v5 = vld [vmem:[#allocation3 + $0xd4] sm:$0xf]  ;;  %v1848_v7 = vld [vmem:[#allocation3 + $0xd8] sm:$0xf0]  ;;  %v1787_v12 = vor.u32 %v2426_v3, %v1784_v4 }
  0x2e   :  { %507 = vmatpush.bf16.msra.mxu0 %v1743_v35  ;;  %v1987_v6 = vor.u32 %v2476_v60, %v1984_v61  ;;  %v2458_v8 = vld [vmem:[#allocation3 + $0x154] sm:$0xf]  ;;  %v1912_v9 = vld [vmem:[#allocation3 + $0x158] sm:$0xf0]  ;;  %v1851_v13 = vor.u32 %v2442_v5, %v1848_v7  ;;  %v2424_v15 = vld [vmem:[#allocation3 + $0x44] sm:$0xf] }
  0x2f   :  { %521 = vmatpush.bf16.msra.mxu1 %v1807_v39  ;;  %v2474_v10 = vld [vmem:[#allocation3 + $0x1d4] sm:$0xf]  ;;  %v1976_v11 = vld [vmem:[#allocation3 + $0x1d8] sm:$0xf0]  ;;  %v1915_v14 = vor.u32 %v2458_v8, %v1912_v9  ;;  %v1776_v16 = vld [vmem:[#allocation3 + $0x48] sm:$0xf0] }
  0x30   :  { %535 = vmatpush.bf16.msra.mxu2 %v1871_v40  ;;  %v2440_v17 = vld [vmem:[#allocation3 + $0xc4] sm:$0xf]  ;;  %v1979_v18 = vor.u32 %v2474_v10, %v1976_v11  ;;  %v1840_v19 = vld [vmem:[#allocation3 + $0xc8] sm:$0xf0]  ;;  %v1779_v24 = vor.u32 %v2424_v15, %v1776_v16  ;;  %v2422_v27 = vld [vmem:[#allocation3 + $0x34] sm:$0xf] }
  0x31   :  { %549 = vmatpush.bf16.msra.mxu3 %v1935_v44  ;;  %508 = vmatmul.bf16.vlgmr.msra.gmra.mxu0 %v2839_v62  ;;  %v2456_v20 = vld [vmem:[#allocation3 + $0x144] sm:$0xf]  ;;  %v1904_v21 = vld [vmem:[#allocation3 + $0x148] sm:$0xf0]  ;;  %v1843_v25 = vor.u32 %v2440_v17, %v1840_v19  ;;  %v1768_v28 = vld [vmem:[#allocation3 + $0x38] sm:$0xf0] }
  0x32   :  { %556 = vmatpush.bf16.msrb.mxu0 %v1803_v45  ;;  %522 = vmatmul.bf16.vlgmr.msra.gmra.mxu1 %v2841_v0  ;;  %v2472_v22 = vld [vmem:[#allocation3 + $0x1c4] sm:$0xf]  ;;  %v1968_v23 = vld [vmem:[#allocation3 + $0x1c8] sm:$0xf0]  ;;  %v1907_v26 = vor.u32 %v2456_v20, %v1904_v21  ;;  %v2438_v29 = vld [vmem:[#allocation3 + $0xb4] sm:$0xf]  ;;  %v1771_v36 = vor.u32 %v2422_v27, %v1768_v28 }
  0x33   :  { %570 = vmatpush.bf16.msrb.mxu1 %v1867_v49  ;;  %536 = vmatmul.bf16.vlgmr.msra.gmra.mxu2 %v2835_v55  ;;  %v1971_v30 = vor.u32 %v2472_v22, %v1968_v23  ;;  %v1832_v31 = vld [vmem:[#allocation3 + $0xb8] sm:$0xf0]  ;;  %v2454_v32 = vld [vmem:[#allocation3 + $0x134] sm:$0xf]  ;;  %v2420_v39 = vld [vmem:[#allocation3 + $0x24] sm:$0xf] }
  0x34   :  { %584 = vmatpush.bf16.msrb.mxu2 %v1931_v50  ;;  %550 = vmatmul.bf16.vlgmr.msra.gmra.mxu3 %v2837_v59  ;;  %v1896_v33 = vld [vmem:[#allocation3 + $0x138] sm:$0xf0]  ;;  %v2470_v34 = vld [vmem:[#allocation3 + $0x1b4] sm:$0xf]  ;;  %v1835_v37 = vor.u32 %v2438_v29, %v1832_v31  ;;  %v1760_v40 = vld [vmem:[#allocation3 + $0x28] sm:$0xf0] }
  0x35   :  { %598 = vmatpush.bf16.msrb.mxu3 %v1995_v54  ;;  %v1960_v35 = vld [vmem:[#allocation3 + $0x1b8] sm:$0xf0]  ;;  %v1899_v38 = vor.u32 %v2454_v32, %v1896_v33  ;;  %v2436_v41 = vld [vmem:[#allocation3 + $0xa4] sm:$0xf]  ;;  %v1824_v43 = vld [vmem:[#allocation3 + $0xa8] sm:$0xf0]  ;;  %v1763_v48 = vor.u32 %v2420_v39, %v1760_v40 }
  0x36   :  { %557 = vmatpush.bf16.msrb.mxu0 %v1795_v63  ;;  %v1963_v42 = vor.u32 %v2470_v34, %v1960_v35  ;;  %v2452_v44 = vld [vmem:[#allocation3 + $0x124] sm:$0xf]  ;;  %v1888_v45 = vld [vmem:[#allocation3 + $0x128] sm:$0xf0]  ;;  %v1827_v49 = vor.u32 %v2436_v41, %v1824_v43  ;;  %v2418_v51 = vld [vmem:[#allocation3 + $0x14] sm:$0xf] }
  0x37   :  { %571 = vmatpush.bf16.msrb.mxu1 %v1859_v1  ;;  %v2468_v46 = vld [vmem:[#allocation3 + $0x1a4] sm:$0xf]  ;;  %v1952_v47 = vld [vmem:[#allocation3 + $0x1a8] sm:$0xf0]  ;;  %v1891_v50 = vor.u32 %v2452_v44, %v1888_v45  ;;  %v1752_v52 = vld [vmem:[#allocation3 + $0x18] sm:$0xf0] }
  0x38   :  { %585 = vmatpush.bf16.msrb.mxu2 %v1923_v2  ;;  %v2434_v53 = vld [vmem:[#allocation3 + $0x94] sm:$0xf]  ;;  %v1955_v54 = vor.u32 %v2468_v46, %v1952_v47  ;;  %v1816_v56 = vld [vmem:[#allocation3 + $0x98] sm:$0xf0]  ;;  %v1755_v63 = vor.u32 %v2418_v51, %v1752_v52  ;;  %v2416_v1 = vld [vmem:[#allocation3 + $0x4] sm:$0xf] }
  0x39   :  { %599 = vmatpush.bf16.msrb.mxu3 %v1987_v6  ;;  %v2450_v57 = vld [vmem:[#allocation3 + $0x114] sm:$0xf]  ;;  %v1880_v58 = vld [vmem:[#allocation3 + $0x118] sm:$0xf0]  ;;  %v1744_v2 = vld [vmem:[#allocation3 + $0x8] sm:$0xf0]  ;;  %v1819_v4 = vor.u32 %v2434_v53, %v1816_v56 }
  0x3a   :  { %558 = vmatpush.bf16.msrb.mxu0 %v1787_v12  ;;  %v2466_v60 = vld [vmem:[#allocation3 + $0x194] sm:$0xf]  ;;  %v1944_v61 = vld [vmem:[#allocation3 + $0x198] sm:$0xf0]  ;;  %v2432_v3 = vld [vmem:[#allocation3 + $0x84] sm:$0xf]  ;;  %v1883_v5 = vor.u32 %v2450_v57, %v1880_v58 }
  0x3b   :  { %572 = vmatpush.bf16.msrb.mxu1 %v1851_v13  ;;  %v1808_v6 = vld [vmem:[#allocation3 + $0x88] sm:$0xf0]  ;;  %v1947_v7 = vor.u32 %v2466_v60, %v1944_v61  ;;  %v2448_v8 = vld [vmem:[#allocation3 + $0x104] sm:$0xf]  ;;  %v2110_v12 = vld [vmem:[#allocation6 + $0xe0] sm:$0xf] }
  0x3c   :  { %586 = vmatpush.bf16.msrb.mxu2 %v1915_v14  ;;  %v1872_v9 = vld [vmem:[#allocation3 + $0x108] sm:$0xf0]  ;;  %v2464_v10 = vld [vmem:[#allocation3 + $0x184] sm:$0xf]  ;;  %v2510_v13 = vld [vmem:[#allocation6 + $0xec] sm:$0xf0]  ;;  %v1747_v14 = vor.u32 %v2416_v1, %v1744_v2  ;;  %v1811_v17 = vor.u32 %v2432_v3, %v1808_v6 }
  0x3d   :  { %600 = vmatpush.bf16.msrb.mxu3 %v1979_v18  ;;  %v1936_v11 = vld [vmem:[#allocation3 + $0x188] sm:$0xf0]  ;;  %v2508_v15 = vld [vmem:[#allocation6 + $0xe4] sm:$0xf]  ;;  %v2112_v16 = vld [vmem:[#allocation6 + $0xf0] sm:$0xf0]  ;;  %v1875_v18 = vor.u32 %v2448_v8, %v1872_v9  ;;  %v2111_v20 = vor.u32 %v2510_v13, %v2110_v12 }
  0x3e   :  { %559 = vmatpush.bf16.msrb.mxu0 %v1779_v24  ;;  %v1939_v19 = vor.u32 %v2464_v10, %v1936_v11  ;;  %v2115_v21 = vor.u32 %v2508_v15, %v2112_v16  ;;  %v2094_v22 = vld [vmem:[#allocation6 + $0xc0] sm:$0xf]  ;;  %v2506_v23 = vld [vmem:[#allocation6 + $0xcc] sm:$0xf0]  ;;  %v2504_v24 = vld [vmem:[#allocation6 + $0xc4] sm:$0xf] }
  0x3f   :  { %573 = vmatpush.bf16.msrb.mxu1 %v1843_v25  ;;  %v2096_v25 = vld [vmem:[#allocation6 + $0xd0] sm:$0xf0]  ;;  %v2078_v28 = vld [vmem:[#allocation6 + $0xa0] sm:$0xf]  ;;  %v2502_v29 = vld [vmem:[#allocation6 + $0xac] sm:$0xf0] }
  0x40   :  { %587 = vmatpush.bf16.msrb.mxu2 %v1907_v26  ;;  %v2095_v26 = vor.u32 %v2506_v23, %v2094_v22  ;;  %v2099_v27 = vor.u32 %v2504_v24, %v2096_v25  ;;  %v2080_v31 = vld [vmem:[#allocation6 + $0xb0] sm:$0xf0]  ;;  %v2079_v32 = vor.u32 %v2502_v29, %v2078_v28  ;;  %v2062_v34 = vld [vmem:[#allocation6 + $0x80] sm:$0xf]  ;;  %v2498_v35 = vld [vmem:[#allocation6 + $0x8c] sm:$0xf0] }
  0x41   :  { %601 = vmatpush.bf16.msrb.mxu3 %v1971_v30  ;;  %v2500_v30 = vld [vmem:[#allocation6 + $0xa4] sm:$0xf]  ;;  %v2046_v39 = vld [vmem:[#allocation6 + $0x60] sm:$0xf]  ;;  %v2490_v43 = vld [vmem:[#allocation6 + $0x4c] sm:$0xf0] }
  0x42   :  { %560 = vmatpush.bf16.msrb.mxu0 %v1771_v36  ;;  %v2083_v33 = vor.u32 %v2500_v30, %v2080_v31  ;;  %v2496_v36 = vld [vmem:[#allocation6 + $0x84] sm:$0xf]  ;;  %v2032_v45 = vld [vmem:[#allocation6 + $0x50] sm:$0xf0]  ;;  %v2482_v56 = vld [vmem:[#allocation6 + $0xc] sm:$0xf0] }
  0x43   :  { %574 = vmatpush.bf16.msrb.mxu1 %v1835_v37  ;;  %v2063_v37 = vor.u32 %v2498_v35, %v2062_v34  ;;  %v2492_v40 = vld [vmem:[#allocation6 + $0x64] sm:$0xf]  ;;  %v2016_v51 = vld [vmem:[#allocation6 + $0x30] sm:$0xf0]  ;;  %v2238_v61 = vld [vmem:[#allocation6 + $0x1e0] sm:$0xf] }
  0x44   :  { %588 = vmatpush.bf16.msrb.mxu2 %v1899_v38  ;;  %v2488_v44 = vld [vmem:[#allocation6 + $0x44] sm:$0xf]  ;;  %v2000_v60 = vld [vmem:[#allocation6 + $0x10] sm:$0xf0]  ;;  %v2509_v8 = vld [vmem:[#allocation6 + $0xec] sm:$0xf] }
  0x45   :  { %602 = vmatpush.bf16.msrb.mxu3 %v1963_v42  ;;  %v2030_v42 = vld [vmem:[#allocation6 + $0x40] sm:$0xf]  ;;  %v2035_v47 = vor.u32 %v2488_v44, %v2032_v45  ;;  %v2480_v57 = vld [vmem:[#allocation6 + $0x4] sm:$0xf]  ;;  %v2120_v10 = vld [vmem:[#allocation6 + $0xf8] sm:$0xf0] }
  0x46   :  { %561 = vmatpush.bf16.msrb.mxu0 %v1763_v48  ;;  %v2031_v46 = vor.u32 %v2490_v43, %v2030_v42  ;;  %v2014_v48 = vld [vmem:[#allocation6 + $0x20] sm:$0xf]  ;;  %v2003_v1 = vor.u32 %v2480_v57, %v2000_v60  ;;  %v2540_v3 = vld [vmem:[#allocation6 + $0x1e4] sm:$0xf]  ;;  %v2123_v11 = vor.u32 %v2509_v8, %v2120_v10  ;;  %v2538_v13 = vld [vmem:[#allocation6 + $0x1cc] sm:$0xf0] }
  0x47   :  { %575 = vmatpush.bf16.msrb.mxu1 %v1827_v49  ;;  %v2486_v49 = vld [vmem:[#allocation6 + $0x2c] sm:$0xf0]  ;;  %v2222_v12 = vld [vmem:[#allocation6 + $0x1c0] sm:$0xf]  ;;  %v2224_v16 = vld [vmem:[#allocation6 + $0x1d0] sm:$0xf0] }
  0x48   :  { %589 = vmatpush.bf16.msrb.mxu2 %v1891_v50  ;;  %v2484_v50 = vld [vmem:[#allocation6 + $0x24] sm:$0xf]  ;;  %v2015_v52 = vor.u32 %v2486_v49, %v2014_v48  ;;  %v2223_v15 = vor.u32 %v2538_v13, %v2222_v12  ;;  %v2104_v22 = vld [vmem:[#allocation6 + $0xd8] sm:$0xf0]  ;;  %v2206_v24 = vld [vmem:[#allocation6 + $0x1a0] sm:$0xf] }
  0x49   :  { %603 = vmatpush.bf16.msrb.mxu3 %v1955_v54  ;;  %v2019_v53 = vor.u32 %v2484_v50, %v2016_v51  ;;  %v1998_v54 = vld [vmem:[#allocation6] sm:$0xf]  ;;  %v2534_v25 = vld [vmem:[#allocation6 + $0x1ac] sm:$0xf0]  ;;  %v2208_v28 = vld [vmem:[#allocation6 + $0x1b0] sm:$0xf0] }
  0x4a   :  { %562 = vmatpush.bf16.msrb.mxu0 %v1755_v63  ;;  %v1999_v58 = vor.u32 %v2482_v56, %v1998_v54  ;;  %v2542_v63 = vld [vmem:[#allocation6 + $0x1ec] sm:$0xf0]  ;;  %v2086_v29 = vld [vmem:[#allocation6 + $0xa8] sm:$0xf]  ;;  %v2503_v30 = vld [vmem:[#allocation6 + $0xb4] sm:$0xf0] }
  0x4b   :  { %576 = vmatpush.bf16.msrb.mxu1 %v1819_v4  ;;  %v2239_v2 = vor.u32 %v2542_v63, %v2238_v61  ;;  %v2240_v4 = vld [vmem:[#allocation6 + $0x1f0] sm:$0xf0]  ;;  %v2088_v34 = vld [vmem:[#allocation6 + $0xb8] sm:$0xf0]  ;;  %v2174_v44 = vld [vmem:[#allocation6 + $0x160] sm:$0xf] }
  0x4c   :  { %590 = vmatpush.bf16.msrb.mxu2 %v1883_v5  ;;  %v2118_v5 = vld [vmem:[#allocation6 + $0xe8] sm:$0xf]  ;;  %v2243_v6 = vor.u32 %v2540_v3, %v2240_v4  ;;  %v2072_v42 = vld [vmem:[#allocation6 + $0x98] sm:$0xf0]  ;;  %v2526_v45 = vld [vmem:[#allocation6 + $0x16c] sm:$0xf0] }
  0x4d   :  { %604 = vmatpush.bf16.msrb.mxu3 %v1947_v7  ;;  %v2511_v7 = vld [vmem:[#allocation6 + $0xf4] sm:$0xf0]  ;;  %v2176_v48 = vld [vmem:[#allocation6 + $0x170] sm:$0xf0]  ;;  %v2054_v49 = vld [vmem:[#allocation6 + $0x68] sm:$0xf] }
  0x4e   :  { %563 = vmatpush.bf16.msrb.mxu0 %v1747_v14  ;;  %v2119_v9 = vor.u32 %v2511_v7, %v2118_v5  ;;  %v2536_v14 = vld [vmem:[#allocation6 + $0x1c4] sm:$0xf]  ;;  %v2495_v50 = vld [vmem:[#allocation6 + $0x74] sm:$0xf0]  ;;  %v2056_v54 = vld [vmem:[#allocation6 + $0x78] sm:$0xf0] }
  0x4f   :  { %577 = vmatpush.bf16.msrb.mxu1 %v1811_v17  ;;  %v2102_v17 = vld [vmem:[#allocation6 + $0xc8] sm:$0xf]  ;;  %v2158_v56 = vld [vmem:[#allocation6 + $0x140] sm:$0xf]  ;;  %v2520_v60 = vld [vmem:[#allocation6 + $0x144] sm:$0xf] }
  0x50   :  { %591 = vmatpush.bf16.msrb.mxu2 %v1875_v18  ;;  %v2507_v18 = vld [vmem:[#allocation6 + $0xd4] sm:$0xf0]  ;;  %v2160_v61 = vld [vmem:[#allocation6 + $0x150] sm:$0xf0]  ;;  %v2489_v4 = vld [vmem:[#allocation6 + $0x4c] sm:$0xf] }
  0x51   :  { %605 = vmatpush.bf16.msrb.mxu3 %v1939_v19  ;;  %564 = vmatmul.bf16.vlgmr.msrb.gmra.mxu0 %v2839_v62  ;;  %v2064_v62 = vld [vmem:[#allocation6 + $0x90] sm:$0xf0]  ;;  %v2227_v19 = vor.u32 %v2536_v14, %v2224_v16  ;;  %v2491_v3 = vld [vmem:[#allocation6 + $0x54] sm:$0xf0]  ;;  %v2142_v8 = vld [vmem:[#allocation6 + $0x120] sm:$0xf] }
  0x52   :  { %1033 = vmatpush.bf16.msra.mxu0 %v2111_v20  ;;  %578 = vmatmul.bf16.vlgmr.msrb.gmra.mxu1 %v2841_v0  ;;  %v2067_v38 = vor.u32 %v2496_v36, %v2064_v62  ;;  %v2494_v0 = vld [vmem:[#allocation6 + $0x6c] sm:$0xf0]  ;;  %v2103_v20 = vor.u32 %v2507_v18, %v2102_v17  ;;  %v2190_v36 = vld [vmem:[#allocation6 + $0x180] sm:$0xf]  ;;  %v2516_v10 = vld [vmem:[#allocation6 + $0x124] sm:$0xf] }
  0x53   :  { %592 = vmatmul.bf16.vlgmr.msrb.gmra.mxu2 %v2835_v55  ;;  %v2048_v55 = vld [vmem:[#allocation6 + $0x70] sm:$0xf0]  ;;  %v2047_v41 = vor.u32 %v2494_v0, %v2046_v39  ;;  %1047 = vmatpush.bf16.msra.mxu1 %v2239_v2  ;;  %v2530_v62 = vld [vmem:[#allocation6 + $0x18c] sm:$0xf0]  ;;  %v2070_v0 = vld [vmem:[#allocation6 + $0x88] sm:$0xf] }
  0x54   :  { %1061 = vmatpush.bf16.msra.mxu2 %v2115_v21  ;;  %606 = vmatmul.bf16.vlgmr.msrb.gmra.mxu3 %v2837_v59  ;;  %v2051_v59 = vor.u32 %v2492_v40, %v2048_v55  ;;  %v2505_v21 = vld [vmem:[#allocation6 + $0xcc] sm:$0xf]  ;;  %v2192_v39 = vld [vmem:[#allocation6 + $0x190] sm:$0xf0]  ;;  %v2499_v40 = vld [vmem:[#allocation6 + $0x94] sm:$0xf0] }
  0x55   :  { %1075 = vmatpush.bf16.msra.mxu3 %v2243_v6  ;;  %v2107_v23 = vor.u32 %v2505_v21, %v2104_v22  ;;  %v2038_v2 = vld [vmem:[#allocation6 + $0x48] sm:$0xf]  ;;  %v2040_v6 = vld [vmem:[#allocation6 + $0x58] sm:$0xf0]  ;;  %v2144_v12 = vld [vmem:[#allocation6 + $0x130] sm:$0xf0] }
  0x56   :  { %1034 = vmatpush.bf16.msra.mxu0 %v2095_v26  ;;  %v2532_v26 = vld [vmem:[#allocation6 + $0x1a4] sm:$0xf]  ;;  %v2039_v5 = vor.u32 %v2491_v3, %v2038_v2  ;;  %v2043_v7 = vor.u32 %v2489_v4, %v2040_v6  ;;  %v2022_v13 = vld [vmem:[#allocation6 + $0x28] sm:$0xf]  ;;  %v2487_v14 = vld [vmem:[#allocation6 + $0x34] sm:$0xf0]  ;;  %v2147_v16 = vor.u32 %v2516_v10, %v2144_v12 }
  0x57   :  { %1048 = vmatpush.bf16.msra.mxu1 %v2223_v15  ;;  %v2211_v31 = vor.u32 %v2532_v26, %v2208_v28  ;;  %v2023_v17 = vor.u32 %v2487_v14, %v2022_v13  ;;  %v2485_v18 = vld [vmem:[#allocation6 + $0x2c] sm:$0xf]  ;;  %v2126_v22 = vld [vmem:[#allocation6 + $0x100] sm:$0xf]  ;;  %v2128_v26 = vld [vmem:[#allocation6 + $0x110] sm:$0xf0] }
  0x58   :  { %1062 = vmatpush.bf16.msra.mxu2 %v2099_v27  ;;  %v2207_v27 = vor.u32 %v2534_v25, %v2206_v24  ;;  %v2512_v24 = vld [vmem:[#allocation6 + $0x104] sm:$0xf]  ;;  %v2483_v28 = vld [vmem:[#allocation6 + $0x14] sm:$0xf0]  ;;  %v2529_v3 = vld [vmem:[#allocation6 + $0x18c] sm:$0xf] }
  0x59   :  { %1076 = vmatpush.bf16.msra.mxu3 %v2227_v19  ;;  %v2024_v19 = vld [vmem:[#allocation6 + $0x38] sm:$0xf0]  ;;  %v2531_v2 = vld [vmem:[#allocation6 + $0x194] sm:$0xf0]  ;;  %v2182_v10 = vld [vmem:[#allocation6 + $0x168] sm:$0xf] }
  0x5a   :  { %1035 = vmatpush.bf16.msra.mxu0 %v2079_v32  ;;  %v2087_v32 = vor.u32 %v2503_v30, %v2086_v29  ;;  %v2027_v21 = vor.u32 %v2485_v18, %v2024_v19  ;;  %v2131_v30 = vor.u32 %v2512_v24, %v2128_v26  ;;  %v2525_v12 = vld [vmem:[#allocation6 + $0x16c] sm:$0xf]  ;;  %v2523_v18 = vld [vmem:[#allocation6 + $0x154] sm:$0xf0]  ;;  %v2152_v26 = vld [vmem:[#allocation6 + $0x138] sm:$0xf0] }
  0x5b   :  { %1049 = vmatpush.bf16.msra.mxu1 %v2207_v27  ;;  %v2006_v27 = vld [vmem:[#allocation6 + $0x8] sm:$0xf]  ;;  %v2521_v19 = vld [vmem:[#allocation6 + $0x14c] sm:$0xf]  ;;  %v2519_v24 = vld [vmem:[#allocation6 + $0x134] sm:$0xf0] }
  0x5c   :  { %1063 = vmatpush.bf16.msra.mxu2 %v2083_v33  ;;  %v2501_v33 = vld [vmem:[#allocation6 + $0xac] sm:$0xf]  ;;  %s2743_s3 = smov 127   ;;  %s2745_s0 = smov 10   ;;  %vm1686_vm10 = vcmask 31744   ;;  %vm1689_vm11 = vcmask 64512  }
  0x5d   :  { %v2091_v35 = vor.u32 %v2501_v33, %v2088_v34  ;;  %1077 = vmatpush.bf16.msra.mxu3 %v2211_v31  ;;  %v2007_v31 = vor.u32 %v2483_v28, %v2006_v27  ;;  %v2008_v33 = vld [vmem:[#allocation6 + $0x18] sm:$0xf0]  ;;  %v2246_v34 = vld [vmem:[#allocation6 + $0x1e8] sm:$0xf]  ;;  %s2746_s23 = smov 11   ;;  %vm1692_vm12 = vcmask 72704  }
  0x5e   :  { %1036 = vmatpush.bf16.msra.mxu0 %v2063_v37  ;;  %v2528_v37 = vld [vmem:[#allocation6 + $0x184] sm:$0xf]  ;;  %vm1695_vm13 = vcmask 80896   ;;  %vm1698_vm14 = vcmask 89088   ;;  %vm1701_vm15 = vcmask 97280   ;;  %s1710_s1 = sshll.u32 %s2942_s9, 4  ;;  %s1711_s1 = int_to_ptr.hbm [resolvable:$true] %s1710_s1 }
  0x5f   :  { %v2195_v55 = vor.u32 %v2528_v37, %v2192_v39  ;;  %v2541_v37 = vld [vmem:[#allocation6 + $0x1ec] sm:$0xf] }
  0x60   :  { %1064 = vmatpush.bf16.msra.mxu2 %v2067_v38  ;;  %v2191_v38 = vor.u32 %v2530_v62, %v2190_v36  ;;  %v2543_v62 = vld [vmem:[#allocation6 + $0x1f4] sm:$0xf0] }
  0x61   :  { %1078 = vmatpush.bf16.msra.mxu3 %v2195_v55  ;;  %v2230_v55 = vld [vmem:[#allocation6 + $0x1c8] sm:$0xf] }
  0x62   :  { %1037 = vmatpush.bf16.msra.mxu0 %v2047_v41  ;;  %v2071_v41 = vor.u32 %v2499_v40, %v2070_v0  ;;  %1050 = vmatpush.bf16.msra.mxu1 %v2191_v38  ;;  %v2248_v38 = vld [vmem:[#allocation6 + $0x1f8] sm:$0xf0]  ;;  %v2247_v0 = vor.u32 %v2543_v62, %v2246_v34 }
  0x63   :  { %v2251_v40 = vor.u32 %v2541_v37, %v2248_v38  ;;  %v2136_v34 = vld [vmem:[#allocation6 + $0x118] sm:$0xf0] }
  0x64   :  { %1065 = vmatpush.bf16.msra.mxu2 %v2051_v59  ;;  %v2497_v59 = vld [vmem:[#allocation6 + $0x8c] sm:$0xf] }
  0x65   :  { %v2075_v43 = vor.u32 %v2497_v59, %v2072_v42  ;;  %v2537_v59 = vld [vmem:[#allocation6 + $0x1cc] sm:$0xf] }
  0x66   :  { %1038 = vmatpush.bf16.msra.mxu0 %v2031_v46  ;;  %v2524_v46 = vld [vmem:[#allocation6 + $0x164] sm:$0xf] }
  0x67   :  { %v2179_v51 = vor.u32 %v2524_v46, %v2176_v48  ;;  %v2854_v46 = vld [vmem:[%s2935_s2] sm:$0x3]  ;;  %s2747_s2 = smov [#allocation9]  }
  0x68   :  { %1066 = vmatpush.bf16.msra.mxu2 %v2035_v47  ;;  %v2175_v47 = vor.u32 %v2526_v45, %v2174_v44  ;;  %v2232_v45 = vld [vmem:[#allocation6 + $0x1d8] sm:$0xf0]  ;;  %s1708_s24 = sshll.u32 %s2747_s2, 4  ;;  %s1709_s24 = int_to_ptr.vmem [resolvable:$true] %s1708_s24 }
  0x69   :  { %1079 = vmatpush.bf16.msra.mxu3 %v2179_v51  ;;  %v2235_v48 = vor.u32 %v2537_v59, %v2232_v45  ;;  %v2535_v51 = vld [vmem:[#allocation6 + $0x1b4] sm:$0xf0] }
  0x6a   :  { %1039 = vmatpush.bf16.msra.mxu0 %v2015_v52  ;;  %v2055_v52 = vor.u32 %v2495_v50, %v2054_v49  ;;  %1051 = vmatpush.bf16.msra.mxu1 %v2175_v47  ;;  %v2214_v50 = vld [vmem:[#allocation6 + $0x1a8] sm:$0xf] }
  0x6c   :  { %1067 = vmatpush.bf16.msra.mxu2 %v2019_v53  ;;  %v2493_v53 = vld [vmem:[#allocation6 + $0x6c] sm:$0xf] }
  0x6d   :  { %v2059_v57 = vor.u32 %v2493_v53, %v2056_v54  ;;  %v629_v54 = vperm.slane %v2854_v46, 0 }
  0x6e   :  { %1040 = vmatpush.bf16.msra.mxu0 %v1999_v58  ;;  %v2522_v58 = vld [vmem:[#allocation6 + $0x14c] sm:$0xf0] }
  0x6f   :  { %v2159_v63 = vor.u32 %v2522_v58, %v2158_v56  ;;  %v2215_v56 = vor.u32 %v2535_v51, %v2214_v50  ;;  %v2551_v50 = vld [vmem:[#allocation8 + $0x38] sm:$0xff]  ;;  %v2550_v51 = vld [vmem:[#allocation8 + $0x30] sm:$0xff] }
  0x70   :  { %1068 = vmatpush.bf16.msra.mxu2 %v2003_v1  ;;  %v2163_v1 = vor.u32 %v2520_v60, %v2160_v61 }
  0x71   :  { %1052 = vmatpush.bf16.msra.mxu1 %v2159_v63 }
  0x72   :  { %1089 = vmatpush.bf16.msrb.mxu0 %v2119_v9  ;;  %1080 = vmatpush.bf16.msra.mxu3 %v2163_v1  ;;  %v2518_v9 = vld [vmem:[#allocation6 + $0x12c] sm:$0xf0]  ;;  %v2198_v1 = vld [vmem:[#allocation6 + $0x188] sm:$0xf] }
  0x73   :  { %v2199_v6 = vor.u32 %v2531_v2, %v2198_v1  ;;  %v2555_v1 = vld [vmem:[#allocation8 + $0x58] sm:$0xff] }
  0x74   :  { %1117 = vmatpush.bf16.msrb.mxu2 %v2123_v11  ;;  %v2143_v11 = vor.u32 %v2518_v9, %v2142_v8  ;;  %v2575_v2 = vld [vmem:[#allocation8 + $0xf8] sm:$0xff] }
  0x76   :  { %1090 = vmatpush.bf16.msrb.mxu0 %v2103_v20  ;;  %1053 = vmatpush.bf16.msra.mxu1 %v2143_v11  ;;  %v2527_v11 = vld [vmem:[#allocation6 + $0x174] sm:$0xf0] }
  0x77   :  { %1081 = vmatpush.bf16.msra.mxu3 %v2147_v16  ;;  %v2183_v14 = vor.u32 %v2527_v11, %v2182_v10  ;;  %v2573_v10 = vld [vmem:[#allocation8 + $0xe8] sm:$0xff]  ;;  %v2563_v11 = vld [vmem:[#allocation8 + $0x98] sm:$0xff] }
  0x78   :  { %1118 = vmatpush.bf16.msrb.mxu2 %v2107_v23  ;;  %v2514_v23 = vld [vmem:[#allocation6 + $0x10c] sm:$0xf0] }
  0x79   :  { %v2127_v25 = vor.u32 %v2514_v23, %v2126_v22  ;;  %v2150_v23 = vld [vmem:[#allocation6 + $0x128] sm:$0xf] }
  0x7a   :  { %1091 = vmatpush.bf16.msrb.mxu0 %v2087_v32  ;;  %v2481_v32 = vld [vmem:[#allocation6 + $0xc] sm:$0xf]  ;;  %v2151_v27 = vor.u32 %v2519_v24, %v2150_v23  ;;  %v703_v23 = vld [vmem:[%s2937_s4] sm:$0xf] }
  0x7b   :  { %1054 = vmatpush.bf16.msra.mxu1 %v2127_v25  ;;  %v2011_v36 = vor.u32 %v2481_v32, %v2008_v33  ;;  %1082 = vmatpush.bf16.msra.mxu3 %v2131_v30  ;;  %v2517_v25 = vld [vmem:[#allocation6 + $0x12c] sm:$0xf]  ;;  %v2515_v32 = vld [vmem:[#allocation6 + $0x114] sm:$0xf0] }
  0x7c   :  { %1119 = vmatpush.bf16.msrb.mxu2 %v2091_v35  ;;  %v2155_v30 = vor.u32 %v2517_v25, %v2152_v26  ;;  %v2513_v33 = vld [vmem:[#allocation6 + $0x10c] sm:$0xf]  ;;  %v705_v26 = vperm.slane %v703_v23, 0 }
  0x7e   :  { %1092 = vmatpush.bf16.msrb.mxu0 %v2071_v41  ;;  %v2539_v41 = vld [vmem:[#allocation6 + $0x1d4] sm:$0xf0] }
  0x7f   :  { %1103 = vmatpush.bf16.msrb.mxu1 %v2247_v0  ;;  %v2231_v44 = vor.u32 %v2539_v41, %v2230_v55  ;;  %1131 = vmatpush.bf16.msrb.mxu3 %v2251_v40 }
  0x80   :  { %1120 = vmatpush.bf16.msrb.mxu2 %v2075_v43 }
  0x82   :  { %1093 = vmatpush.bf16.msrb.mxu0 %v2055_v52  ;;  %v2533_v52 = vld [vmem:[#allocation6 + $0x1ac] sm:$0xf] }
  0x83   :  { %1104 = vmatpush.bf16.msrb.mxu1 %v2231_v44  ;;  %1132 = vmatpush.bf16.msrb.mxu3 %v2235_v48 }
  0x84   :  { %1121 = vmatpush.bf16.msrb.mxu2 %v2059_v57  ;;  %v2216_v57 = vld [vmem:[#allocation6 + $0x1b8] sm:$0xf0] }
  0x85   :  { %v2219_v60 = vor.u32 %v2533_v52, %v2216_v57  ;;  %v2559_v52 = vld [vmem:[#allocation8 + $0x78] sm:$0xff] }
  0x86   :  { %1094 = vmatpush.bf16.msrb.mxu0 %v2039_v5  ;;  %v2547_v57 = vld [vmem:[#allocation8 + $0x18] sm:$0xff] }
  0x87   :  { %1105 = vmatpush.bf16.msrb.mxu1 %v2215_v56  ;;  %1133 = vmatpush.bf16.msrb.mxu3 %v2219_v60  ;;  %v2557_v56 = vld [vmem:[#allocation8 + $0x68] sm:$0xff]  ;;  %v2556_v60 = vld [vmem:[#allocation8 + $0x60] sm:$0xff] }
  0x88   :  { %1122 = vmatpush.bf16.msrb.mxu2 %v2043_v7  ;;  %v2200_v7 = vld [vmem:[#allocation6 + $0x198] sm:$0xf0] }
  0x89   :  { %v2203_v8 = vor.u32 %v2529_v3, %v2200_v7  ;;  %v2545_v3 = vld [vmem:[#allocation8 + $0x8] sm:$0xff]  ;;  %v2544_v7 = vld [vmem:[#allocation8] sm:$0xff] }
  0x8a   :  { %1095 = vmatpush.bf16.msrb.mxu0 %v2023_v17  ;;  %v2166_v17 = vld [vmem:[#allocation6 + $0x148] sm:$0xf] }
  0x8b   :  { %1106 = vmatpush.bf16.msrb.mxu1 %v2199_v6  ;;  %1134 = vmatpush.bf16.msrb.mxu3 %v2203_v8  ;;  %v2574_v6 = vld [vmem:[#allocation8 + $0xf0] sm:$0xff]  ;;  %v2564_v8 = vld [vmem:[#allocation8 + $0xa0] sm:$0xff] }
  0x8c   :  { %1123 = vmatpush.bf16.msrb.mxu2 %v2027_v21  ;;  %v2167_v21 = vor.u32 %v2523_v18, %v2166_v17  ;;  %v2570_v18 = vld [vmem:[#allocation8 + $0xd0] sm:$0xff] }
  0x8e   :  { %1096 = vmatpush.bf16.msrb.mxu0 %v2007_v31  ;;  %v2134_v31 = vld [vmem:[#allocation6 + $0x108] sm:$0xf] }
  0x8f   :  { %1107 = vmatpush.bf16.msrb.mxu1 %v2183_v14  ;;  %v2562_v14 = vld [vmem:[#allocation8 + $0x90] sm:$0xff] }
  0x90   :  { %1124 = vmatpush.bf16.msrb.mxu2 %v2011_v36  ;;  %v2139_v36 = vor.u32 %v2513_v33, %v2136_v34 }
  0x93   :  { %1108 = vmatpush.bf16.msrb.mxu1 %v2167_v21 }
  0x97   :  { %1109 = vmatpush.bf16.msrb.mxu1 %v2151_v27 }
  0xae   :  { %v509_v15 = vpop.f32.mrf.mxu0 }
  0xaf   :  { %v523_v20 = vpop.f32.mrf.mxu1 }
  0xb0   :  { %v524_v29 = vadd.f32 %v523_v20, %v509_v15  ;;  %v2184_v15 = vld [vmem:[#allocation6 + $0x178] sm:$0xf0] }
  0xb1   :  { %v2187_v16 = vor.u32 %v2525_v12, %v2184_v15  ;;  %v2168_v20 = vld [vmem:[#allocation6 + $0x158] sm:$0xf0]  ;;  %v2552_v12 = vld [vmem:[#allocation8 + $0x40] sm:$0xff] }
  0xb2   :  { %v2171_v22 = vor.u32 %v2521_v19, %v2168_v20  ;;  %v2571_v15 = vld [vmem:[#allocation8 + $0xd8] sm:$0xff]  ;;  %v2560_v19 = vld [vmem:[#allocation8 + $0x80] sm:$0xff]  ;;  %v2569_v20 = vld [vmem:[#allocation8 + $0xc8] sm:$0xff] }
  0xb3   :  { %1135 = vmatpush.bf16.msrb.mxu3 %v2187_v16  ;;  %v2561_v16 = vld [vmem:[#allocation8 + $0x88] sm:$0xff] }
  0xb6   :  { %v537_v35 = vpop.f32.mrf.mxu2  ;;  %v511_v43 = vpop.f32.mrf.mxu0 }
  0xb7   :  { %v551_v39 = vpop.f32.mrf.mxu3  ;;  %v538_v42 = vadd.f32 %v537_v35, %v524_v29  ;;  %v525_v47 = vpop.f32.mrf.mxu1  ;;  %1136 = vmatpush.bf16.msrb.mxu3 %v2171_v22  ;;  %v2135_v35 = vor.u32 %v2515_v32, %v2134_v31  ;;  %v2568_v22 = vld [vmem:[#allocation8 + $0xc0] sm:$0xff]  ;;  %v706_v32 = vperm.slane %v703_v23, 1 }
  0xb8   :  { %v526_v49 = vadd.f32 %v525_v47, %v511_v43 }
  0xb9   :  { %v552_v53 = vadd.f32 %v551_v39, %v538_v42  ;;  %1110 = vmatpush.bf16.msrb.mxu1 %v2135_v35  ;;  %v630_v42 = vperm.slane %v2854_v46, 1  ;;  %v2548_v46 = vld [vmem:[#allocation8 + $0x20] sm:$0xff] }
  0xbb   :  { %v633_v4 = vadd.f32 %v629_v54, %v552_v53  ;;  %1137 = vmatpush.bf16.msrb.mxu3 %v2155_v30  ;;  %v2549_v53 = vld [vmem:[#allocation8 + $0x28] sm:$0xff] }
  0xbe   :  { %v539_v58 = vpop.f32.mrf.mxu2 }
  0xbf   :  { %v540_v61 = vadd.f32 %v539_v58, %v526_v49  ;;  %v553_v63 = vpop.f32.mrf.mxu3  ;;  %1138 = vmatpush.bf16.msrb.mxu3 %v2139_v36  ;;  %v2567_v58 = vld [vmem:[#allocation8 + $0xb8] sm:$0xff] }
  0xc1   :  { %v554_v5 = vadd.f32 %v553_v63, %v540_v61  ;;  %v2546_v61 = vld [vmem:[#allocation8 + $0x10] sm:$0xff] }
  0xc2   :  { %v2566_v63 = vld [vmem:[#allocation8 + $0xb0] sm:$0xff] }
  0xc3   :  { %v635_v9 = vadd.f32 %v629_v54, %v554_v5  ;;  %v2558_v54 = vld [vmem:[#allocation8 + $0x70] sm:$0xff] }
  0xc4   :  { %v2554_v5 = vld [vmem:[#allocation8 + $0x50] sm:$0xff] }
  0xc5   :  { %v637_v13 = vpack.c.bf16 %v635_v9, %v633_v4  ;;  %v2565_v4 = vld [vmem:[#allocation8 + $0xa8] sm:$0xff] }
  0xc6   :  { %v2553_v9 = vld [vmem:[#allocation8 + $0x48] sm:$0xff] }
  0xc7   :  { %1041 = vmatmul.bf16.vlgmr.msra.gmra.mxu0 %v637_v13  ;;  %1069 = vmatmul.bf16.vlgmr.msra.gmra.mxu2 %v637_v13 }
  0xc8   :  { %1409 = vmatpush.bf16.msra.mxu0 %v2551_v50  ;;  %1437 = vmatpush.bf16.msra.mxu2 %v2567_v58 }
  0xcc   :  { %1410 = vmatpush.bf16.msra.mxu0 %v2550_v51  ;;  %1438 = vmatpush.bf16.msra.mxu2 %v2566_v63  ;;  %v2581_v63 = vld [vmem:[%s2940_s7 + $0x28] sm:$0xff] }
  0xce   :  { %v565_v28 = vpop.f32.mrf.mxu0 }
  0xcf   :  { %v579_v29 = vpop.f32.mrf.mxu1 }
  0xd0   :  { %v580_v37 = vadd.f32 %v579_v29, %v565_v28  ;;  %1411 = vmatpush.bf16.msra.mxu0 %v2549_v53  ;;  %1439 = vmatpush.bf16.msra.mxu2 %v2565_v4  ;;  %v2577_v4 = vld [vmem:[%s2940_s7 + $0x8] sm:$0xff] }
  0xd4   :  { %1412 = vmatpush.bf16.msra.mxu0 %v2548_v46  ;;  %1440 = vmatpush.bf16.msra.mxu2 %v2564_v8 }
  0xd6   :  { %v593_v62 = vpop.f32.mrf.mxu2  ;;  %v567_v39 = vpop.f32.mrf.mxu0 }
  0xd7   :  { %v607_v38 = vpop.f32.mrf.mxu3  ;;  %1097 = vmatmul.bf16.vlgmr.msrb.gmra.mxu0 %v637_v13  ;;  %1125 = vmatmul.bf16.vlgmr.msrb.gmra.mxu2 %v637_v13  ;;  %v581_v0 = vpop.f32.mrf.mxu1  ;;  %v594_v40 = vadd.f32 %v593_v62, %v580_v37  ;;  %v2572_v13 = vld [vmem:[#allocation8 + $0xe0] sm:$0xff] }
  0xd8   :  { %v582_v55 = vadd.f32 %v581_v0, %v567_v39  ;;  %1413 = vmatpush.bf16.msra.mxu0 %v2547_v57  ;;  %1441 = vmatpush.bf16.msra.mxu2 %v2563_v11 }
  0xd9   :  { %v608_v59 = vadd.f32 %v607_v38, %v594_v40 }
  0xdb   :  { %v634_v47 = vadd.f32 %v630_v42, %v608_v59  ;;  %v707_v59 = vperm.slane %v703_v23, 2 }
  0xdc   :  { %1414 = vmatpush.bf16.msra.mxu0 %v2546_v61  ;;  %1442 = vmatpush.bf16.msra.mxu2 %v2562_v14  ;;  %v2582_v61 = vld [vmem:[%s2940_s7 + $0x30] sm:$0xff] }
  0xde   :  { %v595_v41 = vpop.f32.mrf.mxu2 }
  0xdf   :  { %v596_v43 = vadd.f32 %v595_v41, %v582_v55  ;;  %v609_v44 = vpop.f32.mrf.mxu3 }
  0xe0   :  { %1415 = vmatpush.bf16.msra.mxu0 %v2545_v3  ;;  %1443 = vmatpush.bf16.msra.mxu2 %v2561_v16  ;;  %v2578_v3 = vld [vmem:[%s2940_s7 + $0x10] sm:$0xff] }
  0xe1   :  { %v610_v45 = vadd.f32 %v609_v44, %v596_v43 }
  0xe3   :  { %v636_v48 = vadd.f32 %v630_v42, %v610_v45 }
  0xe4   :  { %1416 = vmatpush.bf16.msra.mxu0 %v2544_v7  ;;  %1444 = vmatpush.bf16.msra.mxu2 %v2560_v19 }
  0xe5   :  { %v638_v49 = vpack.c.bf16 %v636_v48, %v634_v47  ;;  %v708_v48 = vperm.slane %v703_v23, 3 }
  0xe7   :  { %1055 = vmatmul.bf16.vlgmr.msra.gmra.mxu1 %v638_v49  ;;  %1083 = vmatmul.bf16.vlgmr.msra.gmra.mxu3 %v638_v49 }
  0xe8   :  { %1423 = vmatpush.bf16.msra.mxu1 %v2559_v52  ;;  %1451 = vmatpush.bf16.msra.mxu3 %v2575_v2  ;;  %v2579_v2 = vld [vmem:[%s2940_s7 + $0x18] sm:$0xff] }
  0xec   :  { %1424 = vmatpush.bf16.msra.mxu1 %v2558_v54  ;;  %1452 = vmatpush.bf16.msra.mxu3 %v2574_v6 }
  0xf0   :  { %1425 = vmatpush.bf16.msra.mxu1 %v2557_v56  ;;  %1453 = vmatpush.bf16.msra.mxu3 %v2573_v10 }
  0xf4   :  { %1426 = vmatpush.bf16.msra.mxu1 %v2556_v60  ;;  %1454 = vmatpush.bf16.msra.mxu3 %v2572_v13  ;;  %v2583_v60 = vld [vmem:[%s2940_s7 + $0x38] sm:$0xff] }
  0xf5   :  { %1536 = vmatpush.bf16.msrb.mxu0 %v2583_v60 }
  0xf7   :  { %1111 = vmatmul.bf16.vlgmr.msrb.gmra.mxu1 %v638_v49  ;;  %1139 = vmatmul.bf16.vlgmr.msrb.gmra.mxu3 %v638_v49 }
  0xf8   :  { %1427 = vmatpush.bf16.msra.mxu1 %v2555_v1  ;;  %1455 = vmatpush.bf16.msra.mxu3 %v2571_v15  ;;  %v2580_v1 = vld [vmem:[%s2940_s7 + $0x20] sm:$0xff] }
  0xf9   :  { %1537 = vmatpush.bf16.msrb.mxu0 %v2582_v61 }
  0xfc   :  { %1428 = vmatpush.bf16.msra.mxu1 %v2554_v5  ;;  %1456 = vmatpush.bf16.msra.mxu3 %v2570_v18  ;;  %v2576_v5 = vld [vmem:[%s2940_s7] sm:$0xff] }
  0xfd   :  { %1538 = vmatpush.bf16.msrb.mxu0 %v2581_v63 }
 0x100   :  { %1429 = vmatpush.bf16.msra.mxu1 %v2553_v9  ;;  %1457 = vmatpush.bf16.msra.mxu3 %v2569_v20  ;;  %v2600_v9 = vld [vmem:[%s2939_s6] ss:$0 sm:$0xff]  ;;  %s2741_s6 = smov 125  }
 0x101   :  { %1539 = vmatpush.bf16.msrb.mxu0 %v2580_v1 }
 0x104   :  { %1430 = vmatpush.bf16.msra.mxu1 %v2552_v12  ;;  %1458 = vmatpush.bf16.msra.mxu3 %v2568_v22 }
 0x105   :  { %1540 = vmatpush.bf16.msrb.mxu0 %v2579_v2 }
 0x109   :  { %1541 = vmatpush.bf16.msrb.mxu0 %v2578_v3 }
 0x10d   :  { %1542 = vmatpush.bf16.msrb.mxu0 %v2577_v4 }
 0x111   :  { %1543 = vmatpush.bf16.msrb.mxu0 %v2576_v5 }
 0x144   :  { %v1042_v17 = vpop.f32.mrf.mxu0 }
 0x145   :  { %v1043_v29 = vadd.f32 %v1042_v17, %v705_v26 }
 0x14a   :  { %v1070_v21 = vpop.f32.mrf.mxu2 }
 0x14b   :  { %v1071_v62 = vadd.f32 %v1070_v21, %v706_v32 }
 0x14c   :  { %v1044_v24 = vpop.f32.mrf.mxu0 }
 0x14d   :  { %v1045_v30 = vadd.f32 %v1044_v24, %v705_v26  ;;  %v2601_v26 = vld [vmem:[%s2941_s8] ss:$0 sm:$0xff]  ;;  %s2742_s8 = smov 126  }
 0x152   :  { %v1072_v27 = vpop.f32.mrf.mxu2 }
 0x153   :  { %v1073_v37 = vadd.f32 %v1072_v27, %v706_v32 }
 0x154   :  { %v1098_v35 = vpop.f32.mrf.mxu0 }
 0x155   :  { %v1099_v44 = vadd.f32 %v1098_v35, %v707_v59 }
 0x15a   :  { %v1126_v40 = vpop.f32.mrf.mxu2 }
 0x15b   :  { %v1127_v53 = vadd.f32 %v1126_v40, %v708_v48 }
 0x15c   :  { %v1100_v42 = vpop.f32.mrf.mxu0 }
 0x15d   :  { %v1101_v45 = vadd.f32 %v1100_v42, %v707_v59 }
 0x162   :  { %v1128_v51 = vpop.f32.mrf.mxu2 }
 0x163   :  { %v1129_v54 = vadd.f32 %v1128_v51, %v708_v48 }
 0x164   :  { %v1056_v25 = vpop.f32.mrf.mxu1 }
 0x165   :  { %v1057_v33 = vadd.f32 %v1056_v25, %v1043_v29 }
 0x16a   :  { %v1084_v28 = vpop.f32.mrf.mxu3 }
 0x16b   :  { %v1085_v39 = vadd.f32 %v1084_v28, %v1071_v62 }
 0x16c   :  { %v1058_v31 = vpop.f32.mrf.mxu1 }
 0x16d   :  { %v1059_v34 = vadd.f32 %v1058_v31, %v1045_v30 }
 0x16f   :  { %v1145_v36 = vpack.c.bf16 %v1059_v34, %v1057_v33 }
 0x171   :  { %1417 = vmatmul.bf16.vlgmr.msra.gmra.mxu0 %v1145_v36 }
 0x172   :  { %v1086_v38 = vpop.f32.mrf.mxu3 }
 0x173   :  { %v1087_v0 = vadd.f32 %v1086_v38, %v1073_v37 }
 0x174   :  { %v1112_v55 = vpop.f32.mrf.mxu1 }
 0x175   :  { %v1146_v41 = vpack.c.bf16 %v1087_v0, %v1085_v39  ;;  %v1113_v49 = vadd.f32 %v1112_v55, %v1099_v44 }
 0x177   :  { %1431 = vmatmul.bf16.vlgmr.msra.gmra.mxu1 %v1146_v41 }
 0x17a   :  { %v1140_v43 = vpop.f32.mrf.mxu3 }
 0x17b   :  { %v1141_v56 = vadd.f32 %v1140_v43, %v1127_v53 }
 0x17c   :  { %v1114_v47 = vpop.f32.mrf.mxu1 }
 0x17d   :  { %v1115_v50 = vadd.f32 %v1114_v47, %v1101_v45 }
 0x17f   :  { %v1147_v52 = vpack.c.bf16 %v1115_v50, %v1113_v49 }
 0x181   :  { %1445 = vmatmul.bf16.vlgmr.msra.gmra.mxu2 %v1147_v52 }
 0x182   :  { %v1142_v46 = vpop.f32.mrf.mxu3 }
 0x183   :  { %v1143_v57 = vadd.f32 %v1142_v46, %v1129_v54 }
 0x185   :  { %v1148_v58 = vpack.c.bf16 %v1143_v57, %v1141_v56 }
 0x187   :  { %1459 = vmatmul.bf16.vlgmr.msra.gmra.mxu3 %v1148_v58 }
 0x1ee   :  { %v1418_v6 = vpop.f32.mrf.mxu0 }
 0x1ef   :  { %v1419_v12 = vadd.f32 %v2600_v9, %v1418_v6 }
 0x1f4   :  { %v1432_v7 = vpop.f32.mrf.mxu1 }
 0x1f5   :  { %v1433_v14 = vadd.f32 %v1432_v7, %v1419_v12 }
 0x1f6   :  { %v1420_v10 = vpop.f32.mrf.mxu0 }
 0x1f7   :  { %v1421_v15 = vadd.f32 %v2600_v9, %v1420_v10 }
 0x1fc   :  { %v1434_v13 = vpop.f32.mrf.mxu1 }
 0x1fd   :  { %v1435_v17 = vadd.f32 %v1434_v13, %v1421_v15 }
 0x204   :  { %v1446_v8 = vpop.f32.mrf.mxu2 }
 0x205   :  { %v1447_v18 = vadd.f32 %v1446_v8, %v1433_v14 }
 0x20a   :  { %v1460_v11 = vpop.f32.mrf.mxu3 }
 0x20b   :  { %v1461_v19 = vadd.f32 %v1460_v11, %v1447_v18 }
 0x20c   :  { %v1448_v16 = vpop.f32.mrf.mxu2 }
 0x20d   :  { %v1449_v20 = vadd.f32 %v1448_v16, %v1435_v17  ;;  %v1465_v23 = vmax.f32 %v1461_v19, 0.0 }
 0x212   :  { %v1462_v21 = vpop.f32.mrf.mxu3 }
 0x213   :  { %v1463_v22 = vadd.f32 %v1462_v21, %v1449_v20 }
 0x215   :  { %v1466_v24 = vmax.f32 %v1463_v22, 0.0 }
 0x217   :  { %v1467_v25 = vpack.c.bf16 %v1466_v24, %v1465_v23 }
 0x219   :  { %1544 = vmatmul.bf16.vlgmr.msrb.gmra.mxu0 %v1467_v25 }
 0x296   :  { %v1545_v27 = vpop.f32.mrf.mxu0 }
 0x297   :  { %v2891_v28 = vadd.f32 %v2601_v26, %v1545_v27 }
 0x299   :  { %v1550_v29 = vand.u32 2147483647, %v2891_v28  ;;  %v1594_v41 = vmax.f32 %v2891_v28, 0.0  ;;  %vm1558_vm9 = vcmp.ge.f32.partialorder %v2891_v28, 0.0 }
 0x29b   :  { %v1552_v30 = vsub.f32 0.0, %v1550_v29 }
 0x29d   :  { %v1554_v31 = vmul.f32 1.442695, %v1552_v30 }
 0x29e   :  { %v1547_v32 = vpop.f32.mrf.mxu0 }
 0x29f   :  { %2602 = vpow2.f32 %v1554_v31  ;;  %v2894_v33 = vadd.f32 %v2601_v26, %v1547_v32 }
 0x2a1   :  { %v1551_v34 = vand.u32 2147483647, %v2894_v33  ;;  %v1595_v50 = vmax.f32 %v2894_v33, 0.0  ;;  %vm1559_vm8 = vcmp.ge.f32.partialorder %v2894_v33, 0.0 }
 0x2a3   :  { %v1553_v35 = vsub.f32 0.0, %v1551_v34 }
 0x2a5   :  { %v2897_v36 = vpop.eup %2602  ;;  %v1556_v62 = vmul.f32 1.442695, %v1553_v35 }
 0x2a6   :  { %v1562_v37 = vadd.f32 1.0, %v2897_v36  ;;  %v1560_v11 = vsel %vm1558_vm9, 1.0, %v2897_v36 }
 0x2a7   :  { %2604 = vpow2.f32 %v1556_v62 }
 0x2a8   :  { %2606 = vrcp.f32 %v1562_v37  ;;  %vm1569_vm2 = vweird.f32 %v1562_v37  ;;  %v1575_v61 = vand.u32 2147483648, %v1562_v37  ;;  %v1573_v2 = vand.u32 2147483647, %v1562_v37 }
 0x2a9   :  { %2608 = vlog2.f32 %v1562_v37 }
 0x2aa   :  { %v1576_v6 = vor.u32 1.1754944e-38, %v1575_v61  ;;  %vm1574_vm7 = vcmp.eq.f32.partialorder %v1573_v2, 8.507059e+37 }
 0x2ad   :  { %v2605_v38 = vpop.eup %2604 }
 0x2ae   :  { %v2607_v39 = vpop.eup %2606  ;;  %v1563_v0 = vadd.f32 1.0, %v2605_v38  ;;  %v1561_v9 = vsel %vm1559_vm8, 1.0, %v2605_v38 }
 0x2af   :  { %v2609_v40 = vpop.eup %2608  ;;  %v1565_v55 = vmul.f32 %v2607_v39, %v1562_v37  ;;  %vm1570_vm0 = vweird.f32 %v2607_v39 }
 0x2b0   :  { %v1597_v59 = vmul.f32 0.6931472, %v2609_v40  ;;  %2610 = vrcp.f32 %v1563_v0  ;;  %v1590_v54 = vand.u32 2147483648, %v1563_v0  ;;  %v1588_v60 = vand.u32 2147483647, %v1563_v0  ;;  %vm2902_vm4 = vmor %vm1569_vm2, %vm1570_vm0 }
 0x2b1   :  { %2612 = vlog2.f32 %v1563_v0  ;;  %v1566_v43 = vsub.f32 1.0, %v1565_v55  ;;  %vm1584_vm3 = vweird.f32 %v1563_v0 }
 0x2b2   :  { %v1600_v42 = vadd.f32 %v1597_v59, %v1594_v41  ;;  %v1591_v4 = vor.u32 1.1754944e-38, %v1590_v54  ;;  %vm1589_vm6 = vcmp.eq.f32.partialorder %v1588_v60, 8.507059e+37 }
 0x2b3   :  { %v1567_v49 = vmul.f32 %v2607_v39, %v1566_v43 }
 0x2b4   :  { %v1602_v44 = vsub.f32 0.0, %v1600_v42 }
 0x2b5   :  { %v1568_v57 = vadd.f32 %v2607_v39, %v1567_v49 }
 0x2b6   :  { %v2611_v45 = vpop.eup %2610  ;;  %1634 = vrot.lane.b32.xlu2 %v1602_v44, %s2741_s6  ;;  %1622 = vrot.lane.b32.xlu1 %v1602_v44, %s2742_s8  ;;  %v1604_v56 = vmul.f32 1.442695, %v1602_v44 }
 0x2b7   :  { %v2613_v47 = vpop.eup %2612  ;;  %1610 = vrot.lane.b32.xlu0 %v1602_v44, %s2743_s3  ;;  %v1580_v48 = vmul.f32 %v2611_v45, %v1563_v0  ;;  %vm1585_vm1 = vweird.f32 %v2611_v45  ;;  %v1572_v5 = vsel %vm2902_vm4, %v2607_v39, %v1568_v57 }
 0x2b8   :  { %v1599_v51 = vmul.f32 0.6931472, %v2613_v47  ;;  %vm1586_vm5 = vmor %vm1584_vm3, %vm1585_vm1  ;;  %2614 = vpow2.f32 %v1604_v56  ;;  %v1577_v8 = vsel %vm1574_vm7, %v1576_v6, %v1572_v5 }
 0x2b9   :  { %v1581_v52 = vsub.f32 1.0, %v1580_v48  ;;  %v1578_v14 = vmul.f32 %v1577_v8, %v1560_v11 }
 0x2ba   :  { %v1601_v53 = vadd.f32 %v1599_v51, %v1595_v50 }
 0x2bb   :  { %v1582_v46 = vmul.f32 %v2611_v45, %v1581_v52 }
 0x2bc   :  { %v1603_v58 = vsub.f32 0.0, %v1601_v53 }
 0x2bd   :  { %v1583_v63 = vadd.f32 %v2611_v45, %v1582_v46 }
 0x2be   :  { %1636 = vrot.lane.b32.xlu2 %v1603_v58, %s2741_s6  ;;  %1624 = vrot.lane.b32.xlu1 %v1603_v58, %s2742_s8  ;;  %v1606_v12 = vmul.f32 1.442695, %v1603_v58  ;;  %v2615_v13 = vpop.eup %2614 }
 0x2bf   :  { %1612 = vrot.lane.b32.xlu0 %v1603_v58, %s2743_s3  ;;  %v1587_v3 = vsel %vm1586_vm5, %v2611_v45, %v1583_v63 }
 0x2c0   :  { %v1592_v7 = vsel %vm1589_vm6, %v1591_v4, %v1587_v3  ;;  %2616 = vpow2.f32 %v1606_v12 }
 0x2c1   :  { %v1593_v10 = vmul.f32 %v1592_v7, %v1561_v9 }
 0x2c6   :  { %1650 = vrot.lane.b32.xlu1 %v1593_v10, %s2740_s27  ;;  %1656 = vrot.lane.b32.xlu2 %v2615_v13, %s2737_s22  ;;  %v2617_v15 = vpop.eup %2616 }
 0x2c7   :  { %1648 = vrot.lane.b32.xlu0 %v1578_v14, %s2740_s27  ;;  %s2744_s27 = smov 9  }
 0x2cf   :  { %1658 = vrot.lane.b32.xlu0 %v2617_v15, %s2737_s22 }
 0x310   :  { %v1635_v19 = vpop.permute.xlu2 %1634 }
 0x318   :  { %v1637_v30 = vpop.permute.xlu2 %1636 }
 0x320   :  { %v1657_v55 = vpop.permute.xlu2 %1656 }
 0x328   :  { %v1623_v16 = vpop.permute.xlu1 %1622 }
 0x329   :  { %v1611_v17 = vpop.permute.xlu0 %1610 }
 0x32a   :  { %v1616_v18 = vadd.f32 %v1611_v17, %v1602_v44 }
 0x32c   :  { %v1618_v20 = vmul.f32 1.442695, %v1616_v18  ;;  %v1628_v21 = vadd.f32 %v1623_v16, %v1616_v18 }
 0x32e   :  { %2618 = vpow2.f32 %v1618_v20  ;;  %v1630_v22 = vmul.f32 1.442695, %v1628_v21  ;;  %v1640_v32 = vadd.f32 %v1635_v19, %v1628_v21 }
 0x330   :  { %2620 = vpow2.f32 %v1630_v22  ;;  %v1625_v25 = vpop.permute.xlu1 %1624  ;;  %v1642_v62 = vmul.f32 1.442695, %v1640_v32 }
 0x331   :  { %v1613_v23 = vpop.permute.xlu0 %1612 }
 0x332   :  { %v1617_v24 = vadd.f32 %v1613_v23, %v1603_v58 }
 0x334   :  { %v2619_v26 = vpop.eup %2618  ;;  %v1620_v27 = vmul.f32 1.442695, %v1617_v24  ;;  %v1629_v29 = vadd.f32 %v1625_v25, %v1617_v24 }
 0x335   :  { %1664 = vrot.lane.b32.xlu1 %v2619_v26, %s2744_s27 }
 0x336   :  { %v2621_v31 = vpop.eup %2620  ;;  %2622 = vpow2.f32 %v1620_v27  ;;  %v1632_v34 = vmul.f32 1.442695, %v1629_v29  ;;  %v1641_v35 = vadd.f32 %v1637_v30, %v1629_v29 }
 0x337   :  { %1672 = vrot.lane.b32.xlu0 %v2621_v31, %s2745_s0 }
 0x338   :  { %2624 = vpow2.f32 %v1632_v34  ;;  %v1644_v36 = vmul.f32 1.442695, %v1641_v35  ;;  %v1651_v41 = vpop.permute.xlu1 %1650 }
 0x339   :  { %v1649_v40 = vpop.permute.xlu0 %1648 }
 0x33a   :  { %2626 = vpow2.f32 %v1644_v36  ;;  %v1687_v43 = vsel %vm1686_vm10, %v2891_v28, %v1649_v40  ;;  %v1688_v28 = vsel %vm1686_vm10, %v2894_v33, %v1651_v41 }
 0x33b   :  { %2628 = vpow2.f32 %v1642_v62  ;;  %v1690_v45 = vsel %vm1689_vm11, %v1687_v43, %v1657_v55 }
 0x33c   :  { %v2623_v37 = vpop.eup %2622 }
 0x33d   :  { %1666 = vrot.lane.b32.xlu2 %v2623_v37, %s2744_s27 }
 0x33e   :  { %v2625_v38 = vpop.eup %2624 }
 0x33f   :  { %1674 = vrot.lane.b32.xlu1 %v2625_v38, %s2745_s0 }
 0x340   :  { %v2627_v39 = vpop.eup %2626 }
 0x341   :  { %1682 = vrot.lane.b32.xlu0 %v2627_v39, %s2746_s23  ;;  %v2629_v0 = vpop.eup %2628  ;;  %v1659_v42 = vpop.permute.xlu0 %1658 }
 0x342   :  { %v1691_v52 = vsel %vm1689_vm11, %v1688_v28, %v1659_v42 }
 0x345   :  { %1680 = vrot.lane.b32.xlu2 %v2629_v0, %s2746_s23 }
 0x397   :  { %v1667_v59 = vpop.permute.xlu2 %1666 }
 0x398   :  { %v1694_v53 = vsel %vm1692_vm12, %v1691_v52, %v1667_v59 }
 0x39f   :  { %v1681_v49 = vpop.permute.xlu2 %1680 }
 0x3a7   :  { %v1665_v44 = vpop.permute.xlu1 %1664 }
 0x3a8   :  { %v1693_v47 = vsel %vm1692_vm12, %v1690_v45, %v1665_v44 }
 0x3a9   :  { %v1673_v48 = vpop.permute.xlu0 %1672 }
 0x3aa   :  { %v1696_v50 = vsel %vm1695_vm13, %v1693_v47, %v1673_v48 }
 0x3ab   :  { %v1699_v51 = vsel %vm1698_vm14, %v1696_v50, %v1681_v49 }
 0x3ac   :  { %1702 = vst.msk [vmem:[#allocation9] sm:$0xff] %vm1701_vm15, %v1699_v51 }
 0x3b1   :  { %v1675_v54 = vpop.permute.xlu1 %1674 }
 0x3b2   :  { %v1697_v46 = vsel %vm1695_vm13, %v1694_v53, %v1675_v54 }
 0x3b3   :  { %v1683_v56 = vpop.permute.xlu0 %1682 }
 0x3b4   :  { %v1700_v57 = vsel %vm1698_vm14, %v1697_v46, %v1683_v56 }
 0x3b5   :  { %1703 = vst.msk [vmem:[#allocation9 + $0x8] sm:$0xff] %vm1701_vm15, %v1700_v57 }
 0x3b6   :  { %1716 = dma.vmem_to_hbm [thread:$0]  %s1709_s24, 256, %s1711_s1, [#allocation5], %s2736_s21, %s2736_s21, %s2737_s22  }
 0x3b7   :  { %2730 = dma.done.wait [#allocation5], 256  }
 0x3b8   :  { %2731 = vsyncadd [#allocation5], 4294967040 }
 0x3b9   :  { %1721 = vsyncpa [#allocation4], 1 }
 0x3ba   :  { %1722 = vsyncpa [#allocation7], 1 }
 0x3bb   :  { %1723 = vsyncpa [#allocation5], 1 }

</bundles_post_ra>
